<compile_context>
chip_gen: v7x
topology: tpu7x:2x2x1
jax: 0.10.0
libtpu: 0.0.40
codegen_flags: <defaults>
</compile_context>

<pallas_src>
import jax
import jax.numpy as jnp
from jax.experimental import pallas as pl
from jax.experimental.pallas import tpu as pltpu

LANE = 128


def _round_up(x, m):
    return ((x + m - 1) // m) * m


def _vmem_padded_bytes(shape, dtype):
    """Lane/sublane-padding-aware VMEM footprint of one buffer."""
    itemsize = jnp.dtype(dtype).itemsize
    shape = tuple(int(s) for s in shape)
    if len(shape) == 1:
        shape = (1,) + shape
    sub_granule = max(8, 32 // itemsize)          # f32: 8, bf16: 16
    lane = _round_up(shape[-1], LANE)
    sub = _round_up(shape[-2], sub_granule)
    lead = 1
    for s in shape[:-2]:
        lead *= s
    return lead * sub * lane * itemsize


def _seg_head_kernel(xb_ref, xt_ref, xbm_ref, s1_ref, sh1_ref, w1_ref,
                     s2_ref, sh2_ref, w2_ref, b2_ref, o_ref, apad_ref):
    """One (batch n, row-tile t) grid point.

    xb_ref  : (TH, W, Cin)        bf16 this tile's rows
    xt_ref  : (1, W, Cin)         bf16 row above the tile (clamped at edge)
    xbm_ref : (1, W, Cin)         bf16 row below the tile (clamped at edge)
    s1/sh1  : (1, Cin)            f32  folded BN1 scale / shift
    w1_ref  : (9*Cin_p, Cint_p)   bf16 3x3 conv taps, rows ordered (dy, dx, c)
    s2/sh2  : (1, Cint_p)         f32  folded BN2 scale / shift
    w2_ref  : (Cint_p, Cout_p)    bf16 1x1 conv
    b2_ref  : (1, Cout_p)         f32  bias
    o_ref   : (TH*W, Cout_p)      bf16 lane-dense output slab for this tile
    apad_ref: (TH+2, W+2, Cin_p)  bf16 scratch: relu(bn1(x)) with 1-px halo
    """
    t = pl.program_id(1)
    n_t = pl.num_programs(1)
    th, w, cin = xb_ref.shape
    cin_p = apad_ref.shape[-1]
    cdt = apad_ref.dtype                                    # bf16

    s1 = s1_ref[...]
    sh1 = sh1_ref[...]

    def bn1_relu(rows):                                     # bf16 -> f32 BN -> bf16
        r = rows.astype(jnp.float32)
        return jnp.maximum(r * s1 + sh1, 0.0).astype(cdt)

    # Refresh only the scratch regions NOT overwritten below: the 1-px
    # left/right halo columns and the padded channel lanes.  The interior
    # valid-channel region and the top/bottom halo rows are fully written
    # every tile, so re-zeroing them would be redundant vst traffic.  This is
    # done every tile (scratch is per-core and persists across grid steps, so
    # a "first grid step only" init would break under megacore sharding).
    zcol = jnp.zeros((th + 2, 1, cin_p), cdt)
    apad_ref[:, pl.ds(0, 1), :] = zcol
    apad_ref[:, pl.ds(w + 1, 1), :] = zcol
    if cin < cin_p:
        apad_ref[:, :, pl.ds(cin, cin_p - cin)] = jnp.zeros(
            (th + 2, w + 2, cin_p - cin), cdt)

    # Interior rows: BN1 + ReLU of this tile's TH rows.
    apad_ref[pl.ds(1, th), pl.ds(1, w), pl.ds(0, cin)] = bn1_relu(xb_ref[...])

    # Top / bottom halo rows: neighbour tile's edge row, or zeros at the image
    # boundary (conv pad=1 semantics).  Both branches write, so stale rows
    # from the previous grid step can never leak in.
    @pl.when(t > 0)
    def _():
        apad_ref[pl.ds(0, 1), pl.ds(1, w), pl.ds(0, cin)] = bn1_relu(xt_ref[...])

    @pl.when(t == 0)
    def _():
        apad_ref[pl.ds(0, 1), pl.ds(1, w), pl.ds(0, cin)] = jnp.zeros(
            (1, w, cin), cdt)

    @pl.when(t < n_t - 1)
    def _():
        apad_ref[pl.ds(th + 1, 1), pl.ds(1, w), pl.ds(0, cin)] = bn1_relu(
            xbm_ref[...])

    @pl.when(t == n_t - 1)
    def _():
        apad_ref[pl.ds(th + 1, 1), pl.ds(1, w), pl.ds(0, cin)] = jnp.zeros(
            (1, w, cin), cdt)

    # Single-pass im2col: 9 lane-aligned (128-multiple) channel chunks ordered
    # (dy, dx, c) to match w1's row layout -> ONE fused MXU matmul.
    a = apad_ref[...]                                       # (th+2, w+2, cin_p)
    chunks = [a[dy:dy + th, dx:dx + w, :]
              for dy in range(3) for dx in range(3)]
    im2col = jnp.concatenate(chunks, axis=-1).reshape(th * w, 9 * cin_p)

    acc = jnp.dot(im2col, w1_ref[...],
                  preferred_element_type=jnp.float32)       # (th*w, Cint_p) f32

    # BN2 + ReLU epilogue (f32), then the 1x1 conv + bias as a dense matmul.
    a2 = jnp.maximum(acc * s2_ref[...] + sh2_ref[...], 0.0)
    out = jnp.dot(a2.astype(cdt), w2_ref[...],
                  preferred_element_type=jnp.float32) + b2_ref[...]
    o_ref[...] = out.astype(o_ref.dtype)                    # bf16 writeback


def segmentation_head_forward(x_nchw, params, scale_factor=None, eps=1e-5,
                              max_tile_elems=2048):
    """Matches SegmentationHead.forward (eval-mode BN).  Input/output NCHW."""
    N, Cin, H, W = x_nchw.shape

    # bf16 NHWC input: halves HBM read and streamed VMEM; BN1 math stays f32.
    x = jnp.transpose(x_nchw, (0, 2, 3, 1)).astype(jnp.bfloat16)

    Cin_p = _round_up(Cin, LANE)

    # Fold eval-mode BatchNorm into per-channel scale / shift (f32).
    s1 = params["bn1_gamma"] / jnp.sqrt(params["bn1_var"] + eps)
    sh1 = params["bn1_beta"] - params["bn1_mean"] * s1
    s2 = params["bn2_gamma"] / jnp.sqrt(params["bn2_var"] + eps)
    sh2 = params["bn2_beta"] - params["bn2_mean"] * s2

    # conv1 (3x3, OIHW) -> one fused (9*Cin_p, Cint_p) bf16 matrix, rows=(dy,dx,c).
    w1 = params["conv1_w"]
    Cint = w1.shape[0]
    Cint_p = _round_up(Cint, LANE)
    w1_t = jnp.transpose(w1, (2, 3, 1, 0))                          # (3,3,Cin,Cint)
    w1_t = jnp.pad(w1_t, ((0, 0), (0, 0), (0, Cin_p - Cin), (0, Cint_p - Cint)))
    w1_mat = w1_t.reshape(9 * Cin_p, Cint_p).astype(jnp.bfloat16)

    # conv2 (1x1) -> (Cint_p, Cout_p) bf16 matrix + f32 bias.
    w2 = params["conv2_w"]
    Cout = w2.shape[0]
    Cout_p = _round_up(Cout, LANE)
    w2_mat = jnp.pad(jnp.transpose(w2.reshape(Cout, Cint), (1, 0)),
                     ((0, Cint_p - Cint), (0, Cout_p - Cout))).astype(jnp.bfloat16)

    s1r = s1.reshape(1, Cin).astype(jnp.float32)
    sh1r = sh1.reshape(1, Cin).astype(jnp.float32)
    s2p = jnp.pad(s2, (0, Cint_p - Cint)).reshape(1, Cint_p).astype(jnp.float32)
    sh2p = jnp.pad(sh2, (0, Cint_p - Cint)).reshape(1, Cint_p).astype(jnp.float32)
    b2p = jnp.pad(params["conv2_b"],
                  (0, Cout_p - Cout)).reshape(1, Cout_p).astype(jnp.float32)

    # ---- VMEM-aware row-tile selection (lane-padding-aware estimate) -------
    def tile_vmem_bytes(th):
        bf, f32 = jnp.bfloat16, jnp.float32
        return (2 * _vmem_padded_bytes((th, W, Cin), bf)            # x body (x2 bufs)
                + 4 * _vmem_padded_bytes((1, W, Cin), bf)           # 2 halo rows (x2)
                + 2 * _vmem_padded_bytes((th * W, Cout_p), bf)      # out slab (x2)
                + _vmem_padded_bytes((9 * Cin_p, Cint_p), bf)       # w1 (Buffered(1))
                + _vmem_padded_bytes((Cint_p, Cout_p), bf)          # w2 (Buffered(1))
                + 2 * _vmem_padded_bytes((1, Cin), f32)
                + 2 * _vmem_padded_bytes((1, Cint_p), f32)
                + _vmem_padded_bytes((1, Cout_p), f32)
                + _vmem_padded_bytes((th + 2, W + 2, Cin_p), bf)    # halo scratch
                + 2 * _vmem_padded_bytes((th * W, 9 * Cin_p), bf)   # im2col + temps
                + _vmem_padded_bytes((th * W, Cint_p), f32)         # conv1 f32 acc
                + _vmem_padded_bytes((th * W, Cint_p), bf)          # bn2 operand
                + _vmem_padded_bytes((th * W, Cout_p), f32)         # conv2 f32 result
                + (2 << 20))                                        # slack

    try:   # generation-aware cap (64 MiB on v7x, 128 MiB on v5e/v6e)
        vmem_cap = int(getattr(pltpu.get_tpu_info(), "vmem_capacity_bytes",
                               64 << 20))
    except Exception:  # pragma: no cover - conservative fallback
        vmem_cap = 64 << 20
    vmem_budget = int(vmem_cap * 4 // 5)          # leave compiler headroom

    TH = 1
    for d in range(1, H + 1):                     # largest divisor of H that fits
        if (H % d == 0 and d * W <= max(max_tile_elems, W)
                and tile_vmem_bytes(d) <= vmem_budget):
            TH = d
    n_th = H // TH
    vmem_limit = int(min(vmem_budget, max(tile_vmem_bytes(TH), 32 << 20)))

    body_spec = pl.BlockSpec((None, TH, W, Cin), lambda n, t: (n, t, 0, 0))
    top_spec = pl.BlockSpec(
        (None, 1, W, Cin),
        lambda n, t: (n, jnp.maximum(t * TH - 1, 0), 0, 0))
    bot_spec = pl.BlockSpec(
        (None, 1, W, Cin),
        lambda n, t: (n, jnp.minimum((t + 1) * TH, H - 1), 0, 0))

    def const_spec(shape):     # grid-invariant operand: single-buffered
        return pl.BlockSpec(shape, lambda n, t: (0,) * len(shape),
                            pipeline_mode=pl.Buffered(1))

    out_bf16 = pl.pallas_call(
        _seg_head_kernel,
        out_shape=jax.ShapeDtypeStruct((N, n_th, TH * W, Cout_p), jnp.bfloat16),
        grid_spec=pltpu.PrefetchScalarGridSpec(
            num_scalar_prefetch=0,
            grid=(N, n_th),
            in_specs=[
                body_spec, top_spec, bot_spec,
                const_spec((1, Cin)),              # s1
                const_spec((1, Cin)),              # sh1
                const_spec((9 * Cin_p, Cint_p)),   # w1
                const_spec((1, Cint_p)),           # s2
                const_spec((1, Cint_p)),           # sh2
                const_spec((Cint_p, Cout_p)),      # w2
                const_spec((1, Cout_p)),           # b2
            ],
            out_specs=pl.BlockSpec((None, None, TH * W, Cout_p),
                                   lambda n, t: (n, t, 0, 0)),
            scratch_shapes=[pltpu.VMEM((TH + 2, W + 2, Cin_p), jnp.bfloat16)],
        ),
        compiler_params=pltpu.CompilerParams(
            dimension_semantics=("parallel", "parallel"),
            vmem_limit_bytes=vmem_limit),
    )(x, x, x, s1r, sh1r, w1_mat, s2p, sh2p, w2_mat, b2p)

    # Lane-dense bf16 kernel output -> slice real channels, upcast, NCHW.
    out = out_bf16.reshape(N, H, W, Cout_p)[..., :Cout].astype(jnp.float32)
    out = jnp.transpose(out, (0, 3, 1, 2))
    if scale_factor is not None:
        out = jax.image.resize(
            out, (N, Cout, H * scale_factor, W * scale_factor), method="bilinear")
    return out


def _reference(x_nchw, params, scale_factor=None, eps=1e-5):
    """Pure-JAX f32 reference mirroring the PyTorch forward (eval-mode BN)."""
    s1 = params["bn1_gamma"] / jnp.sqrt(params["bn1_var"] + eps)
    sh1 = params["bn1_beta"] - params["bn1_mean"] * s1
    a = jax.nn.relu(x_nchw * s1[None, :, None, None] + sh1[None, :, None, None])
    y = jax.lax.conv_general_dilated(
        a, params["conv1_w"], (1, 1), ((1, 1), (1, 1)),
        dimension_numbers=("NCHW", "OIHW", "NCHW"))
    s2 = params["bn2_gamma"] / jnp.sqrt(params["bn2_var"] + eps)
    sh2 = params["bn2_beta"] - params["bn2_mean"] * s2
    a2 = jax.nn.relu(y * s2[None, :, None, None] + sh2[None, :, None, None])
    out = jax.lax.conv_general_dilated(
        a2, params["conv2_w"], (1, 1), ((0, 0), (0, 0)),
        dimension_numbers=("NCHW", "OIHW", "NCHW"))
    out = out + params["conv2_b"][None, :, None, None]
    if scale_factor is not None:
        N, Cout, H, W = out.shape
        out = jax.image.resize(
            out, (N, Cout, H * scale_factor, W * scale_factor), method="bilinear")
    return out


def _init_params(key, in_channels, inter_channels, out_channels):
    ks = jax.random.split(key, 10)
    return {
        "bn1_gamma": jax.random.uniform(ks[0], (in_channels,), jnp.float32, 0.5, 1.5),
        "bn1_beta":  0.1 * jax.random.normal(ks[1], (in_channels,), jnp.float32),
        "bn1_mean":  0.1 * jax.random.normal(ks[2], (in_channels,), jnp.float32),
        "bn1_var":   jax.random.uniform(ks[3], (in_channels,), jnp.float32, 0.5, 1.5),
        "conv1_w":   0.1 * jax.random.normal(ks[4], (inter_channels, in_channels, 3, 3), jnp.float32),
        "bn2_gamma": jax.random.uniform(ks[5], (inter_channels,), jnp.float32, 0.5, 1.5),
        "bn2_beta":  0.1 * jax.random.normal(ks[6], (inter_channels,), jnp.float32),
        "bn2_mean":  0.1 * jax.random.normal(ks[7], (inter_channels,), jnp.float32),
        "bn2_var":   jax.random.uniform(ks[8], (inter_channels,), jnp.float32, 0.5, 1.5),
        "conv2_w":   0.1 * jax.random.normal(ks[9], (out_channels, inter_channels, 1, 1), jnp.float32),
        "conv2_b":   jnp.linspace(-0.1, 0.1, out_channels).astype(jnp.float32),
    }


if __name__ == "__main__":
    N, Cin, Cint, Cout, H, W = 2, 16, 32, 8, 16, 16
    scale_factor = 2

    key = jax.random.PRNGKey(0)
    k_x, k_p = jax.random.split(key)
    x = jax.random.normal(k_x, (N, Cin, H, W), jnp.float32)          # NCHW, like PyTorch
    params = _init_params(k_p, Cin, Cint, Cout)

    out = segmentation_head_forward(x, params, scale_factor=scale_factor)
    out = jax.block_until_ready(out)

    ref = jax.block_until_ready(_reference(x, params, scale_factor=scale_factor))
    assert out.shape == (N, Cout, H * scale_factor, W * scale_factor), out.shape
    # bf16 input / MXU operands / output slab vs. an all-f32 reference ->
    # loosened tolerance (inference-grade logits).
    err = float(jnp.abs(out - ref).max())
    assert jnp.allclose(out, ref, atol=5e-2, rtol=5e-2), err

    print("KERNEL_OK")
</pallas_src>

<mosaic_0001>
module attributes {stable_mosaic.version = 11 : i64} {
  func.func @_seg_head_kernel(%arg0: i32, %arg1: i32, %arg2: memref<1x16x16x16xbf16, #tpu.memory_space<vmem>>, %arg3: memref<1x1x16x16xbf16, #tpu.memory_space<vmem>>, %arg4: memref<1x1x16x16xbf16, #tpu.memory_space<vmem>>, %arg5: memref<1x16xf32, #tpu.memory_space<vmem>>, %arg6: memref<1x16xf32, #tpu.memory_space<vmem>>, %arg7: memref<1152x128xbf16, #tpu.memory_space<vmem>>, %arg8: memref<1x128xf32, #tpu.memory_space<vmem>>, %arg9: memref<1x128xf32, #tpu.memory_space<vmem>>, %arg10: memref<128x128xbf16, #tpu.memory_space<vmem>>, %arg11: memref<1x128xf32, #tpu.memory_space<vmem>>, %arg12: memref<1x1x256x128xbf16, #tpu.memory_space<vmem>>, %arg13: memref<18x18x128xbf16, #tpu.memory_space<vmem>>) attributes {dimension_semantics = [#tpu.dimension_semantics<parallel>, #tpu.dimension_semantics<parallel>], iteration_bounds = array<i64: 2, 1>, scalar_prefetch = 0 : i64, scratch_operands = 1 : i64, tpu.core_type = #tpu.core_type<tc>, window_params = [{transform_indices = @transform_0, window_bounds = array<i64: 1, 16, 16, 16>}, {transform_indices = @transform_1, window_bounds = array<i64: 1, 1, 16, 16>}, {transform_indices = @transform_2, window_bounds = array<i64: 1, 1, 16, 16>}, {pipeline_mode = #tpu.pipeline_mode<synchronous>, transform_indices = @transform_3, window_bounds = array<i64: 1, 16>}, {pipeline_mode = #tpu.pipeline_mode<synchronous>, transform_indices = @transform_4, window_bounds = array<i64: 1, 16>}, {pipeline_mode = #tpu.pipeline_mode<synchronous>, transform_indices = @transform_5, window_bounds = array<i64: 1152, 128>}, {pipeline_mode = #tpu.pipeline_mode<synchronous>, transform_indices = @transform_6, window_bounds = array<i64: 1, 128>}, {pipeline_mode = #tpu.pipeline_mode<synchronous>, transform_indices = @transform_7, window_bounds = array<i64: 1, 128>}, {pipeline_mode = #tpu.pipeline_mode<synchronous>, transform_indices = @transform_8, window_bounds = array<i64: 128, 128>}, {pipeline_mode = #tpu.pipeline_mode<synchronous>, transform_indices = @transform_9, window_bounds = array<i64: 1, 128>}, {transform_indices = @transform_10, window_bounds = array<i64: 1, 1, 256, 128>}]} {
    %c0 = arith.constant 0 : index
    %c0_0 = arith.constant 0 : index
    %0 = vector.load %arg5[%c0, %c0_0] : memref<1x16xf32, #tpu.memory_space<vmem>>, vector<1x16xf32>
    %c0_1 = arith.constant 0 : index
    %c0_2 = arith.constant 0 : index
    %1 = vector.load %arg6[%c0_1, %c0_2] : memref<1x16xf32, #tpu.memory_space<vmem>>, vector<1x16xf32>
    %cst = arith.constant 0.000000e+00 : bf16
    %2 = vector.broadcast %cst : bf16 to vector<18x1x128xbf16>
    %c0_3 = arith.constant 0 : index
    %c0_4 = arith.constant 0 : index
    %c0_5 = arith.constant 0 : index
    %3 = vector.load %arg13[%c0_3, %c0_4, %c0_5] : memref<18x18x128xbf16, #tpu.memory_space<vmem>>, vector<18x1x128xbf16>
    tpu.vector_store %arg13[%c0_3, %c0_4, %c0_5], %2 {strides = array<i32>} : memref<18x18x128xbf16, #tpu.memory_space<vmem>>, vector<18x1x128xbf16>,
    %c0_6 = arith.constant 0 : index
    %c17 = arith.constant 17 : index
    %c0_7 = arith.constant 0 : index
    %4 = vector.load %arg13[%c0_6, %c17, %c0_7] : memref<18x18x128xbf16, #tpu.memory_space<vmem>>, vector<18x1x128xbf16>
    tpu.vector_store %arg13[%c0_6, %c17, %c0_7], %2 {strides = array<i32>} : memref<18x18x128xbf16, #tpu.memory_space<vmem>>, vector<18x1x128xbf16>,
    %cst_8 = arith.constant 0.000000e+00 : bf16
    %5 = vector.broadcast %cst_8 : bf16 to vector<18x18x112xbf16>
    %c0_9 = arith.constant 0 : index
    %c0_10 = arith.constant 0 : index
    %c16 = arith.constant 16 : index
    %6 = vector.load %arg13[%c0_9, %c0_10, %c16] : memref<18x18x128xbf16, #tpu.memory_space<vmem>>, vector<18x18x112xbf16>
    tpu.vector_store %arg13[%c0_9, %c0_10, %c16], %5 {strides = array<i32>} : memref<18x18x128xbf16, #tpu.memory_space<vmem>>, vector<18x18x112xbf16>,
    %c0_11 = arith.constant 0 : index
    %c0_12 = arith.constant 0 : index
    %c0_13 = arith.constant 0 : index
    %c0_14 = arith.constant 0 : index
    %7 = vector.load %arg2[%c0_11, %c0_12, %c0_13, %c0_14] : memref<1x16x16x16xbf16, #tpu.memory_space<vmem>>, vector<1x16x16x16xbf16>
    %8 = vector.shape_cast %7 : vector<1x16x16x16xbf16> to vector<16x16x16xbf16>
    %9 = arith.extf %8 : vector<16x16x16xbf16> to vector<16x16x16xf32>
    %10 = vector.shape_cast %0 : vector<1x16xf32> to vector<1x1x16xf32>
    %11 = vector.broadcast %10 : vector<1x1x16xf32> to vector<16x16x16xf32>
    %12 = arith.mulf %9, %11 : vector<16x16x16xf32>
    %13 = vector.shape_cast %1 : vector<1x16xf32> to vector<1x1x16xf32>
    %14 = vector.broadcast %13 : vector<1x1x16xf32> to vector<16x16x16xf32>
    %15 = arith.addf %12, %14 : vector<16x16x16xf32>
    %cst_15 = arith.constant 0.000000e+00 : f32
    %16 = vector.broadcast %cst_15 : f32 to vector<16x16x16xf32>
    %17 = arith.maximumf %15, %16 : vector<16x16x16xf32>
    %18 = arith.truncf %17 : vector<16x16x16xf32> to vector<16x16x16xbf16>
    %c1 = arith.constant 1 : index
    %c1_16 = arith.constant 1 : index
    %c0_17 = arith.constant 0 : index
    %19 = vector.load %arg13[%c1, %c1_16, %c0_17] : memref<18x18x128xbf16, #tpu.memory_space<vmem>>, vector<16x16x16xbf16>
    tpu.vector_store %arg13[%c1, %c1_16, %c0_17], %18 {strides = array<i32>} : memref<18x18x128xbf16, #tpu.memory_space<vmem>>, vector<16x16x16xbf16>,
    %c0_i32 = arith.constant 0 : i32
    %20 = arith.cmpi sgt, %arg1, %c0_i32 : i32
    %21 = arith.extui %20 : i1 to i32
    %c0_i32_18 = arith.constant 0 : i32
    %22 = arith.cmpi ne, %21, %c0_i32_18 : i32
    scf.if %22 {
      %c0_45 = arith.constant 0 : index
      %c0_46 = arith.constant 0 : index
      %c0_47 = arith.constant 0 : index
      %c0_48 = arith.constant 0 : index
      %64 = vector.load %arg3[%c0_45, %c0_46, %c0_47, %c0_48] : memref<1x1x16x16xbf16, #tpu.memory_space<vmem>>, vector<1x1x16x16xbf16>
      %65 = vector.shape_cast %64 : vector<1x1x16x16xbf16> to vector<1x16x16xbf16>
      %66 = arith.extf %65 : vector<1x16x16xbf16> to vector<1x16x16xf32>
      %67 = vector.shape_cast %0 : vector<1x16xf32> to vector<1x1x16xf32>
      %68 = vector.broadcast %67 : vector<1x1x16xf32> to vector<1x16x16xf32>
      %69 = arith.mulf %66, %68 : vector<1x16x16xf32>
      %70 = vector.shape_cast %1 : vector<1x16xf32> to vector<1x1x16xf32>
      %71 = vector.broadcast %70 : vector<1x1x16xf32> to vector<1x16x16xf32>
      %72 = arith.addf %69, %71 : vector<1x16x16xf32>
      %cst_49 = arith.constant 0.000000e+00 : f32
      %73 = vector.broadcast %cst_49 : f32 to vector<1x16x16xf32>
      %74 = arith.maximumf %72, %73 : vector<1x16x16xf32>
      %75 = arith.truncf %74 : vector<1x16x16xf32> to vector<1x16x16xbf16>
      %c0_50 = arith.constant 0 : index
      %c1_51 = arith.constant 1 : index
      %c0_52 = arith.constant 0 : index
      %76 = vector.load %arg13[%c0_50, %c1_51, %c0_52] : memref<18x18x128xbf16, #tpu.memory_space<vmem>>, vector<1x16x16xbf16>
      tpu.vector_store %arg13[%c0_50, %c1_51, %c0_52], %75 {strides = array<i32>} : memref<18x18x128xbf16, #tpu.memory_space<vmem>>, vector<1x16x16xbf16>,
    } else {
    }
    %c0_i32_19 = arith.constant 0 : i32
    %23 = arith.cmpi eq, %arg1, %c0_i32_19 : i32
    %24 = arith.extui %23 : i1 to i32
    %c0_i32_20 = arith.constant 0 : i32
    %25 = arith.cmpi ne, %24, %c0_i32_20 : i32
    scf.if %25 {
      %cst_45 = arith.constant 0.000000e+00 : bf16
      %64 = vector.broadcast %cst_45 : bf16 to vector<1x16x16xbf16>
      %c0_46 = arith.constant 0 : index
      %c1_47 = arith.constant 1 : index
      %c0_48 = arith.constant 0 : index
      %65 = vector.load %arg13[%c0_46, %c1_47, %c0_48] : memref<18x18x128xbf16, #tpu.memory_space<vmem>>, vector<1x16x16xbf16>
      tpu.vector_store %arg13[%c0_46, %c1_47, %c0_48], %64 {strides = array<i32>} : memref<18x18x128xbf16, #tpu.memory_space<vmem>>, vector<1x16x16xbf16>,
    } else {
    }
    %c0_i32_21 = arith.constant 0 : i32
    %26 = arith.cmpi slt, %arg1, %c0_i32_21 : i32
    %27 = arith.extui %26 : i1 to i32
    %c0_i32_22 = arith.constant 0 : i32
    %28 = arith.cmpi ne, %27, %c0_i32_22 : i32
    scf.if %28 {
      %c0_45 = arith.constant 0 : index
      %c0_46 = arith.constant 0 : index
      %c0_47 = arith.constant 0 : index
      %c0_48 = arith.constant 0 : index
      %64 = vector.load %arg4[%c0_45, %c0_46, %c0_47, %c0_48] : memref<1x1x16x16xbf16, #tpu.memory_space<vmem>>, vector<1x1x16x16xbf16>
      %65 = vector.shape_cast %64 : vector<1x1x16x16xbf16> to vector<1x16x16xbf16>
      %66 = arith.extf %65 : vector<1x16x16xbf16> to vector<1x16x16xf32>
      %67 = vector.shape_cast %0 : vector<1x16xf32> to vector<1x1x16xf32>
      %68 = vector.broadcast %67 : vector<1x1x16xf32> to vector<1x16x16xf32>
      %69 = arith.mulf %66, %68 : vector<1x16x16xf32>
      %70 = vector.shape_cast %1 : vector<1x16xf32> to vector<1x1x16xf32>
      %71 = vector.broadcast %70 : vector<1x1x16xf32> to vector<1x16x16xf32>
      %72 = arith.addf %69, %71 : vector<1x16x16xf32>
      %cst_49 = arith.constant 0.000000e+00 : f32
      %73 = vector.broadcast %cst_49 : f32 to vector<1x16x16xf32>
      %74 = arith.maximumf %72, %73 : vector<1x16x16xf32>
      %75 = arith.truncf %74 : vector<1x16x16xf32> to vector<1x16x16xbf16>
      %c17_50 = arith.constant 17 : index
      %c1_51 = arith.constant 1 : index
      %c0_52 = arith.constant 0 : index
      %76 = vector.load %arg13[%c17_50, %c1_51, %c0_52] : memref<18x18x128xbf16, #tpu.memory_space<vmem>>, vector<1x16x16xbf16>
      tpu.vector_store %arg13[%c17_50, %c1_51, %c0_52], %75 {strides = array<i32>} : memref<18x18x128xbf16, #tpu.memory_space<vmem>>, vector<1x16x16xbf16>,
    } else {
    }
    %c0_i32_23 = arith.constant 0 : i32
    %29 = arith.cmpi eq, %arg1, %c0_i32_23 : i32
    %30 = arith.extui %29 : i1 to i32
    %c0_i32_24 = arith.constant 0 : i32
    %31 = arith.cmpi ne, %30, %c0_i32_24 : i32
    scf.if %31 {
      %cst_45 = arith.constant 0.000000e+00 : bf16
      %64 = vector.broadcast %cst_45 : bf16 to vector<1x16x16xbf16>
      %c17_46 = arith.constant 17 : index
      %c1_47 = arith.constant 1 : index
      %c0_48 = arith.constant 0 : index
      %65 = vector.load %arg13[%c17_46, %c1_47, %c0_48] : memref<18x18x128xbf16, #tpu.memory_space<vmem>>, vector<1x16x16xbf16>
      tpu.vector_store %arg13[%c17_46, %c1_47, %c0_48], %64 {strides = array<i32>} : memref<18x18x128xbf16, #tpu.memory_space<vmem>>, vector<1x16x16xbf16>,
    } else {
    }
    %c0_25 = arith.constant 0 : index
    %c0_26 = arith.constant 0 : index
    %c0_27 = arith.constant 0 : index
    %32 = vector.load %arg13[%c0_25, %c0_26, %c0_27] : memref<18x18x128xbf16, #tpu.memory_space<vmem>>, vector<18x18x128xbf16>
    %33 = vector.extract_strided_slice %32 {offsets = [0, 0, 0], sizes = [16, 16, 128], strides = [1, 1, 1]} : vector<18x18x128xbf16> to vector<16x16x128xbf16>
    %34 = vector.extract_strided_slice %32 {offsets = [0, 1, 0], sizes = [16, 16, 128], strides = [1, 1, 1]} : vector<18x18x128xbf16> to vector<16x16x128xbf16>
    %35 = vector.extract_strided_slice %32 {offsets = [0, 2, 0], sizes = [16, 16, 128], strides = [1, 1, 1]} : vector<18x18x128xbf16> to vector<16x16x128xbf16>
    %36 = vector.extract_strided_slice %32 {offsets = [1, 0, 0], sizes = [16, 16, 128], strides = [1, 1, 1]} : vector<18x18x128xbf16> to vector<16x16x128xbf16>
    %37 = vector.extract_strided_slice %32 {offsets = [1, 1, 0], sizes = [16, 16, 128], strides = [1, 1, 1]} : vector<18x18x128xbf16> to vector<16x16x128xbf16>
    %38 = vector.extract_strided_slice %32 {offsets = [1, 2, 0], sizes = [16, 16, 128], strides = [1, 1, 1]} : vector<18x18x128xbf16> to vector<16x16x128xbf16>
    %39 = vector.extract_strided_slice %32 {offsets = [2, 0, 0], sizes = [16, 16, 128], strides = [1, 1, 1]} : vector<18x18x128xbf16> to vector<16x16x128xbf16>
    %40 = vector.extract_strided_slice %32 {offsets = [2, 1, 0], sizes = [16, 16, 128], strides = [1, 1, 1]} : vector<18x18x128xbf16> to vector<16x16x128xbf16>
    %41 = vector.extract_strided_slice %32 {offsets = [2, 2, 0], sizes = [16, 16, 128], strides = [1, 1, 1]} : vector<18x18x128xbf16> to vector<16x16x128xbf16>
    %42 = tpu.concatenate %33, %34, %35, %36, %37, %38, %39, %40, %41 in 2 : vector<16x16x128xbf16>, vector<16x16x128xbf16>, vector<16x16x128xbf16>, vector<16x16x128xbf16>, vector<16x16x128xbf16>, vector<16x16x128xbf16>, vector<16x16x128xbf16>, vector<16x16x128xbf16>, vector<16x16x128xbf16> -> vector<16x16x1152xbf16>
    %43 = vector.shape_cast %42 : vector<16x16x1152xbf16> to vector<256x1152xbf16>
    %c0_28 = arith.constant 0 : index
    %c0_29 = arith.constant 0 : index
    %44 = vector.load %arg7[%c0_28, %c0_29] : memref<1152x128xbf16, #tpu.memory_space<vmem>>, vector<1152x128xbf16>
    %cst_30 = arith.constant dense<0.000000e+00> : vector<256x128xf32>
    %45 = tpu.matmul %43, %44, %cst_30 {dimension_numbers = #tpu.dot_dimension_numbers<[1], [0], [0], [1], [0, 0, 1, 1], [], []>} : vector<256x1152xbf16>, vector<1152x128xbf16>, vector<256x128xf32> -> vector<256x128xf32>
    %c0_31 = arith.constant 0 : index
    %c0_32 = arith.constant 0 : index
    %46 = vector.load %arg8[%c0_31, %c0_32] : memref<1x128xf32, #tpu.memory_space<vmem>>, vector<1x128xf32>
    %47 = vector.broadcast %46 : vector<1x128xf32> to vector<256x128xf32>
    %48 = arith.mulf %45, %47 : vector<256x128xf32>
    %c0_33 = arith.constant 0 : index
    %c0_34 = arith.constant 0 : index
    %49 = vector.load %arg9[%c0_33, %c0_34] : memref<1x128xf32, #tpu.memory_space<vmem>>, vector<1x128xf32>
    %50 = vector.broadcast %49 : vector<1x128xf32> to vector<256x128xf32>
    %51 = arith.addf %48, %50 : vector<256x128xf32>
    %cst_35 = arith.constant 0.000000e+00 : f32
    %52 = vector.broadcast %cst_35 : f32 to vector<256x128xf32>
    %53 = arith.maximumf %51, %52 : vector<256x128xf32>
    %54 = arith.truncf %53 : vector<256x128xf32> to vector<256x128xbf16>
    %c0_36 = arith.constant 0 : index
    %c0_37 = arith.constant 0 : index
    %55 = vector.load %arg10[%c0_36, %c0_37] : memref<128x128xbf16, #tpu.memory_space<vmem>>, vector<128x128xbf16>
    %cst_38 = arith.constant dense<0.000000e+00> : vector<256x128xf32>
    %56 = tpu.matmul %54, %55, %cst_38 {dimension_numbers = #tpu.dot_dimension_numbers<[1], [0], [0], [1], [0, 0, 1, 1], [], []>} : vector<256x128xbf16>, vector<128x128xbf16>, vector<256x128xf32> -> vector<256x128xf32>
    %c0_39 = arith.constant 0 : index
    %c0_40 = arith.constant 0 : index
    %57 = vector.load %arg11[%c0_39, %c0_40] : memref<1x128xf32, #tpu.memory_space<vmem>>, vector<1x128xf32>
    %58 = vector.broadcast %57 : vector<1x128xf32> to vector<256x128xf32>
    %59 = arith.addf %56, %58 : vector<256x128xf32>
    %60 = arith.truncf %59 : vector<256x128xf32> to vector<256x128xbf16>
    %c0_41 = arith.constant 0 : index
    %c0_42 = arith.constant 0 : index
    %c0_43 = arith.constant 0 : index
    %c0_44 = arith.constant 0 : index
    %61 = vector.load %arg12[%c0_41, %c0_42, %c0_43, %c0_44] : memref<1x1x256x128xbf16, #tpu.memory_space<vmem>>, vector<1x1x256x128xbf16>
    %62 = vector.shape_cast %61 : vector<1x1x256x128xbf16> to vector<256x128xbf16>
    %63 = vector.shape_cast %60 : vector<256x128xbf16> to vector<1x1x256x128xbf16>
    tpu.vector_store %arg12[%c0_41, %c0_42, %c0_43, %c0_44], %63 {strides = array<i32>} : memref<1x1x256x128xbf16, #tpu.memory_space<vmem>>, vector<1x1x256x128xbf16>,
    return
  }
  func.func @transform_0(%arg0: i32, %arg1: i32) -> (i32, i32, i32, i32) {
    %c0_i32 = arith.constant 0 : i32
    %c0_i32_0 = arith.constant 0 : i32
    %c0_i32_1 = arith.constant 0 : i32
    return %arg0, %arg1, %c0_i32, %c0_i32_0 : i32, i32, i32, i32
  }
  func.func @transform_1(%arg0: i32, %arg1: i32) -> (i32, i32, i32, i32) {
    %c16_i32 = arith.constant 16 : i32
    %0 = arith.muli %arg1, %c16_i32 : i32
    %c1_i32 = arith.constant 1 : i32
    %1 = arith.subi %0, %c1_i32 : i32
    %c0_i32 = arith.constant 0 : i32
    %2 = arith.maxsi %1, %c0_i32 : i32
    %c0_i32_0 = arith.constant 0 : i32
    %c0_i32_1 = arith.constant 0 : i32
    %c0_i32_2 = arith.constant 0 : i32
    return %arg0, %2, %c0_i32_0, %c0_i32_1 : i32, i32, i32, i32
  }
  func.func @transform_2(%arg0: i32, %arg1: i32) -> (i32, i32, i32, i32) {
    %c1_i32 = arith.constant 1 : i32
    %0 = arith.addi %arg1, %c1_i32 : i32
    %c16_i32 = arith.constant 16 : i32
    %1 = arith.muli %0, %c16_i32 : i32
    %c15_i32 = arith.constant 15 : i32
    %2 = arith.minsi %1, %c15_i32 : i32
    %c0_i32 = arith.constant 0 : i32
    %c0_i32_0 = arith.constant 0 : i32
    %c0_i32_1 = arith.constant 0 : i32
    return %arg0, %2, %c0_i32, %c0_i32_0 : i32, i32, i32, i32
  }
  func.func @transform_3(%arg0: i32, %arg1: i32) -> (i32, i32) {
    %c0_i32 = arith.constant 0 : i32
    %c0_i32_0 = arith.constant 0 : i32
    %c0_i32_1 = arith.constant 0 : i32
    return %c0_i32, %c0_i32_0 : i32, i32
  }
  func.func @transform_4(%arg0: i32, %arg1: i32) -> (i32, i32) {
    %c0_i32 = arith.constant 0 : i32
    %c0_i32_0 = arith.constant 0 : i32
    %c0_i32_1 = arith.constant 0 : i32
    return %c0_i32, %c0_i32_0 : i32, i32
  }
  func.func @transform_5(%arg0: i32, %arg1: i32) -> (i32, i32) {
    %c0_i32 = arith.constant 0 : i32
    %c0_i32_0 = arith.constant 0 : i32
    %c0_i32_1 = arith.constant 0 : i32
    return %c0_i32, %c0_i32_0 : i32, i32
  }
  func.func @transform_6(%arg0: i32, %arg1: i32) -> (i32, i32) {
    %c0_i32 = arith.constant 0 : i32
    %c0_i32_0 = arith.constant 0 : i32
    %c0_i32_1 = arith.constant 0 : i32
    return %c0_i32, %c0_i32_0 : i32, i32
  }
  func.func @transform_7(%arg0: i32, %arg1: i32) -> (i32, i32) {
    %c0_i32 = arith.constant 0 : i32
    %c0_i32_0 = arith.constant 0 : i32
    %c0_i32_1 = arith.constant 0 : i32
    return %c0_i32, %c0_i32_0 : i32, i32
  }
  func.func @transform_8(%arg0: i32, %arg1: i32) -> (i32, i32) {
    %c0_i32 = arith.constant 0 : i32
    %c0_i32_0 = arith.constant 0 : i32
    %c0_i32_1 = arith.constant 0 : i32
    return %c0_i32, %c0_i32_0 : i32, i32
  }
  func.func @transform_9(%arg0: i32, %arg1: i32) -> (i32, i32) {
    %c0_i32 = arith.constant 0 : i32
    %c0_i32_0 = arith.constant 0 : i32
    %c0_i32_1 = arith.constant 0 : i32
    return %c0_i32, %c0_i32_0 : i32, i32
  }
  func.func @transform_10(%arg0: i32, %arg1: i32) -> (i32, i32, i32, i32) {
    %c0_i32 = arith.constant 0 : i32
    %c0_i32_0 = arith.constant 0 : i32
    %c0_i32_1 = arith.constant 0 : i32
    return %arg0, %arg1, %c0_i32, %c0_i32_0 : i32, i32, i32, i32
  }
}

</mosaic_0001>

<bundles_post_ra>
// kernel: tpu_custom_call.1
= control target key start
LH: loop header
LB: loop body
LE: loop exit
PB: predicated region body
PF: predicated region fallthrough
CT: control target
= control target key end

     0   :  { %s7200_s0 = inlined_call_operand.hbm [shape: bf16[2,16,16,16], index: 0, kind: input, shape index: {}]   ;;  %s7201_s1 = inlined_call_operand.hbm [shape: bf16[2,16,16,16], index: 1, kind: input, shape index: {}]   ;;  %s7202_s2 = inlined_call_operand.hbm [shape: bf16[2,16,16,16], index: 2, kind: input, shape index: {}]   ;;  %s7203_s3 = inlined_call_operand.vmem [shape: f32[1,16], index: 3, kind: input, shape index: {}]   ;;  %s7204_s4 = inlined_call_operand.vmem [shape: f32[1,16], index: 4, kind: input, shape index: {}]   ;;  %s7205_s5 = inlined_call_operand.hbm [shape: bf16[1152,128], index: 5, kind: input, shape index: {}]   ;;  %s7206_s6 = inlined_call_operand.vmem [shape: f32[1,128], index: 6, kind: input, shape index: {}]   ;;  %s7207_s7 = inlined_call_operand.vmem [shape: f32[1,128], index: 7, kind: input, shape index: {}]   ;;  %s7208_s8 = inlined_call_operand.hbm [shape: bf16[128,128], index: 8, kind: input, shape index: {}]   ;;  %s7209_s9 = inlined_call_operand.vmem [shape: f32[1,128], index: 9, kind: input, shape index: {}]   ;;  %s7210_s10 = inlined_call_operand.hbm [shape: bf16[2,1,256,128], index: 10, kind: output, shape index: {}]  }
   0x1   :  { %7240 = sst [smem:[#allocation27_spill]] %s7201_s1 }
   0x2   :  { %7241 = sst [smem:[#allocation28_spill]] %s7205_s5 }
   0x3   :  { %7242 = sst [smem:[#allocation29_spill]] %s7208_s8 }
   0x4   :  { %7243 = sst [smem:[#allocation30_spill]] %s7209_s9 }
   0x5   :  { %7244 = sst [smem:[#allocation31_spill]] %s7210_s10 }
   0x6   :  { %15 = vsyncpa [#allocation4], 0 }
   0x7   :  { %17 = vsyncpa [#allocation4 + $0x1], 0 }
   0x8   :  { %18 = vsyncpa [#allocation7], 0 }
   0x9   :  { %20 = vsyncpa [#allocation7 + $0x1], 0 }
   0xa   :  { %21 = vsyncpa [#allocation10], 0 }
   0xb   :  { %22 = vsyncpa [#allocation5], 0 }
   0xc   :  { %24 = vsyncpa [#allocation5 + $0x1], 0  ;;  %s5718_s13 = smov 0   ;;  %s5720_s14 = smov 0  }
   0xd   :  { %s5722_s15 = smov 0   ;;  %s5724_s16 = smov 0  }
   0xe   :  { %s5726_s17 = smov 0   ;;  %s5728_s18 = smov 0  }
   0xf LB: > { %7245 = sst [smem:[#allocation17_spill]] %s5630_s13  ;;  %s5749_s19 = sadd.s32 4294967295, %s5650_s18   ;;  %s5650_s18 = sphi %s5728_s18, %s30_s18   ;;  %s5646_s17 = sphi %s5726_s17, %s7306_s17   ;;  %s5642_s16 = sphi %s5724_s16, %s7305_s16   ;;  %s5638_s15 = sphi %s5722_s15, %s7304_s15   ;;  %s5634_s14 = sphi %s5720_s14, %s7308_s14   ;;  %s5630_s13 = sphi %s5718_s13, %s7307_s13  }
  0x10   : > { %7246 = sst [smem:[#allocation18_spill]] %s5638_s15  ;;  %s4136_s20 = sadd.s32 4294967294, %s5650_s18  }
  0x11   : > { %7247 = sst [smem:[#allocation19_spill]] %s5642_s16  ;;  %p58_p0 = scmp.ne.s32.totalorder %s5638_s15, %s5634_s14 }
  0x12   : > { %7248 = sst [smem:[#allocation20_spill]] %s5646_s17  ;;  %p59_p1 = scmp.eq.s32.totalorder %s5650_s18, 0 }
  0x13   : > { %7249 = sst [smem:[#allocation21_spill]] %s5650_s18  ;;  %p64_p2 = scmp.ne.s32.totalorder %s5634_s14, %s5630_s13 }
  0x14   : > { %p7214_p3 = scmp.eq.s32.totalorder %s5749_s19, 0  ;;  %p5758_p4 = por %p59_p1, %p58_p0 }
  0x15   : > { %p309_p5 = scmp.eq.s32.totalorder %s5749_s19, 1  ;;  %p315_p7 = scmp.eq.s32.totalorder %s4136_s20, 1 }
  0x16   : > { %p5765_p6 = por %p7214_p3, %p64_p2  ;;  %p4137_p9 = scmp.ge.s32.totalorder %s5650_s18, 1 }
  0x17   : > { %p5769_p8 = por %p309_p5, %p58_p0  ;;  %p5774_p10 = por %p315_p7, %p64_p2 }
  0x18   : > { %s7251_s22 = scalar_select %p5765_p6, 1, 0 }
  0x19   : > { %s7252_s23 = scalar_select %p5769_p8, 1, 0 }
  0x1a   : > { %s7254_s24 = scalar_select %p5774_p10, 1, 0 }
  0x1b   : > { %7253 = sst [smem:[#allocation22_spill]] %s7252_s23  ;;  %p322_p11 = scmp.lt.s32.totalorder %s5650_s18, 3 }
  0x1c   : > { %7255 = sst [smem:[#allocation23_spill]] %s7254_s24  ;;  %s5652_s26 = smov [#allocation9]  }
  0x1d   : > { %p5779_p12 = pnand %p4137_p9, %p322_p11  ;;  %s340_s27 = sshll.u32 %s5652_s26, 4  ;;  %s5783_s27 = int_to_ptr.vmem [resolvable:$true] %s340_s27 }
  0x1e   : > { %s42_s29 = sadd.s32 1, %s5646_s17  ;;  %s7259_s5 = sld [smem:[#allocation28_spill]] }
  0x1f   : > { %s7256_s25 = scalar_select %p5779_p12, 1, 0 }
  0x20   : > { %p5207_p13 = pneg %p5779_p12  ;;  %p5796_p2 = scmp.ge.s32.totalorder %s42_s29, 2 }
  0x22   : > { %p5790_p1 = pnand %p5207_p13, %p7214_p3 }
  0x24   : > { %s7257_s28 = scalar_select %p5790_p1, 1, 0 }
  0x25   : > { %s5414_s26 = scalar_lea.hbm %s7259_s5, 9216  ;;  %p7229_p7 = pneg %p5790_p1 }
  0x26   : > { %p5415_p5 = scmp.ne.s32.totalorder %s7259_s5, %s5414_s26  ;;  %p5421_p13 = scmp.lt.u32.totalorder %s5414_s26, %s7259_s5 }
  0x28   : > { %p5417_p9 = pnand %p7229_p7, %p5415_p5 }
  0x2a   : > { %p5418_p11 = pneg %p5417_p9 }
  0x2c   : > { %p5423_p0 = pnand %p5421_p13, %p5418_p11 }
  0x2e   : > { %5426 = shalt.err (!%p5423_p0)
}
  0x2f   : > { %s5427_s12 = scalar_lea.vmem %s5783_s27, 9216  ;;  %p5435_p6 = scmp.lt.s32.totalorder %s5783_s27, %s5783_s27 }
  0x30   : > { %p5428_p3 = scmp.ne.s32.totalorder %s5783_s27, %s5427_s12  ;;  %p5436_p5 = scmp.lt.s32.totalorder %s5427_s12, %s5427_s12 }
  0x32   : > { %p5430_p10 = pnand %p5428_p3, %p7229_p7  ;;  %p5437_p9 = por %p5436_p5, %p5435_p6 }
  0x34   : > { %p5431_p8 = pneg %p5430_p10 }
  0x36   : > { %p5438_p12 = pnand %p5437_p9, %p5431_p8 }
  0x38   : > { %5441 = shalt.err (!%p5438_p12)
}
  0x39   : > { %s7220_s10 = smov 64   ;;  %s7222_s13 = smov 4  }
  0x3a   : > { %5210 = dma.hbm_to_vmem [thread:$0]  (!%p5790_p1), %s7259_s5, 9216, %s5783_s27, [#allocation10], %s7220_s10, %s7220_s10, %s7222_s13  }
  0x3b   : > { %s7310_s29 = smov (%p5796_p2, %s42_s29), 0  ;;  %p5230_p3 = scmp.lt.s32.totalorder %s5650_s18, 2 }
  0x3c   : > { %7260 = sst [smem:[#allocation24_spill]] %s7310_s29  ;;  %s5836_s20 = sand.u32 1, %s5638_s15  }
  0x3d   : > { %s46_s26 = ssub.s32 %s5646_s17, %s7310_s29  ;;  %s5841_s12 = sshll.u32 %s5646_s17, 11 }
  0x3e   : > { %p49_p6 = scmp.eq.s32.totalorder %s46_s26, 0  ;;  %p5845_p8 = pnand %p5230_p3, %p5758_p4 }
  0x3f   : > { %s400_s27 = sand.u32 1, %s5650_s18   ;;  %s4144_s11 = sshll.u32 %s5836_s20, 3 }
  0x40   : > { %s7261_s23 = scalar_select %p5845_p8, 1, 0 }
  0x41   : > { %s7262_s24 = sadd.s32 1, %s5638_s15  ;;  %s7264_s1 = sld [smem:[#allocation27_spill]] }
  0x42   : > { %s5854_s30 = scalar_select %p49_p6, %s5638_s15, %s7262_s24  }
  0x43   : > { %s404_s21 = scalar_lea.vmem [#allocation6], %s4144_s11  ;;  %s5864_s29 = scalar_lea.vmem [#allocation8], %s4144_s11 }
  0x44   : > { %7263 = sst [smem:[#allocation25_spill]] %s5854_s30  ;;  %s417_s26 = sshll.u32 %s404_s21, 4  ;;  %s5862_s26 = int_to_ptr.vmem [resolvable:$true] %s417_s26 }
  0x45   : > { %s444_s17 = sshll.u32 %s5864_s29, 4  ;;  %s5867_s18 = scalar_lea.sflag [#allocation7], %s400_s27  ;;  %s5902_s17 = int_to_ptr.vmem [resolvable:$true] %s444_s17 }
  0x46   : > { %p5873_p10 = pneg %p5845_p8 }
  0x47   : > { %s5860_s5 = scalar_lea.hbm %s7264_s1, %s5841_s12  ;;  %s5447_s11 = scalar_lea.hbm %s7264_s1, 4096 }
  0x48   : > { %s5442_s24 = scalar_lea.hbm %s5860_s5, 128  ;;  %p5448_p2 = scmp.lt.u32.totalorder %s5860_s5, %s7264_s1 }
  0x49   : > { %p5443_p4 = scmp.ne.s32.totalorder %s5860_s5, %s5442_s24  ;;  %p5449_p11 = scmp.lt.u32.totalorder %s5447_s11, %s5442_s24 }
  0x4a   : > { %s7265_s10 = scalar_select %p5873_p10, 1, 0 }
  0x4b   : > { %p5445_p12 = pnand %p5873_p10, %p5443_p4  ;;  %p5450_p13 = por %p5449_p11, %p5448_p2 }
  0x4c   : > { %p5451_p5 = scmp.lt.u32.totalorder %s5442_s24, %s5860_s5 }
  0x4d   : > { %p5446_p0 = pneg %p5445_p12 }
  0x4e   : > { %p5452_p9 = por %p5451_p5, %p5450_p13 }
  0x50   : > { %p5453_p3 = pnand %p5452_p9, %p5446_p0 }
  0x52   : > { %5456 = shalt.err (!%p5453_p3)
}
  0x53   : > { %s5457_s27 = scalar_lea.vmem %s5862_s26, 128  ;;  %s5655_s13 = smov [#allocation6]  }
  0x54   : > { %p5458_p6 = scmp.ne.s32.totalorder %s5862_s26, %s5457_s27  ;;  %s5462_s21 = sshll.u32 %s5655_s13, 4  ;;  %s5463_s21 = int_to_ptr.vmem [resolvable:$false] %s5462_s21 }
  0x55   : > { %s5464_s15 = scalar_lea.vmem %s5463_s21, 256  ;;  %p5465_p7 = scmp.lt.s32.totalorder %s5862_s26, %s5463_s21 }
  0x56   : > { %p5460_p4 = pnand %p5458_p6, %p5873_p10  ;;  %p5466_p1 = scmp.lt.s32.totalorder %s5464_s15, %s5457_s27 }
  0x58   : > { %p5461_p12 = pneg %p5460_p4  ;;  %p5467_p2 = por %p5466_p1, %p5465_p7 }
  0x5a   : > { %p5468_p11 = pnand %p5467_p2, %p5461_p12 }
  0x5c   : > { %5471 = shalt.err (!%p5468_p11)
}
  0x5d   : > { %s7266_s30 = smov 4   ;;  %s7267_s24 = smov 64  }
  0x5e   : > { %5220 = dma.hbm_to_vmem [thread:$0]  (!%p5845_p8), %s5860_s5, 128, %s5862_s26, %s5867_s18, %s7267_s24, %s7267_s24, %s7266_s30  }
  0x5f   : > { %s5656_s11 = smov [#allocation11]   ;;  %s4141_s13 = sshll.u32 %s5836_s20, 7 }
  0x60   : > { %s359_s27 = sshll.u32 %s5656_s11, 4  ;;  %s7268_s8 = sld [smem:[#allocation29_spill]]  ;;  %s360_s27 = int_to_ptr.vmem [resolvable:$true] %s359_s27 }
  0x61   : > { %p7269_p7 = scmp.ne.s32.totalorder %s7257_s28, 0 }
  0x63   : > { %p7270_p0 = pneg %p7269_p7 }
  0x66   : > { %s5472_s1 = scalar_lea.hbm %s7268_s8, 1024 }
  0x67   : > { %p5473_p1 = scmp.ne.s32.totalorder %s7268_s8, %s5472_s1  ;;  %p5479_p9 = scmp.lt.u32.totalorder %s5472_s1, %s7268_s8 }
  0x69   : > { %p5475_p13 = pnand %p5473_p1, %p7270_p0 }
  0x6b   : > { %p5476_p5 = pneg %p5475_p13 }
  0x6d   : > { %p5481_p3 = pnand %p5479_p9, %p5476_p5 }
  0x6f   : > { %5484 = shalt.err (!%p5481_p3)
}
  0x70   : > { %s5485_s26 = scalar_lea.vmem %s360_s27, 1024  ;;  %p7271_p4 = pmov %p7270_p0 }
  0x71   : > { %p5486_p6 = scmp.ne.s32.totalorder %s360_s27, %s5485_s26  ;;  %p5493_p11 = scmp.lt.s32.totalorder %s360_s27, %s360_s27 }
  0x72   : > { %p5494_p8 = scmp.lt.s32.totalorder %s5485_s26, %s5485_s26 }
  0x73   : > { %p5488_p12 = pnand %p5486_p6, %p7271_p4 }
  0x74   : > { %p5495_p10 = por %p5494_p8, %p5493_p11 }
  0x75   : > { %p5489_p2 = pneg %p5488_p12 }
  0x77   : > { %p5496_p0 = pnand %p5495_p10, %p5489_p2 }
  0x79   : > { %5499 = shalt.err (!%p5496_p0)
}
  0x7a   : > { %5213 = dma.hbm_to_vmem [thread:$0]  (!%p7269_p7), %s7268_s8, 1024, %s360_s27, [#allocation10], %s7267_s24, %s7267_s24, %s7266_s30  }
  0x7b   : > { %s5932_s21 = scalar_lea.hbm %s7200_s0, %s5841_s12  ;;  %s380_s28 = scalar_lea.vmem [#allocation3], %s4141_s13 }
  0x7c   : > { %s390_s15 = sshll.u32 %s380_s28, 4  ;;  %s4354_s5 = sadd.s32 1920, %s5841_s12  ;;  %s5935_s15 = int_to_ptr.vmem [resolvable:$true] %s390_s15 }
  0x7d   : > { %s5940_s1 = scalar_lea.hbm %s7202_s2, %s4354_s5  ;;  %s377_s27 = scalar_lea.sflag [#allocation4], %s5836_s20 }
  0x7e   : > { %s5500_s9 = scalar_lea.hbm %s5932_s21, 2048  ;;  %p7272_p10 = scmp.ne.s32.totalorder %s7265_s10, 0 }
  0x7f   : > { %p5501_p8 = scmp.ne.s32.totalorder %s5932_s21, %s5500_s9  ;;  %s5505_s8 = scalar_lea.hbm %s7200_s0, 4096 }
  0x80   : > { %p5506_p13 = scmp.lt.u32.totalorder %s5932_s21, %s7200_s0  ;;  %p5507_p5 = scmp.lt.u32.totalorder %s5505_s8, %s5500_s9 }
  0x81   : > { %p5503_p1 = pnand %p5501_p8, %p7272_p10  ;;  %p5509_p3 = scmp.lt.u32.totalorder %s5500_s9, %s5932_s21 }
  0x82   : > { %p5508_p9 = por %p5507_p5, %p5506_p13 }
  0x83   : > { %p5504_p7 = pneg %p5503_p1 }
  0x84   : > { %p5510_p6 = por %p5509_p3, %p5508_p9 }
  0x86   : > { %p5511_p4 = pnand %p5510_p6, %p5504_p7 }
  0x88   : > { %5514 = shalt.err (!%p5511_p4)
}
  0x89   : > { %s5515_s12 = scalar_lea.vmem %s5935_s15, 2048  ;;  %s5657_s5 = smov [#allocation3]  }
  0x8a   : > { %p5516_p12 = scmp.ne.s32.totalorder %s5935_s15, %s5515_s12  ;;  %s5520_s29 = sshll.u32 %s5657_s5, 4  ;;  %s5521_s29 = int_to_ptr.vmem [resolvable:$false] %s5520_s29 }
  0x8b   : > { %s5522_s26 = scalar_lea.vmem %s5521_s29, 4096  ;;  %p5523_p0 = scmp.lt.s32.totalorder %s5935_s15, %s5521_s29 }
  0x8c   : > { %p5518_p2 = pnand %p5516_p12, %p7272_p10  ;;  %p5524_p8 = scmp.lt.s32.totalorder %s5522_s26, %s5515_s12 }
  0x8e   : > { %p5519_p11 = pneg %p5518_p2  ;;  %p5525_p1 = por %p5524_p8, %p5523_p0 }
  0x90   : > { %p5526_p13 = pnand %p5525_p1, %p5519_p11 }
  0x92   : > { %5529 = shalt.err (!%p5526_p13)
}
  0x93   : > { %p7273_p7 = scmp.ne.s32.totalorder %s7261_s23, 0  ;;  %s5530_s8 = scalar_lea.hbm %s5940_s1, 128 }
  0x94   : > { %p5531_p5 = scmp.ne.s32.totalorder %s5940_s1, %s5530_s8  ;;  %s5535_s11 = scalar_lea.hbm %s7202_s2, 4096 }
  0x95   : > { %5217 = dma.hbm_to_vmem [thread:$0]  (!%p7273_p7), %s5932_s21, 2048, %s5935_s15, %s377_s27, %s7267_s24, %s7267_s24, %s7266_s30  }
  0x96   : > { %p5533_p9 = pnand %p5531_p5, %p7272_p10  ;;  %p5536_p6 = scmp.lt.u32.totalorder %s5940_s1, %s7202_s2 }
  0x97   : > { %p5537_p4 = scmp.lt.u32.totalorder %s5535_s11, %s5530_s8  ;;  %p5539_p2 = scmp.lt.u32.totalorder %s5530_s8, %s5940_s1 }
  0x98   : > { %p5534_p3 = pneg %p5533_p9 }
  0x99   : > { %p5538_p12 = por %p5537_p4, %p5536_p6 }
  0x9b   : > { %p5540_p11 = por %p5539_p2, %p5538_p12 }
  0x9d   : > { %p5541_p0 = pnand %p5540_p11, %p5534_p3 }
  0x9f   : > { %5544 = shalt.err (!%p5541_p0)
}
  0xa0   : > { %s5545_s20 = scalar_lea.vmem %s5902_s17, 128  ;;  %s5658_s21 = smov [#allocation8]  }
  0xa1   : > { %p5546_p8 = scmp.ne.s32.totalorder %s5902_s17, %s5545_s20  ;;  %s5550_s15 = sshll.u32 %s5658_s21, 4  ;;  %s5551_s15 = int_to_ptr.vmem [resolvable:$false] %s5550_s15 }
  0xa2   : > { %s5552_s27 = scalar_lea.vmem %s5551_s15, 256  ;;  %p5553_p5 = scmp.lt.s32.totalorder %s5902_s17, %s5551_s15 }
  0xa3   : > { %p5548_p1 = pnand %p5546_p8, %p7272_p10  ;;  %p5554_p9 = scmp.lt.s32.totalorder %s5552_s27, %s5545_s20 }
  0xa5   : > { %p5549_p13 = pneg %p5548_p1  ;;  %p5555_p6 = por %p5554_p9, %p5553_p5 }
  0xa7   : > { %p5556_p4 = pnand %p5555_p6, %p5549_p13 }
  0xa9   : > { %5559 = shalt.err (!%p5556_p4)
}
  0xaa   : > { %5223 = dma.hbm_to_vmem [thread:$0]  (!%p7273_p7), %s5940_s1, 128, %s5902_s17, %s5867_s18, %s7267_s24, %s7267_s24, %s7266_s30  }
  0xab   : > { %p7274_p10 = scmp.ne.s32.totalorder %s7256_s25, 0 }
  0xad   : > { %456 = sbr.rel (%p7274_p10) target bundleno = 1017 (0x3f9), region = 60 }
  0xb4   : > { %s5997_s10 = sand.u32 1, %s5634_s14   ;;  %p7275_p3 = scmp.ne.s32.totalorder %s7251_s22, 0 }
  0xb5   : > { %s4151_s12 = sshll.u32 %s5997_s10, 7  ;;  %s459_s5 = scalar_lea.sflag [#allocation4], %s5997_s10 }
  0xb6   : > { %s6003_s23 = scalar_lea.vmem [#allocation3], %s4151_s12 }
  0xb7   : > { %5613 = dma.done.wait (%p7275_p3), %s459_s5, 2048  }
  0xb8   : > { %5615 = vsyncadd (%p7275_p3), %s459_s5, 4294965248  ;;  %s467_s17 = sand.u32 1, %s5749_s19  }
  0xb9   : > { %s468_s18 = scalar_lea.sflag [#allocation7], %s467_s17 }
  0xba   : > { %5617 = dma.done.wait (%p7275_p3), %s468_s18, 256  }
  0xbb   : > { %5619 = vsyncadd (%p7275_p3), %s468_s18, 4294967040  ;;  %p7276_p7 = scmp.eq.s32.totalorder %s5749_s19, 0 }
  0xbd   : > { %5621 = dma.done.wait (%p7276_p7), [#allocation10], 10240   ;;  %p7277_p12 = pmov %p7276_p7 }
  0xbe   : > { %vm660_vm0 = vcmask 1043584   ;;  %v7236_v0 = vmov 0   ;;  %vm1307_vm1 = vcmask 125952   ;;  %v5289_v1 = vld [vmem:[#allocation9 + $0x40] sm:$0xff]   ;;  %v5293_v5 = vld [vmem:[#allocation9 + $0x48] sm:$0xff]   ;;  %v5297_v9 = vld [vmem:[#allocation9 + $0x50] sm:$0xff]  }
  0xbf   : > { %5623 = vsyncadd (%p7277_p12), [#allocation10], 4294957056  ;;  %662 = vst.msk [vmem:[#allocation2 + $0x4] sm:$0xf] %vm660_vm0, %v7236_v0  ;;  %v5290_v2 = vld [vmem:[#allocation9 + $0xc0] sm:$0xff]   ;;  %4599 = vmatprep.subr.bf16.mxu0 %v5289_v1  ;;  %v5294_v6 = vld [vmem:[#allocation9 + $0xc8] sm:$0xff]  }
  0xc0   : > { %666 = vst.msk [vmem:[#allocation2 + $0x10] sm:$0xf] %vm660_vm0, %v7236_v0  ;;  %669 = vst.msk [vmem:[#allocation2 + $0x1c] sm:$0xf] %vm660_vm0, %v7236_v0  ;;  %v5291_v3 = vld [vmem:[#allocation9] sm:$0xff]   ;;  %4711 = vmatprep.subr.bf16.mxu1 %v5290_v2  ;;  %v5295_v7 = vld [vmem:[#allocation9 + $0x8] sm:$0xff]  }
  0xc1   : > { %672 = vst.msk [vmem:[#allocation2 + $0x28] sm:$0xf] %vm660_vm0, %v7236_v0  ;;  %675 = vst.msk [vmem:[#allocation2 + $0x34] sm:$0xf] %vm660_vm0, %v7236_v0  ;;  %v5292_v4 = vld [vmem:[#allocation9 + $0x80] sm:$0xff]   ;;  %4600 = vmatpush3.bf16.msra.mxu0 %v5291_v3  ;;  %v5296_v8 = vld [vmem:[#allocation9 + $0x88] sm:$0xff]  }
  0xc2   : > { %678 = vst.msk [vmem:[#allocation2 + $0x40] sm:$0xf] %vm660_vm0, %v7236_v0  ;;  %681 = vst.msk [vmem:[#allocation2 + $0x4c] sm:$0xf] %vm660_vm0, %v7236_v0  ;;  %4712 = vmatpush3.bf16.msra.mxu1 %v5292_v4  ;;  %4601 = vmatprep.subr.bf16.mxu0 %v5293_v5  ;;  %v5298_v10 = vld [vmem:[#allocation9 + $0xd0] sm:$0xff]   ;;  %v5301_v13 = vld [vmem:[#allocation9 + $0x58] sm:$0xff]  }
  0xc3   : > { %684 = vst.msk [vmem:[#allocation2 + $0x58] sm:$0xf] %vm660_vm0, %v7236_v0  ;;  %687 = vst.msk [vmem:[#allocation2 + $0x64] sm:$0xf] %vm660_vm0, %v7236_v0  ;;  %4713 = vmatprep.subr.bf16.mxu1 %v5294_v6  ;;  %v5299_v11 = vld [vmem:[#allocation9 + $0x10] sm:$0xff]   ;;  %v5302_v14 = vld [vmem:[#allocation9 + $0xd8] sm:$0xff]  }
  0xc4   : > { %690 = vst.msk [vmem:[#allocation2 + $0x70] sm:$0xf] %vm660_vm0, %v7236_v0  ;;  %693 = vst.msk [vmem:[#allocation2 + $0x7c] sm:$0xf] %vm660_vm0, %v7236_v0  ;;  %v5300_v12 = vld [vmem:[#allocation9 + $0x90] sm:$0xff]   ;;  %v5303_v15 = vld [vmem:[#allocation9 + $0x18] sm:$0xff]  }
  0xc5   : > { %696 = vst.msk [vmem:[#allocation2 + $0x88] sm:$0xf] %vm660_vm0, %v7236_v0  ;;  %699 = vst.msk [vmem:[#allocation2 + $0x94] sm:$0xf] %vm660_vm0, %v7236_v0  ;;  %4602 = vmatpush3.bf16.msra.mxu0 %v5295_v7  ;;  %vm548_vm2 = vsmask.f32 256 }
  0xc6   : > { %702 = vst.msk [vmem:[#allocation2 + $0xa0] sm:$0xf] %vm660_vm0, %v7236_v0  ;;  %705 = vst.msk [vmem:[#allocation2 + $0xac] sm:$0xf] %vm660_vm0, %v7236_v0  ;;  %4714 = vmatpush3.bf16.msra.mxu1 %v5296_v8  ;;  %4603 = vmatprep.subr.bf16.mxu0 %v5297_v9  ;;  %vm604_vm3 = vsmask.f32 7938 }
  0xc7   : > { %708 = vst.msk [vmem:[#allocation2 + $0xb8] sm:$0xf] %vm660_vm0, %v7236_v0  ;;  %711 = vst.msk [vmem:[#allocation2 + $0xc4] sm:$0xf] %vm660_vm0, %v7236_v0  ;;  %4715 = vmatprep.subr.bf16.mxu1 %v5298_v10  ;;  %v5304_v16 = vld [vmem:[#allocation9 + $0x98] sm:$0xff]   ;;  %v5305_v17 = vld [vmem:[#allocation9 + $0x60] sm:$0xff]  }
  0xc8   : > { %714 = vst.msk [vmem:[#allocation2 + $0xd0] sm:$0xf] %vm660_vm0, %v7236_v0  ;;  %v5306_v18 = vld [vmem:[#allocation9 + $0xe0] sm:$0xff]   ;;  %vm547_vm4 = vcmask 1040384   ;;  %v5309_v21 = vld [vmem:[#allocation9 + $0x68] sm:$0xff]   ;;  %v5313_v27 = vld [vmem:[#allocation9 + $0x70] sm:$0xff]  }
  0xc9   : > { %1478 = vst.msk [vmem:[#allocation2 + $0x4] sm:$0xf] %vm1307_vm1, %v7236_v0  ;;  %1537 = vst.msk [vmem:[#allocation2 + $0xd0] sm:$0xf] %vm1307_vm1, %v7236_v0  ;;  %4604 = vmatpush3.bf16.msra.mxu0 %v5299_v11  ;;  %v5307_v19 = vld [vmem:[#allocation9 + $0x20] sm:$0xff]   ;;  %v5310_v22 = vld [vmem:[#allocation9 + $0xe8] sm:$0xff]  }
  0xca   : > { %4716 = vmatpush3.bf16.msra.mxu1 %v5300_v12  ;;  %4605 = vmatprep.subr.bf16.mxu0 %v5301_v13  ;;  %v5308_v20 = vld [vmem:[#allocation9 + $0xa0] sm:$0xff]   ;;  %v5311_v23 = vld [vmem:[#allocation9 + $0x28] sm:$0xff]   ;;  %vm6059_vm5 = vmand %vm547_vm4, %vm548_vm2  ;;  %vm663_vm7 = vcmask 1040512   ;;  %vm1314_vm8 = vcmask 122880   ;;  %vm984_vm9 = vsmask.f32 4368 }
  0xcb   : > { %4717 = vmatprep.subr.bf16.mxu1 %v5302_v14  ;;  %vm6064_vm6 = vmand %vm547_vm4, %vm604_vm3  ;;  %v5312_v26 = vld [vmem:[#allocation9 + $0xa8] sm:$0xff]   ;;  %v5314_v28 = vld [vmem:[#allocation9 + $0xf0] sm:$0xff]   ;;  %vm1948_vm12 = vcmask 1046528   ;;  %vm1739_vm13 = vsmask.f32 7424  ;;  %s7292_s20 = sld [smem:[#allocation30_spill]] }
  0xcc   : > { %v5315_v29 = vld [vmem:[#allocation9 + $0x30] sm:$0xff]   ;;  %v5317_v31 = vld [vmem:[#allocation9 + $0x78] sm:$0xff]   ;;  %v550_v35 = vld [vmem:[#allocation2] sm:$0x1]  ;;  %s7098_s21 = scalar_lea.vmem [#allocation12], %s4151_s12  ;;  %s7293_s15 = sld [smem:[#allocation19_spill]] }
  0xcd   : > { %4606 = vmatpush3.bf16.msra.mxu0 %v5303_v15  ;;  %v5316_v30 = vld [vmem:[#allocation9 + $0xb0] sm:$0xff]   ;;  %v5318_v32 = vld [vmem:[#allocation9 + $0xf8] sm:$0xff]   ;;  %v551_v37 = vsel %vm6059_vm5, 0, %v550_v35  ;;  %v6075_v39 = vld [vmem:[%s7203_s3] ss:$0 sm:$0xff]  ;;  %s7294_s12 = sld [smem:[#allocation22_spill]] }
  0xce   : > { %4718 = vmatpush3.bf16.msra.mxu1 %v5304_v16  ;;  %4607 = vmatprep.subr.bf16.mxu0 %v5305_v17  ;;  %v5319_v33 = vld [vmem:[#allocation9 + $0x38] sm:$0xff]   ;;  %v606_v36 = vld [vmem:[#allocation2 + $0x8] sm:$0x1]  ;;  %552 = vst [vmem:[#allocation2] sm:$0x1] %v551_v37  ;;  %v4425_v41 = vld [vmem:[%s6003_s23] sm:$0xff]  }
  0xcf   : > { %4719 = vmatprep.subr.bf16.mxu1 %v5306_v18  ;;  %v5320_v34 = vld [vmem:[#allocation9 + $0xb8] sm:$0xff]   ;;  %v607_v38 = vsel %vm6064_vm6, 0, %v606_v36  ;;  %v553_v40 = vld [vmem:[#allocation2 + $0xc] sm:$0x1]  ;;  %661 = vst.msk [vmem:[#allocation2] sm:$0xf] %vm660_vm0, %v7236_v0  ;;  %v4426_v43 = vunpack.c.l.bf16 %v4425_v41  ;;  %v4427_v44 = vunpack.c.h.bf16 %v4425_v41  ;;  %vm6098_vm10 = vmand %vm1307_vm1, %vm604_vm3 }
  0xd0   : > { %608 = vst [vmem:[#allocation2 + $0x8] sm:$0x1] %v607_v38  ;;  %v554_v42 = vsel %vm6059_vm5, 0, %v553_v40  ;;  %v5324_v45 = vld [vmem:[#allocation9 + $0x140] sm:$0xff]   ;;  %v6087_v46 = vld [vmem:[%s7204_s4] ss:$0 sm:$0xff]  ;;  %vm6109_vm11 = vmand %vm1314_vm8, %vm548_vm2 }
  0xd1   : > { %4608 = vmatpush3.bf16.msra.mxu0 %v5307_v19  ;;  %664 = vst.msk [vmem:[#allocation2 + $0x8] sm:$0x1] %vm663_vm7, %v7236_v0  ;;  %555 = vst [vmem:[#allocation2 + $0xc] sm:$0x1] %v554_v42  ;;  %v609_v47 = vld [vmem:[#allocation2 + $0x14] sm:$0x1]  ;;  %v786_v48 = vmul.f32 %v4426_v43, %v6075_v39  ;;  %v787_v49 = vmul.f32 %v4427_v44, %v6075_v39 }
  0xd2   : > { %4720 = vmatpush3.bf16.msra.mxu1 %v5308_v20  ;;  %4609 = vmatprep.subr.bf16.mxu0 %v5309_v21  ;;  %665 = vst.msk [vmem:[#allocation2 + $0xc] sm:$0xf] %vm660_vm0, %v7236_v0  ;;  %v610_v50 = vsel %vm6064_vm6, 0, %v609_v47  ;;  %v556_v51 = vld [vmem:[#allocation2 + $0x18] sm:$0x1]  ;;  %v4569_v52 = vld [vmem:[%s6003_s23 + $0x8] sm:$0xff]   ;;  %vm6152_vm14 = vmor %vm548_vm2, %vm984_vm9 }
  0xd3   : > { %4721 = vmatprep.subr.bf16.mxu1 %v5310_v22  ;;  %v612_v53 = vld [vmem:[#allocation2 + $0x20] sm:$0x1]  ;;  %611 = vst [vmem:[#allocation2 + $0x14] sm:$0x1] %v610_v50  ;;  %v557_v55 = vsel %vm6059_vm5, 0, %v556_v51  ;;  %v4430_v56 = vunpack.c.l.bf16 %v4569_v52  ;;  %v4431_v57 = vunpack.c.h.bf16 %v4569_v52  ;;  %v4570_v60 = vld [vmem:[%s6003_s23 + $0x10] sm:$0xff]   ;;  %v824_v62 = vadd.f32 %v6087_v46, %v786_v48 }
  0xd4   : > { %v613_v58 = vsel %vm6064_vm6, 0, %v612_v53  ;;  %v559_v59 = vld [vmem:[#allocation2 + $0x24] sm:$0x1]  ;;  %v825_v63 = vadd.f32 %v6087_v46, %v787_v49  ;;  %667 = vst.msk [vmem:[#allocation2 + $0x14] sm:$0x1] %vm663_vm7, %v7236_v0  ;;  %v4434_v2 = vunpack.c.l.bf16 %v4570_v60  ;;  %v4435_v5 = vunpack.c.h.bf16 %v4570_v60  ;;  %s4423_s27 = sshll.u32 %s7293_s15, 11 }
  0xd5   : > { %4610 = vmatpush3.bf16.msra.mxu0 %v5311_v23  ;;  %558 = vst [vmem:[#allocation2 + $0x18] sm:$0x1] %v557_v55  ;;  %614 = vst [vmem:[#allocation2 + $0x20] sm:$0x1] %v613_v58  ;;  %v560_v1 = vsel %vm6059_vm5, 0, %v559_v59  ;;  %v788_v3 = vmul.f32 %v4430_v56, %v6075_v39  ;;  %v789_v4 = vmul.f32 %v4431_v57, %v6075_v39  ;;  %v856_v7 = vmax.f32 %v824_v62, 0.0 }
  0xd6   : > { %4722 = vmatpush3.bf16.msra.mxu1 %v5312_v26  ;;  %4611 = vmatprep.subr.bf16.mxu0 %v5313_v27  ;;  %668 = vst.msk [vmem:[#allocation2 + $0x18] sm:$0xf] %vm660_vm0, %v7236_v0  ;;  %561 = vst [vmem:[#allocation2 + $0x24] sm:$0x1] %v560_v1  ;;  %v615_v6 = vld [vmem:[#allocation2 + $0x2c] sm:$0x1]  ;;  %v790_v9 = vmul.f32 %v4434_v2, %v6075_v39  ;;  %v791_v16 = vmul.f32 %v4435_v5, %v6075_v39 }
  0xd7   : > { %4723 = vmatprep.subr.bf16.mxu1 %v5314_v28  ;;  %670 = vst.msk [vmem:[#allocation2 + $0x20] sm:$0x1] %vm663_vm7, %v7236_v0  ;;  %v857_v8 = vmax.f32 %v825_v63, 0.0  ;;  %v616_v10 = vsel %vm6064_vm6, 0, %v615_v6  ;;  %v562_v11 = vld [vmem:[#allocation2 + $0x30] sm:$0x1]  ;;  %v826_v14 = vadd.f32 %v6087_v46, %v788_v3  ;;  %v827_v15 = vadd.f32 %v6087_v46, %v789_v4 }
  0xd8   : > { %671 = vst.msk [vmem:[#allocation2 + $0x24] sm:$0xf] %vm660_vm0, %v7236_v0  ;;  %v1475_v12 = vld [vmem:[#allocation2] sm:$0xf]  ;;  %v1479_v13 = vld [vmem:[#allocation2 + $0x8] sm:$0x1]  ;;  %v4355_v20 = vpack.c.bf16 %v856_v7, %v856_v7  ;;  %v828_v26 = vadd.f32 %v6087_v46, %v790_v9  ;;  %v829_v27 = vadd.f32 %v6087_v46, %v791_v16 }
  0xd9   : > { %4612 = vmatpush3.bf16.msra.mxu0 %v5315_v29  ;;  %617 = vst [vmem:[#allocation2 + $0x2c] sm:$0x1] %v616_v10  ;;  %v563_v17 = vsel %vm6059_vm5, 0, %v562_v11  ;;  %v1476_v18 = vsel %vm6098_vm10, 0, %v1475_v12  ;;  %v1480_v19 = vsel %vm6109_vm11, 0, %v1479_v13  ;;  %v4356_v21 = vpack.c.bf16 %v857_v8, %v857_v8  ;;  %v6146_v28 = vld [vmem:[%s6003_s23 + $0x18] sm:$0xff]  }
  0xda   : > { %4724 = vmatpush3.bf16.msra.mxu1 %v5316_v30  ;;  %4613 = vmatprep.subr.bf16.mxu0 %v5317_v31  ;;  %673 = vst.msk [vmem:[#allocation2 + $0x2c] sm:$0x1] %vm663_vm7, %v7236_v0  ;;  %564 = vst [vmem:[#allocation2 + $0x30] sm:$0x1] %v563_v17  ;;  %v858_v22 = vmax.f32 %v826_v14, 0.0  ;;  %v859_v23 = vmax.f32 %v827_v15, 0.0  ;;  %v4438_v41 = vunpack.c.l.bf16 %v6146_v28  ;;  %v4439_v42 = vunpack.c.h.bf16 %v6146_v28 }
  0xdb   : > { %4725 = vmatprep.subr.bf16.mxu1 %v5318_v32  ;;  %1477 = vst [vmem:[#allocation2] sm:$0xf] %v1476_v18  ;;  %1481 = vst [vmem:[#allocation2 + $0x8] sm:$0x1] %v1480_v19  ;;  %v987_v29 = vshrl.u32 %v4355_v20, 16  ;;  %v990_v30 = vshll.u32 %v4355_v20, 16 }
  0xdc   : > { %674 = vst.msk [vmem:[#allocation2 + $0x30] sm:$0xf] %vm660_vm0, %v7236_v0  ;;  %v995_v31 = vshrl.u32 %v4356_v21, 16  ;;  %v998_v32 = vshll.u32 %v4356_v21, 16  ;;  %v860_v35 = vmax.f32 %v828_v26, 0.0  ;;  %v861_v36 = vmax.f32 %v829_v27, 0.0 }
  0xdd   : > { %4614 = vmatpush3.bf16.msra.mxu0 %v5319_v33  ;;  %v4357_v33 = vpack.c.bf16 %v858_v22, %v858_v22  ;;  %v989_v37 = vrot.slane %v987_v29, 7  ;;  %v1309_v40 = vld [vmem:[#allocation2 + $0xc] sm:$0xf]  ;;  %v1316_v44 = vld [vmem:[#allocation2 + $0x14] sm:$0x1]  ;;  %v792_v3 = vmul.f32 %v4438_v41, %v6075_v39  ;;  %v5325_v28 = vld [vmem:[#allocation9 + $0x100] sm:$0xff]  }
  0xde   : > { %4726 = vmatpush3.bf16.msra.mxu1 %v5320_v34  ;;  %4823 = vmatprep.subr.bf16.mxu0 %v5324_v45  ;;  %v4358_v34 = vpack.c.bf16 %v859_v23, %v859_v23  ;;  %v997_v38 = vrot.slane %v995_v31, 7  ;;  %v1319_v57 = vld [vmem:[#allocation2 + $0x18] sm:$0xf]  ;;  %v1323_v58 = vld [vmem:[#allocation2 + $0x20] sm:$0x1]  ;;  %v4359_v59 = vpack.c.bf16 %v860_v35, %v860_v35  ;;  %v4360_v60 = vpack.c.bf16 %v861_v36, %v861_v36  ;;  %s3980_s5 = sshll.u32 %s7098_s21, 4  ;;  %s7149_s5 = int_to_ptr.vmem [resolvable:$true] %s3980_s5 }
  0xdf   : > { %v1004_v45 = vshrl.u32 %v4357_v33, 16  ;;  %v1007_v47 = vshll.u32 %v4357_v33, 16  ;;  %v992_v50 = vor.u32 %v990_v30, %v989_v37  ;;  %v993_v51 = vrot.slane %v989_v37, 4  ;;  %v618_v17 = vld [vmem:[#allocation2 + $0x38] sm:$0x1]  ;;  %v6180_v37 = vld [vmem:[%s6003_s23 + $0x28] sm:$0xff]  }
  0xe0   : > { %v1012_v48 = vshrl.u32 %v4358_v34, 16  ;;  %v1015_v49 = vshll.u32 %v4358_v34, 16  ;;  %v1000_v52 = vor.u32 %v998_v32, %v997_v38  ;;  %v1002_v53 = vrot.slane %v997_v38, 4  ;;  %v565_v18 = vld [vmem:[#allocation2 + $0x3c] sm:$0x1]  ;;  %v5387_v61 = vld [vmem:[#allocation9 + $0x208] sm:$0xff]  }
  0xe1   : > { %v1006_v55 = vrot.slane %v1004_v45, 7  ;;  %v1310_v1 = vsel %vm6098_vm10, %v992_v50, %v1309_v40  ;;  %v1021_v12 = vshrl.u32 %v4359_v59, 16  ;;  %v1024_v22 = vshll.u32 %v4359_v59, 16  ;;  %v1326_v23 = vld [vmem:[#allocation2 + $0x24] sm:$0xf]  ;;  %v4572_v31 = vld [vmem:[%s6003_s23 + $0x20] sm:$0xff]  }
  0xe2   : > { %v1014_v56 = vrot.slane %v1012_v48, 7  ;;  %v6156_v62 = vld [vmem:[#allocation2] sm:$0xff]   ;;  %v1001_v63 = vsel %vm6152_vm14, %v993_v51, %v1000_v52  ;;  %v1317_v2 = vsel %vm6109_vm11, %v1002_v53, %v1316_v44  ;;  %v5322_v4 = vld [vmem:[#allocation2 + $0x8] ss:$0 sps:$4 sm:$0x11]   ;;  %v1029_v29 = vshrl.u32 %v4360_v60, 16 }
  0xe3   : > { %1311 = vst [vmem:[#allocation2 + $0xc] sm:$0xf] %v1310_v1  ;;  %1313 = vst.msk [vmem:[#allocation2 + $0x10] sm:$0xf] %vm1307_vm1, %v1001_v63  ;;  %v1009_v5 = vor.u32 %v1007_v47, %v1006_v55  ;;  %v1010_v6 = vrot.slane %v1006_v55, 4  ;;  %v1741_v9 = vshrl.u32 %v6156_v62, 16  ;;  %v793_v36 = vmul.f32 %v4439_v42, %v6075_v39 }
  0xe4   : > { %1318 = vst [vmem:[#allocation2 + $0x14] sm:$0x1] %v1317_v2  ;;  %v1017_v7 = vor.u32 %v1015_v49, %v1014_v56  ;;  %v1019_v8 = vrot.slane %v1014_v56, 4  ;;  %v1743_v10 = vshll.u32 %v6156_v62, 16  ;;  %v1949_v11 = vrot.slane %v6156_v62, 1  ;;  %v5330_v40 = vld [vmem:[#allocation9 + $0x148] sm:$0xff]  }
  0xe5   : > { %v1748_v13 = vshll.u32 %v5322_v4, 16  ;;  %v1950_v14 = vrot.slane %v5322_v4, 1  ;;  %v1320_v16 = vsel %vm6098_vm10, %v1009_v5, %v1319_v57  ;;  %v1023_v21 = vrot.slane %v1021_v12, 7  ;;  %v1330_v35 = vld [vmem:[#allocation2 + $0x2c] sm:$0x1]  ;;  %s7295_s18 = sld [smem:[#allocation31_spill]] }
  0xe6   : > { %v1018_v15 = vsel %vm6152_vm14, %v1010_v6, %v1017_v7  ;;  %v1745_v19 = vrot.slane %v1743_v10, 1  ;;  %1321 = vst [vmem:[#allocation2 + $0x18] sm:$0xf] %v1320_v16  ;;  %v1324_v20 = vsel %vm6109_vm11, %v1019_v8, %v1323_v58  ;;  %v1032_v30 = vshll.u32 %v4360_v60, 16  ;;  %v5331_v60 = vld [vmem:[#allocation9 + $0x108] sm:$0xff]   ;;  %v5336_v1 = vld [vmem:[#allocation9 + $0x150] sm:$0xff]  }
  0xe7   : > { %1322 = vst.msk [vmem:[#allocation2 + $0x1c] sm:$0xf] %vm1307_vm1, %v1018_v15  ;;  %v1750_v26 = vrot.slane %v1748_v13, 1  ;;  %v1951_v27 = vsel %vm1948_vm12, %v1949_v11, %v1950_v14  ;;  %1325 = vst [vmem:[#allocation2 + $0x20] sm:$0x1] %v1324_v20  ;;  %v1026_v33 = vor.u32 %v1024_v22, %v1023_v21  ;;  %v1027_v34 = vrot.slane %v1023_v21, 4 }
  0xe8   : > { %v1746_v32 = vor.u32 %v1745_v19, %v1741_v9  ;;  %v1031_v38 = vrot.slane %v1029_v29, 7  ;;  %v830_v41 = vadd.f32 %v6087_v46, %v792_v3  ;;  %v619_v44 = vsel %vm6064_vm6, 0, %v618_v17  ;;  %v5346_v10 = vld [vmem:[#allocation9 + $0x1c0] sm:$0xff]   ;;  %v5337_v16 = vld [vmem:[#allocation9 + $0x110] sm:$0xff]   ;;  %v621_v21 = vld [vmem:[#allocation2 + $0x44] sm:$0x1] }
  0xe9   : > { %v566_v45 = vsel %vm6059_vm5, 0, %v565_v18  ;;  %v1327_v49 = vsel %vm6098_vm10, %v1026_v33, %v1326_v23  ;;  %v831_v42 = vadd.f32 %v6087_v46, %v793_v36  ;;  %620 = vst [vmem:[#allocation2 + $0x38] sm:$0x1] %v619_v44  ;;  %v4442_v50 = vunpack.c.l.bf16 %v4572_v31  ;;  %4935 = vmatprep.subr.bf16.mxu1 %v5346_v10  ;;  %v5347_v22 = vld [vmem:[#allocation9 + $0x180] sm:$0xff]   ;;  %v1333_v33 = vld [vmem:[#allocation2 + $0x30] sm:$0xf] }
  0xea   : > { %v1751_v47 = vsel %vm1739_vm13, %v1746_v32, %v1750_v26  ;;  %v6188_v48 = vld [vmem:[#allocation2 + $0xc] sm:$0xff]   ;;  %567 = vst [vmem:[#allocation2 + $0x3c] sm:$0x1] %v566_v45  ;;  %v1034_v52 = vor.u32 %v1032_v30, %v1031_v38  ;;  %1328 = vst [vmem:[#allocation2 + $0x24] sm:$0xf] %v1327_v49  ;;  %v1036_v53 = vrot.slane %v1031_v38, 4  ;;  %v4443_v55 = vunpack.c.h.bf16 %v4572_v31 }
  0xeb   : > { %2673 = vmatprep.mubr.bf16.mxu0 %v1751_v47  ;;  %v5326_v51 = vld [vmem:[#allocation2 + $0x14] ss:$0 sps:$4 sm:$0x11]   ;;  %676 = vst.msk [vmem:[#allocation2 + $0x38] sm:$0x1] %vm663_vm7, %v7236_v0  ;;  %v4446_v56 = vunpack.c.l.bf16 %v6180_v37  ;;  %2834 = vmatprep.mubr.bf16.mxu1 %v6188_v48  ;;  %v1753_v57 = vshrl.u32 %v6188_v48, 16  ;;  %v794_v5 = vmul.f32 %v4442_v50, %v6075_v39  ;;  %s7296_s19 = smov %s7295_s18  ;;  %s7147_s22 = scalar_lea.hbm %s7295_s18, %s4423_s27 }
  0xec   : > { %677 = vst.msk [vmem:[#allocation2 + $0x3c] sm:$0xf] %vm660_vm0, %v7236_v0  ;;  %2674 = vmatmul.mubr.bf16.vlgmr.msra.gmra.mrb[0].mxu0 %v6156_v62  ;;  %v1755_v58 = vshll.u32 %v6188_v48, 16  ;;  %v1952_v59 = vrot.slane %v6188_v48, 1  ;;  %v862_v63 = vmax.f32 %v830_v41, 0.0  ;;  %2835 = vmatmul.mubr.bf16.vlgmr.msra.gmra.mrb[0].mxu1 %v1951_v27  ;;  %v1760_v2 = vshll.u32 %v5326_v51, 16 }
  0xed   : > { %4824 = vmatpush3.bf16.msra.mxu0 %v5325_v28  ;;  %v1035_v4 = vsel %vm6152_vm14, %v1027_v34, %v1034_v52  ;;  %v1331_v62 = vsel %vm6109_vm11, %v1036_v53, %v1330_v35  ;;  %v1953_v7 = vrot.slane %v5326_v51, 1  ;;  %v863_v8 = vmax.f32 %v831_v42, 0.0  ;;  %v5342_v34 = vld [vmem:[#allocation9 + $0x158] sm:$0xff]   ;;  %4936 = vmatpush3.bf16.msra.mxu1 %v5347_v22  ;;  %v568_v50 = vld [vmem:[#allocation2 + $0x48] sm:$0x1]  ;;  %s3965_s25 = scalar_lea.sflag [#allocation5], %s5997_s10 }
  0xee   : > { %v6203_v3 = vld [vmem:[#allocation2 + $0x18] sm:$0xff]   ;;  %v1757_v6 = vrot.slane %v1755_v58, 1  ;;  %1329 = vst.msk [vmem:[#allocation2 + $0x28] sm:$0xf] %vm1307_vm1, %v1035_v4  ;;  %4825 = vmatprep.subr.bf16.mxu0 %v5330_v40  ;;  %1332 = vst [vmem:[#allocation2 + $0x2c] sm:$0x1] %v1331_v62  ;;  %v4361_v9 = vpack.c.bf16 %v862_v63, %v862_v63  ;;  %v795_v15 = vmul.f32 %v4443_v55, %v6075_v39 }
  0xef   : > { %v1762_v11 = vrot.slane %v1760_v2, 1  ;;  %2842 = vmatprep.mubr.bf16.mxu1 %v6203_v3  ;;  %v5328_v12 = vld [vmem:[#allocation2 + $0x20] ss:$0 sps:$4 sm:$0x11]   ;;  %v1765_v13 = vshrl.u32 %v6203_v3, 16  ;;  %v1767_v14 = vshll.u32 %v6203_v3, 16  ;;  %v6216_v18 = vsel %vm1948_vm12, %v1952_v59, %v1953_v7 }
  0xf0   : > { %v1758_v17 = vor.u32 %v1757_v6, %v1753_v57  ;;  %v1955_v19 = vrot.slane %v6203_v3, 1  ;;  %v4362_v20 = vpack.c.bf16 %v863_v8, %v863_v8  ;;  %v1772_v26 = vshll.u32 %v5328_v12, 16  ;;  %v5343_v44 = vld [vmem:[#allocation9 + $0x118] sm:$0xff]   ;;  %s5560_s30 = scalar_lea.vmem %s7149_s5, 2048  ;;  %p7297_p11 = scmp.ne.s32.totalorder %s7294_s12, 0 }
  0xf1   : > { %v1769_v23 = vrot.slane %v1767_v14, 1  ;;  %v1956_v27 = vrot.slane %v5328_v12, 1  ;;  %4826 = vmatpush3.bf16.msra.mxu0 %v5331_v60  ;;  %v1038_v28 = vshrl.u32 %v4361_v9, 16  ;;  %v1041_v30 = vshll.u32 %v4361_v9, 16  ;;  %v624_v10 = vld [vmem:[#allocation2 + $0x50] sm:$0x1]  ;;  %p5561_p2 = scmp.ne.s32.totalorder %s7149_s5, %s5560_s30 }
  0xf2   : > { %v6220_v29 = vsel %vm1739_vm13, %v1758_v17, %v1762_v11  ;;  %v1046_v31 = vshrl.u32 %v4362_v20, 16  ;;  %v1049_v32 = vshll.u32 %v4362_v20, 16  ;;  %4827 = vmatprep.subr.bf16.mxu0 %v5336_v1  ;;  %v1774_v36 = vrot.slane %v1772_v26, 1  ;;  %v1337_v41 = vld [vmem:[#allocation2 + $0x38] sm:$0x1]  ;;  %s5660_s24 = smov [#allocation12]  }
  0xf3   : > { %2681 = vmatprep.mubr.bf16.mxu0 %v6220_v29  ;;  %v1770_v35 = vor.u32 %v1769_v23, %v1765_v13  ;;  %v6224_v38 = vsel %vm1948_vm12, %v1955_v19, %v1956_v27  ;;  %v1040_v40 = vrot.slane %v1038_v28, 7  ;;  %v832_v47 = vadd.f32 %v6087_v46, %v794_v5  ;;  %v5350_v5 = vld [vmem:[#allocation9 + $0x160] sm:$0xff]   ;;  %v571_v20 = vld [vmem:[#allocation2 + $0x54] sm:$0x1]  ;;  %v4574_v28 = vld [vmem:[%s6003_s23 + $0x30] sm:$0xff]   ;;  %p5562_p0 = pnand %p5561_p2, %p7297_p11  ;;  %s5564_s1 = sshll.u32 %s5660_s24, 4  ;;  %s5565_s1 = int_to_ptr.vmem [resolvable:$false] %s5564_s1 }
  0xf4   : > { %2682 = vmatmul.mubr.bf16.gmra.mrb[4].mxu0 %v6188_v48  ;;  %v1048_v45 = vrot.slane %v1046_v31, 7  ;;  %v833_v49 = vadd.f32 %v6087_v46, %v795_v15  ;;  %v622_v42 = vsel %vm6064_vm6, 0, %v621_v21  ;;  %2843 = vmatmul.mubr.bf16.gmra.mrb[4].mxu1 %v6216_v18  ;;  %v4447_v48 = vunpack.c.h.bf16 %v6180_v37  ;;  %v5351_v21 = vld [vmem:[#allocation9 + $0x120] sm:$0xff]   ;;  %s5566_s29 = scalar_lea.vmem %s5565_s1, 4096  ;;  %p5567_p1 = scmp.lt.s32.totalorder %s7149_s5, %s5565_s1 }
  0xf5   : > { %v6233_v51 = vsel %vm1739_vm13, %v1770_v35, %v1774_v36  ;;  %v6235_v52 = vld [vmem:[#allocation2 + $0x24] sm:$0xff]   ;;  %v1043_v53 = vor.u32 %v1041_v30, %v1040_v40  ;;  %v1044_v55 = vrot.slane %v1040_v40, 4  ;;  %4828 = vmatpush3.bf16.msra.mxu0 %v5337_v16  ;;  %623 = vst [vmem:[#allocation2 + $0x44] sm:$0x1] %v622_v42  ;;  %v864_v60 = vmax.f32 %v832_v47, 0.0  ;;  %p5563_p8 = pneg %p5562_p0  ;;  %p5568_p13 = scmp.lt.s32.totalorder %s5566_s29, %s5560_s30 }
  0xf6   : > { %2689 = vmatprep.mubr.bf16.mxu0 %v6233_v51  ;;  %v5332_v57 = vld [vmem:[#allocation2 + $0x2c] ss:$0 sps:$4 sm:$0x11]   ;;  %v1051_v58 = vor.u32 %v1049_v32, %v1048_v45  ;;  %v1053_v59 = vrot.slane %v1048_v45, 4  ;;  %v865_v63 = vmax.f32 %v833_v49, 0.0  ;;  %4829 = vmatprep.subr.bf16.mxu0 %v5342_v34  ;;  %v1777_v1 = vshrl.u32 %v6235_v52, 16 }
  0xf7   : > { %679 = vst.msk [vmem:[#allocation2 + $0x44] sm:$0x1] %vm663_vm7, %v7236_v0  ;;  %2850 = vmatprep.mubr.bf16.mxu1 %v6235_v52  ;;  %v1779_v2 = vshll.u32 %v6235_v52, 16  ;;  %v1334_v4 = vsel %vm6098_vm10, %v1043_v53, %v1333_v33  ;;  %v1958_v62 = vrot.slane %v6235_v52, 1  ;;  %v1784_v6 = vshll.u32 %v5332_v57, 16  ;;  %p5569_p5 = por %p5568_p13, %p5567_p1 }
  0xf8   : > { %v1052_v7 = vsel %vm6152_vm14, %v1044_v55, %v1051_v58  ;;  %1335 = vst [vmem:[#allocation2 + $0x30] sm:$0xf] %v1334_v4  ;;  %v1959_v8 = vrot.slane %v5332_v57, 1  ;;  %v1338_v9 = vsel %vm6109_vm11, %v1053_v59, %v1337_v41  ;;  %v4363_v12 = vpack.c.bf16 %v864_v60, %v864_v60  ;;  %v1340_v31 = vld [vmem:[#allocation2 + $0x3c] sm:$0xf]  ;;  %v5354_v41 = vld [vmem:[#allocation9 + $0x1c8] sm:$0xff]  }
  0xf9   : > { %v1781_v11 = vrot.slane %v1779_v2, 1  ;;  %1336 = vst.msk [vmem:[#allocation2 + $0x34] sm:$0xf] %vm1307_vm1, %v1052_v7  ;;  %1339 = vst [vmem:[#allocation2 + $0x38] sm:$0x1] %v1338_v9  ;;  %v4364_v13 = vpack.c.bf16 %v865_v63, %v865_v63  ;;  %v569_v14 = vsel %vm6059_vm5, 0, %v568_v50  ;;  %4830 = vmatpush3.bf16.msra.mxu0 %v5343_v44  ;;  %v796_v17 = vmul.f32 %v4446_v56, %v6075_v39  ;;  %p5570_p9 = pnand %p5569_p5, %p5563_p8 }
  0xfa   : > { %v1786_v15 = vrot.slane %v1784_v6, 1  ;;  %v6255_v16 = vsel %vm1948_vm12, %v1958_v62, %v1959_v8  ;;  %570 = vst [vmem:[#allocation2 + $0x48] sm:$0x1] %v569_v14  ;;  %v797_v19 = vmul.f32 %v4447_v48, %v6075_v39  ;;  %4831 = vmatprep.subr.bf16.mxu0 %v5350_v5  ;;  %v1055_v23 = vshrl.u32 %v4363_v12, 16  ;;  %v627_v33 = vld [vmem:[#allocation2 + $0x5c] sm:$0x1]  ;;  %4937 = vmatprep.subr.bf16.mxu1 %v5354_v41 }
  0xfb   : > { %v1782_v22 = vor.u32 %v1781_v11, %v1777_v1  ;;  %v1058_v26 = vshll.u32 %v4363_v12, 16  ;;  %v1063_v27 = vshrl.u32 %v4364_v13, 16  ;;  %680 = vst.msk [vmem:[#allocation2 + $0x48] sm:$0xf] %vm660_vm0, %v7236_v0  ;;  %v1066_v30 = vshll.u32 %v4364_v13, 16  ;;  %v5355_v48 = vld [vmem:[#allocation9 + $0x188] sm:$0xff]  }
  0xfc   : > { %2690 = vmatmul.mubr.bf16.gmra.mrb[8].mxu0 %v6203_v3  ;;  %v834_v37 = vadd.f32 %v6087_v46, %v796_v17  ;;  %v835_v56 = vadd.f32 %v6087_v46, %v797_v19  ;;  %v625_v32 = vsel %vm6064_vm6, 0, %v624_v10  ;;  %2851 = vmatmul.mubr.bf16.gmra.mrb[8].mxu1 %v6224_v38  ;;  %v1057_v35 = vrot.slane %v1055_v23, 7  ;;  %v574_v14 = vld [vmem:[#allocation2 + $0x60] sm:$0x1] }
  0xfd   : > { %v6271_v34 = vsel %vm1739_vm13, %v1782_v22, %v1786_v15  ;;  %v1065_v36 = vrot.slane %v1063_v27, 7  ;;  %626 = vst [vmem:[#allocation2 + $0x50] sm:$0x1] %v625_v32  ;;  %v572_v3 = vsel %vm6059_vm5, 0, %v571_v20  ;;  %4832 = vmatpush3.bf16.msra.mxu0 %v5351_v21  ;;  %v4450_v47 = vunpack.c.l.bf16 %v4574_v28  ;;  %4938 = vmatpush3.bf16.msra.mxu1 %v5355_v48  ;;  %v6300_v15 = vld [vmem:[%s6003_s23 + $0x38] sm:$0xff]   ;;  %v5358_v22 = vld [vmem:[#allocation9 + $0x168] sm:$0xff]  }
  0xfe   : > { %v1344_v40 = vld [vmem:[#allocation2 + $0x44] sm:$0x1]  ;;  %2697 = vmatprep.mubr.bf16.mxu0 %v6271_v34  ;;  %v866_v44 = vmax.f32 %v834_v37, 0.0  ;;  %v867_v45 = vmax.f32 %v835_v56, 0.0  ;;  %682 = vst.msk [vmem:[#allocation2 + $0x50] sm:$0x1] %vm663_vm7, %v7236_v0  ;;  %v4451_v49 = vunpack.c.h.bf16 %v4574_v28  ;;  %v1060_v42 = vor.u32 %v1058_v26, %v1057_v35  ;;  %4833 = vmatprep.subr.bf16.mxu0 %v5358_v22 }
  0xff   : > { %573 = vst [vmem:[#allocation2 + $0x54] sm:$0x1] %v572_v3  ;;  %v1061_v50 = vrot.slane %v1057_v35, 4  ;;  %v1068_v53 = vor.u32 %v1066_v30, %v1065_v36  ;;  %v1070_v55 = vrot.slane %v1065_v36, 4  ;;  %v798_v60 = vmul.f32 %v4450_v47, %v6075_v39  ;;  %v5359_v41 = vld [vmem:[#allocation9 + $0x128] sm:$0xff]  }
 0x100   : > { %683 = vst.msk [vmem:[#allocation2 + $0x54] sm:$0xf] %vm660_vm0, %v7236_v0  ;;  %v6280_v57 = vld [vmem:[#allocation2 + $0x30] sm:$0xff]   ;;  %v4365_v58 = vpack.c.bf16 %v866_v44, %v866_v44  ;;  %v4366_v59 = vpack.c.bf16 %v867_v45, %v867_v45  ;;  %v799_v63 = vmul.f32 %v4451_v49, %v6075_v39  ;;  %v5334_v1 = vld [vmem:[#allocation2 + $0x38] ss:$0 sps:$4 sm:$0x11]   ;;  %v1341_v4 = vsel %vm6098_vm10, %v1060_v42, %v1340_v31 }
 0x101   : > { %v1069_v2 = vsel %vm6152_vm14, %v1061_v50, %v1068_v53  ;;  %v1345_v62 = vsel %vm6109_vm11, %v1070_v55, %v1344_v40  ;;  %v628_v5 = vsel %vm6064_vm6, 0, %v627_v33  ;;  %2858 = vmatprep.mubr.bf16.mxu1 %v6280_v57  ;;  %v1789_v6 = vshrl.u32 %v6280_v57, 16  ;;  %1342 = vst [vmem:[#allocation2 + $0x3c] sm:$0xf] %v1341_v4  ;;  %v6310_v31 = vld [vmem:[%s6003_s23 + $0x40] sm:$0xff]   ;;  %4834 = vmatpush3.bf16.msra.mxu0 %v5359_v41 }
 0x102   : > { %v1791_v7 = vshll.u32 %v6280_v57, 16  ;;  %1343 = vst.msk [vmem:[#allocation2 + $0x40] sm:$0xf] %vm1307_vm1, %v1069_v2  ;;  %v1961_v8 = vrot.slane %v6280_v57, 1  ;;  %1346 = vst [vmem:[#allocation2 + $0x44] sm:$0x1] %v1345_v62  ;;  %v836_v21 = vadd.f32 %v6087_v46, %v798_v60  ;;  %v837_v30 = vadd.f32 %v6087_v46, %v799_v63 }
 0x103   : > { %v1072_v9 = vshrl.u32 %v4365_v58, 16  ;;  %629 = vst [vmem:[#allocation2 + $0x5c] sm:$0x1] %v628_v5  ;;  %v1796_v10 = vshll.u32 %v5334_v1, 16  ;;  %v1962_v11 = vrot.slane %v5334_v1, 1  ;;  %v1075_v12 = vshll.u32 %v4365_v58, 16 }
 0x104   : > { %v1080_v13 = vshrl.u32 %v4366_v59, 16  ;;  %685 = vst.msk [vmem:[#allocation2 + $0x5c] sm:$0x1] %vm663_vm7, %v7236_v0  ;;  %2698 = vmatmul.mubr.bf16.gmra.mrb[12].mxu0 %v6235_v52  ;;  %v1793_v17 = vrot.slane %v1791_v7, 1  ;;  %v1083_v20 = vshll.u32 %v4366_v59, 16  ;;  %2859 = vmatmul.mubr.bf16.gmra.mrb[12].mxu1 %v6255_v16  ;;  %v868_v33 = vmax.f32 %v836_v21, 0.0 }
 0x105   : > { %v1074_v19 = vrot.slane %v1072_v9, 7  ;;  %v1798_v23 = vrot.slane %v1796_v10, 1  ;;  %v6306_v26 = vsel %vm1948_vm12, %v1961_v8, %v1962_v11  ;;  %v1347_v28 = vld [vmem:[#allocation2 + $0x48] sm:$0xf]  ;;  %v1351_v32 = vld [vmem:[#allocation2 + $0x50] sm:$0x1]  ;;  %v4454_v49 = vunpack.c.l.bf16 %v6300_v15 }
 0x106   : > { %v1082_v27 = vrot.slane %v1080_v13, 7  ;;  %v1794_v37 = vor.u32 %v1793_v17, %v1789_v6  ;;  %v869_v40 = vmax.f32 %v837_v30, 0.0  ;;  %v575_v3 = vsel %vm6059_vm5, 0, %v574_v14  ;;  %v630_v7 = vld [vmem:[#allocation2 + $0x68] sm:$0x1] }
 0x107   : > { %v1077_v52 = vor.u32 %v1075_v12, %v1074_v19  ;;  %v1078_v56 = vrot.slane %v1074_v19, 4  ;;  %v4367_v47 = vpack.c.bf16 %v868_v33, %v868_v33  ;;  %576 = vst [vmem:[#allocation2 + $0x60] sm:$0x1] %v575_v3  ;;  %v4455_v48 = vunpack.c.h.bf16 %v6300_v15  ;;  %v1354_v6 = vld [vmem:[#allocation2 + $0x54] sm:$0xf]  ;;  %v5362_v19 = vld [vmem:[#allocation9 + $0x1d0] sm:$0xff]  }
 0x108   : > { %v1085_v35 = vor.u32 %v1083_v20, %v1082_v27  ;;  %v1087_v36 = vrot.slane %v1082_v27, 4  ;;  %v6315_v44 = vsel %vm1739_vm13, %v1794_v37, %v1798_v23  ;;  %v4368_v55 = vpack.c.bf16 %v869_v40, %v869_v40  ;;  %686 = vst.msk [vmem:[#allocation2 + $0x60] sm:$0xf] %vm660_vm0, %v7236_v0  ;;  %v577_v8 = vld [vmem:[#allocation2 + $0x6c] sm:$0x1]  ;;  %4939 = vmatprep.subr.bf16.mxu1 %v5362_v19 }
 0x109   : > { %v1348_v45 = vsel %vm6098_vm10, %v1077_v52, %v1347_v28  ;;  %2705 = vmatprep.mubr.bf16.mxu0 %v6315_v44  ;;  %v6321_v42 = vld [vmem:[#allocation2 + $0x3c] sm:$0xff]   ;;  %v5338_v58 = vld [vmem:[#allocation2 + $0x44] ss:$0 sps:$4 sm:$0x11]   ;;  %v1089_v59 = vshrl.u32 %v4367_v47, 16  ;;  %v800_v60 = vmul.f32 %v4454_v49, %v6075_v39  ;;  %v4458_v63 = vunpack.c.l.bf16 %v6310_v31  ;;  %v5363_v20 = vld [vmem:[#allocation9 + $0x190] sm:$0xff]  }
 0x10a   : > { %v1086_v50 = vsel %vm6152_vm14, %v1078_v56, %v1085_v35  ;;  %1349 = vst [vmem:[#allocation2 + $0x48] sm:$0xf] %v1348_v45  ;;  %v1352_v53 = vsel %vm6109_vm11, %v1087_v36, %v1351_v32  ;;  %v4459_v1 = vunpack.c.h.bf16 %v6310_v31  ;;  %2866 = vmatprep.mubr.bf16.mxu1 %v6321_v42  ;;  %v1801_v2 = vshrl.u32 %v6321_v42, 16  ;;  %v633_v37 = vld [vmem:[#allocation2 + $0x74] sm:$0x1]  ;;  %4940 = vmatpush3.bf16.msra.mxu1 %v5363_v20 }
 0x10b   : > { %1350 = vst.msk [vmem:[#allocation2 + $0x4c] sm:$0xf] %vm1307_vm1, %v1086_v50  ;;  %1353 = vst [vmem:[#allocation2 + $0x50] sm:$0x1] %v1352_v53  ;;  %v1803_v4 = vshll.u32 %v6321_v42, 16  ;;  %v1964_v62 = vrot.slane %v6321_v42, 1  ;;  %v801_v15 = vmul.f32 %v4455_v48, %v6075_v39  ;;  %v838_v17 = vadd.f32 %v6087_v46, %v800_v60 }
 0x10c   : > { %v1092_v5 = vshll.u32 %v4367_v47, 16  ;;  %2706 = vmatmul.mubr.bf16.gmra.mrb[16].mxu0 %v6280_v57  ;;  %v1808_v9 = vshll.u32 %v5338_v58, 16  ;;  %v1965_v10 = vrot.slane %v5338_v58, 1  ;;  %v1091_v11 = vrot.slane %v1089_v59, 7  ;;  %2867 = vmatmul.mubr.bf16.gmra.mrb[16].mxu1 %v6306_v26  ;;  %v1358_v56 = vld [vmem:[#allocation2 + $0x5c] sm:$0x1] }
 0x10d   : > { %v1097_v12 = vshrl.u32 %v4368_v55, 16  ;;  %v1805_v13 = vrot.slane %v1803_v4, 1  ;;  %v1100_v14 = vshll.u32 %v4368_v55, 16  ;;  %v839_v30 = vadd.f32 %v6087_v46, %v801_v15 }
 0x10e   : > { %v1810_v21 = vrot.slane %v1808_v9, 1  ;;  %v6343_v22 = vsel %vm1948_vm12, %v1964_v62, %v1965_v10  ;;  %v1094_v23 = vor.u32 %v1092_v5, %v1091_v11  ;;  %v1095_v57 = vrot.slane %v1091_v11, 4 }
 0x10f   : > { %v1806_v27 = vor.u32 %v1805_v13, %v1801_v2  ;;  %v1099_v28 = vrot.slane %v1097_v12, 7  ;;  %v870_v31 = vmax.f32 %v838_v17, 0.0  ;;  %v631_v32 = vsel %vm6064_vm6, 0, %v630_v7  ;;  %v4577_v2 = vld [vmem:[%s6003_s23 + $0x48] sm:$0xff]  }
 0x110   : > { %v1355_v52 = vsel %vm6098_vm10, %v1094_v23, %v1354_v6  ;;  %v578_v33 = vsel %vm6059_vm5, 0, %v577_v8  ;;  %v802_v35 = vmul.f32 %v4458_v63, %v6075_v39  ;;  %632 = vst [vmem:[#allocation2 + $0x68] sm:$0x1] %v631_v32  ;;  %v871_v49 = vmax.f32 %v839_v30, 0.0  ;;  %v580_v63 = vld [vmem:[#allocation2 + $0x78] sm:$0x1] }
 0x111   : > { %v6354_v36 = vsel %vm1739_vm13, %v1806_v27, %v1810_v21  ;;  %v1102_v3 = vor.u32 %v1100_v14, %v1099_v28  ;;  %1356 = vst [vmem:[#allocation2 + $0x54] sm:$0xf] %v1355_v52  ;;  %v1104_v41 = vrot.slane %v1099_v28, 4  ;;  %v4369_v45 = vpack.c.bf16 %v870_v31, %v870_v31  ;;  %579 = vst [vmem:[#allocation2 + $0x6c] sm:$0x1] %v578_v33  ;;  %v5370_v21 = vld [vmem:[#allocation9 + $0x1d8] sm:$0xff]  }
 0x112   : > { %v6356_v40 = vld [vmem:[#allocation2 + $0x48] sm:$0xff]   ;;  %2713 = vmatprep.mubr.bf16.mxu0 %v6354_v36  ;;  %v5340_v47 = vld [vmem:[#allocation2 + $0x50] ss:$0 sps:$4 sm:$0x11]   ;;  %688 = vst.msk [vmem:[#allocation2 + $0x68] sm:$0x1] %vm663_vm7, %v7236_v0  ;;  %v803_v50 = vmul.f32 %v4459_v1, %v6075_v39  ;;  %v840_v53 = vadd.f32 %v6087_v46, %v802_v35  ;;  %v4370_v5 = vpack.c.bf16 %v871_v49, %v871_v49  ;;  %v4463_v27 = vunpack.c.h.bf16 %v4577_v2 }
 0x113   : > { %689 = vst.msk [vmem:[#allocation2 + $0x6c] sm:$0xf] %vm660_vm0, %v7236_v0  ;;  %v634_v55 = vsel %vm6064_vm6, 0, %v633_v37  ;;  %2874 = vmatprep.mubr.bf16.mxu1 %v6356_v40  ;;  %v1813_v48 = vshrl.u32 %v6356_v40, 16  ;;  %v1815_v58 = vshll.u32 %v6356_v40, 16  ;;  %v1103_v59 = vsel %vm6152_vm14, %v1095_v57, %v1102_v3  ;;  %v5366_v39 = vld [vmem:[#allocation9 + $0x170] sm:$0xff]   ;;  %4941 = vmatprep.subr.bf16.mxu1 %v5370_v21 }
 0x114   : > { %v1967_v60 = vrot.slane %v6356_v40, 1  ;;  %635 = vst [vmem:[#allocation2 + $0x74] sm:$0x1] %v634_v55  ;;  %2714 = vmatmul.mubr.bf16.gmra.mrb[20].mxu0 %v6321_v42  ;;  %v1820_v1 = vshll.u32 %v5340_v47, 16  ;;  %1357 = vst.msk [vmem:[#allocation2 + $0x58] sm:$0xf] %vm1307_vm1, %v1103_v59  ;;  %v1359_v62 = vsel %vm6109_vm11, %v1104_v41, %v1358_v56  ;;  %2875 = vmatmul.mubr.bf16.gmra.mrb[20].mxu1 %v6343_v22 }
 0x115   : > { %v1968_v4 = vrot.slane %v5340_v47, 1  ;;  %691 = vst.msk [vmem:[#allocation2 + $0x74] sm:$0x1] %vm663_vm7, %v7236_v0  ;;  %v1817_v6 = vrot.slane %v1815_v58, 1  ;;  %1360 = vst [vmem:[#allocation2 + $0x5c] sm:$0x1] %v1359_v62  ;;  %v841_v9 = vadd.f32 %v6087_v46, %v803_v50  ;;  %4835 = vmatprep.subr.bf16.mxu0 %v5366_v39  ;;  %v4462_v46 = vunpack.c.l.bf16 %v4577_v2 }
 0x116   : > { %v1106_v7 = vshrl.u32 %v4369_v45, 16  ;;  %v1109_v8 = vshll.u32 %v4369_v45, 16  ;;  %v5367_v42 = vld [vmem:[#allocation9 + $0x130] sm:$0xff]   ;;  %v1822_v10 = vrot.slane %v1820_v1, 1  ;;  %v1114_v12 = vshrl.u32 %v4370_v5, 16  ;;  %v5371_v56 = vld [vmem:[#allocation9 + $0x198] sm:$0xff]  }
 0x117   : > { %v6383_v11 = vsel %vm1948_vm12, %v1967_v60, %v1968_v4  ;;  %v1117_v13 = vshll.u32 %v4370_v5, 16  ;;  %v1818_v14 = vor.u32 %v1817_v6, %v1813_v48  ;;  %v1361_v17 = vld [vmem:[#allocation2 + $0x60] sm:$0xf]  ;;  %v872_v19 = vmax.f32 %v840_v53, 0.0  ;;  %4836 = vmatpush3.bf16.msra.mxu0 %v5367_v42  ;;  %4942 = vmatpush3.bf16.msra.mxu1 %v5371_v56  ;;  %v5374_v55 = vld [vmem:[#allocation9 + $0x178] sm:$0xff]  }
 0x118   : > { %v1108_v15 = vrot.slane %v1106_v7, 7  ;;  %v873_v20 = vmax.f32 %v841_v9, 0.0  ;;  %v1116_v23 = vrot.slane %v1114_v12, 7  ;;  %v581_v57 = vsel %vm6059_vm5, 0, %v580_v63  ;;  %v6396_v3 = vld [vmem:[%s7203_s3] ss:$0 sm:$0xff]  ;;  %4837 = vmatprep.subr.bf16.mxu0 %v5374_v55 }
 0x119   : > { %v6388_v28 = vsel %vm1739_vm13, %v1818_v14, %v1822_v10  ;;  %v1365_v37 = vld [vmem:[#allocation2 + $0x68] sm:$0x1]  ;;  %v4371_v52 = vpack.c.bf16 %v872_v19, %v872_v19  ;;  %582 = vst [vmem:[#allocation2 + $0x78] sm:$0x1] %v581_v57  ;;  %v804_v41 = vmul.f32 %v6396_v3, %v4462_v46  ;;  %v805_v53 = vmul.f32 %v6396_v3, %v4463_v27  ;;  %v6412_v63 = vld [vmem:[%s7204_s4] ss:$0 sm:$0xff] }
 0x11a   : > { %v1111_v30 = vor.u32 %v1109_v8, %v1108_v15  ;;  %v1112_v31 = vrot.slane %v1108_v15, 4  ;;  %2721 = vmatprep.mubr.bf16.mxu0 %v6388_v28  ;;  %v1119_v32 = vor.u32 %v1117_v13, %v1116_v23  ;;  %v1121_v33 = vrot.slane %v1116_v23, 4  ;;  %692 = vst.msk [vmem:[#allocation2 + $0x78] sm:$0xf] %vm660_vm0, %v7236_v0  ;;  %v1368_v62 = vld [vmem:[#allocation2 + $0x6c] sm:$0xf] }
 0x11b   : > { %v4372_v35 = vpack.c.bf16 %v873_v20, %v873_v20  ;;  %v6399_v45 = vld [vmem:[#allocation2 + $0x54] sm:$0xff]   ;;  %v1123_v49 = vshrl.u32 %v4371_v52, 16  ;;  %v1126_v50 = vshll.u32 %v4371_v52, 16  ;;  %v842_v2 = vadd.f32 %v6412_v63, %v804_v41  ;;  %v636_v5 = vld [vmem:[#allocation2 + $0x80] sm:$0x1]  ;;  %v6422_v10 = vld [vmem:[%s6003_s23 + $0x50] sm:$0xff]  }
 0x11c   : > { %v1362_v47 = vsel %vm6098_vm10, %v1111_v30, %v1361_v17  ;;  %2722 = vmatmul.mubr.bf16.gmra.mrb[24].mxu0 %v6356_v40  ;;  %v5344_v48 = vld [vmem:[#allocation2 + $0x5c] ss:$0 sps:$4 sm:$0x11]   ;;  %v1120_v58 = vsel %vm6152_vm14, %v1112_v31, %v1119_v32  ;;  %v1366_v59 = vsel %vm6109_vm11, %v1121_v33, %v1365_v37  ;;  %2882 = vmatprep.mubr.bf16.mxu1 %v6399_v45  ;;  %v1825_v40 = vshrl.u32 %v6399_v45, 16  ;;  %v583_v6 = vld [vmem:[#allocation2 + $0x84] sm:$0x1] }
 0x11d   : > { %1363 = vst [vmem:[#allocation2 + $0x60] sm:$0xf] %v1362_v47  ;;  %v1131_v60 = vshrl.u32 %v4372_v35, 16  ;;  %v1827_v39 = vshll.u32 %v6399_v45, 16  ;;  %1364 = vst.msk [vmem:[#allocation2 + $0x64] sm:$0xf] %vm1307_vm1, %v1120_v58  ;;  %2883 = vmatmul.mubr.bf16.gmra.mrb[24].mxu1 %v6383_v11  ;;  %v843_v17 = vadd.f32 %v6412_v63, %v805_v53  ;;  %v4466_v53 = vunpack.c.l.bf16 %v6422_v10 }
 0x11e   : > { %v1970_v1 = vrot.slane %v6399_v45, 1  ;;  %1367 = vst [vmem:[#allocation2 + $0x68] sm:$0x1] %v1366_v59  ;;  %v1125_v4 = vrot.slane %v1123_v49, 7  ;;  %v1832_v7 = vshll.u32 %v5344_v48, 16  ;;  %v1971_v8 = vrot.slane %v5344_v48, 1 }
 0x11f   : > { %v1133_v9 = vrot.slane %v1131_v60, 7  ;;  %v1134_v42 = vshll.u32 %v4372_v35, 16  ;;  %v1829_v12 = vrot.slane %v1827_v39, 1  ;;  %v1372_v15 = vld [vmem:[#allocation2 + $0x74] sm:$0x1]  ;;  %v874_v30 = vmax.f32 %v842_v2, 0.0 }
 0x120   : > { %v1128_v13 = vor.u32 %v1126_v50, %v1125_v4  ;;  %v1129_v14 = vrot.slane %v1125_v4, 4  ;;  %v639_v19 = vld [vmem:[#allocation2 + $0x8c] sm:$0x1]  ;;  %v1834_v20 = vrot.slane %v1832_v7, 1  ;;  %v6426_v21 = vsel %vm1948_vm12, %v1970_v1, %v1971_v8  ;;  %v6431_v37 = vld [vmem:[%s6003_s23 + $0x58] sm:$0xff]   ;;  %v5376_v41 = vld [vmem:[#allocation9 + $0x1e0] sm:$0xff]  }
 0x121   : > { %v1136_v23 = vor.u32 %v1134_v42, %v1133_v9  ;;  %v1138_v57 = vrot.slane %v1133_v9, 4  ;;  %v1830_v46 = vor.u32 %v1829_v12, %v1825_v40  ;;  %v875_v31 = vmax.f32 %v843_v17, 0.0  ;;  %v5375_v35 = vld [vmem:[#allocation9 + $0x138] sm:$0xff]   ;;  %4943 = vmatprep.subr.bf16.mxu1 %v5376_v41  ;;  %v1375_v9 = vld [vmem:[#allocation2 + $0x78] sm:$0xf] }
 0x122   : > { %v1369_v27 = vsel %vm6098_vm10, %v1128_v13, %v1368_v62  ;;  %v637_v32 = vsel %vm6064_vm6, 0, %v636_v5  ;;  %v584_v33 = vsel %vm6059_vm5, 0, %v583_v6  ;;  %v4373_v49 = vpack.c.bf16 %v874_v30, %v874_v30  ;;  %v586_v55 = vld [vmem:[#allocation2 + $0x90] sm:$0x1]  ;;  %4838 = vmatpush3.bf16.msra.mxu0 %v5375_v35 }
 0x123   : > { %v1137_v52 = vsel %vm6152_vm14, %v1129_v14, %v1136_v23  ;;  %1370 = vst [vmem:[#allocation2 + $0x6c] sm:$0xf] %v1369_v27  ;;  %v1373_v56 = vsel %vm6109_vm11, %v1138_v57, %v1372_v15  ;;  %v6442_v47 = vsel %vm1739_vm13, %v1830_v46, %v1834_v20  ;;  %v4374_v50 = vpack.c.bf16 %v875_v31, %v875_v31  ;;  %v5378_v20 = vld [vmem:[#allocation9 + $0x1e8] sm:$0xff]  }
 0x124   : > { %1371 = vst.msk [vmem:[#allocation2 + $0x70] sm:$0xf] %vm1307_vm1, %v1137_v52  ;;  %1374 = vst [vmem:[#allocation2 + $0x74] sm:$0x1] %v1373_v56  ;;  %2729 = vmatprep.mubr.bf16.mxu0 %v6442_v47  ;;  %v6447_v48 = vld [vmem:[#allocation2 + $0x60] sm:$0xff]   ;;  %v4467_v58 = vunpack.c.h.bf16 %v6422_v10  ;;  %v640_v59 = vsel %vm6064_vm6, 0, %v639_v19  ;;  %v4470_v60 = vunpack.c.l.bf16 %v6431_v37  ;;  %v4471_v2 = vunpack.c.h.bf16 %v6431_v37 }
 0x125   : > { %638 = vst [vmem:[#allocation2 + $0x80] sm:$0x1] %v637_v32  ;;  %585 = vst [vmem:[#allocation2 + $0x84] sm:$0x1] %v584_v33  ;;  %2730 = vmatmul.mubr.bf16.gmra.mrb[28].mxu0 %v6399_v45  ;;  %v1140_v39 = vshrl.u32 %v4373_v49, 16  ;;  %v1143_v1 = vshll.u32 %v4373_v49, 16  ;;  %v806_v62 = vmul.f32 %v6396_v3, %v4466_v53  ;;  %2890 = vmatprep.mubr.bf16.mxu1 %v6447_v48 }
 0x126   : > { %694 = vst.msk [vmem:[#allocation2 + $0x80] sm:$0x1] %vm663_vm7, %v7236_v0  ;;  %v5348_v40 = vld [vmem:[#allocation2 + $0x68] ss:$0 sps:$4 sm:$0x11]   ;;  %v1148_v4 = vshrl.u32 %v4374_v50, 16  ;;  %2891 = vmatmul.mubr.bf16.gmra.mrb[28].mxu1 %v6426_v21  ;;  %v807_v14 = vmul.f32 %v6396_v3, %v4467_v58  ;;  %v808_v49 = vmul.f32 %v6396_v3, %v4470_v60 }
 0x127   : > { %695 = vst.msk [vmem:[#allocation2 + $0x84] sm:$0xf] %vm660_vm0, %v7236_v0  ;;  %641 = vst [vmem:[#allocation2 + $0x8c] sm:$0x1] %v640_v59  ;;  %v1837_v5 = vshrl.u32 %v6447_v48, 16  ;;  %v1839_v6 = vshll.u32 %v6447_v48, 16  ;;  %v844_v15 = vadd.f32 %v6412_v63, %v806_v62 }
 0x128   : > { %v1973_v7 = vrot.slane %v6447_v48, 1  ;;  %v1151_v8 = vshll.u32 %v4374_v50, 16  ;;  %697 = vst.msk [vmem:[#allocation2 + $0x8c] sm:$0x1] %vm663_vm7, %v7236_v0  ;;  %v1844_v45 = vshll.u32 %v5348_v40, 16  ;;  %v1974_v42 = vrot.slane %v5348_v40, 1 }
 0x129   : > { %v1142_v10 = vrot.slane %v1140_v39, 7  ;;  %v1150_v12 = vrot.slane %v1148_v4, 7  ;;  %v1841_v13 = vrot.slane %v1839_v6, 1  ;;  %v587_v17 = vsel %vm6059_vm5, 0, %v586_v55  ;;  %v5377_v19 = vld [vmem:[#allocation9 + $0x1a0] sm:$0xff]  }
 0x12a   : > { %v1846_v23 = vrot.slane %v1844_v45, 1  ;;  %v6472_v57 = vsel %vm1948_vm12, %v1973_v7, %v1974_v42  ;;  %588 = vst [vmem:[#allocation2 + $0x90] sm:$0x1] %v587_v17  ;;  %v845_v56 = vadd.f32 %v6412_v63, %v807_v14  ;;  %4944 = vmatpush3.bf16.msra.mxu1 %v5377_v19  ;;  %v876_v41 = vmax.f32 %v844_v15, 0.0  ;;  %v642_v40 = vld [vmem:[#allocation2 + $0x98] sm:$0x1] }
 0x12b   : > { %v1145_v46 = vor.u32 %v1143_v1, %v1142_v10  ;;  %v1146_v27 = vrot.slane %v1142_v10, 4  ;;  %v1842_v30 = vor.u32 %v1841_v13, %v1837_v5  ;;  %v6474_v31 = vld [vmem:[#allocation2 + $0x6c] sm:$0xff]   ;;  %v1153_v37 = vor.u32 %v1151_v8, %v1150_v12  ;;  %698 = vst.msk [vmem:[#allocation2 + $0x90] sm:$0xf] %vm660_vm0, %v7236_v0  ;;  %4945 = vmatprep.subr.bf16.mxu1 %v5378_v20  ;;  %v589_v4 = vld [vmem:[#allocation2 + $0x9c] sm:$0x1] }
 0x12c   : > { %v1155_v52 = vrot.slane %v1150_v12, 4  ;;  %v5352_v32 = vld [vmem:[#allocation2 + $0x74] ss:$0 sps:$4 sm:$0x11]   ;;  %v809_v50 = vmul.f32 %v6396_v3, %v4471_v2  ;;  %2898 = vmatprep.mubr.bf16.mxu1 %v6474_v31  ;;  %v1849_v55 = vshrl.u32 %v6474_v31, 16  ;;  %v1851_v58 = vshll.u32 %v6474_v31, 16 }
 0x12d   : > { %v1376_v33 = vsel %vm6098_vm10, %v1145_v46, %v1375_v9  ;;  %v1379_v35 = vld [vmem:[#allocation2 + $0x80] sm:$0x1]  ;;  %v6484_v53 = vsel %vm1739_vm13, %v1842_v30, %v1846_v23  ;;  %v1154_v59 = vsel %vm6152_vm14, %v1146_v27, %v1153_v37  ;;  %v1856_v60 = vshll.u32 %v5352_v32, 16  ;;  %v4580_v8 = vld [vmem:[%s6003_s23 + $0x60] sm:$0xff]   ;;  %v5382_v13 = vld [vmem:[#allocation9 + $0x1f0] sm:$0xff]  }
 0x12e   : > { %1377 = vst [vmem:[#allocation2 + $0x78] sm:$0xf] %v1376_v33  ;;  %2737 = vmatprep.mubr.bf16.mxu0 %v6484_v53  ;;  %1378 = vst.msk [vmem:[#allocation2 + $0x7c] sm:$0xf] %vm1307_vm1, %v1154_v59  ;;  %v1976_v2 = vrot.slane %v6474_v31, 1  ;;  %v1977_v39 = vrot.slane %v5352_v32, 1  ;;  %v1380_v1 = vsel %vm6109_vm11, %v1155_v52, %v1379_v35  ;;  %v4375_v6 = vpack.c.bf16 %v876_v41, %v876_v41 }
 0x12f   : > { %2738 = vmatmul.mubr.bf16.gmra.mrb[32].mxu0 %v6447_v48  ;;  %v1853_v62 = vrot.slane %v1851_v58, 1  ;;  %1381 = vst [vmem:[#allocation2 + $0x80] sm:$0x1] %v1380_v1  ;;  %v877_v5 = vmax.f32 %v845_v56, 0.0  ;;  %v846_v7 = vadd.f32 %v6412_v63, %v808_v49  ;;  %2899 = vmatmul.mubr.bf16.gmra.mrb[32].mxu1 %v6472_v57  ;;  %v1858_v9 = vrot.slane %v1856_v60, 1  ;;  %v5381_v12 = vld [vmem:[#allocation9 + $0x1a8] sm:$0xff]  }
 0x130   : > { %v6501_v45 = vsel %vm1948_vm12, %v1976_v2, %v1977_v39  ;;  %v847_v42 = vadd.f32 %v6412_v63, %v809_v50  ;;  %v643_v10 = vsel %vm6064_vm6, 0, %v642_v40  ;;  %v645_v48 = vld [vmem:[#allocation2 + $0xa4] sm:$0x1]  ;;  %v1157_v17 = vshrl.u32 %v4375_v6, 16  ;;  %4946 = vmatpush3.bf16.msra.mxu1 %v5381_v12  ;;  %v5383_v52 = vld [vmem:[#allocation9 + $0x1b0] sm:$0xff]   ;;  %v5384_v41 = vld [vmem:[#allocation9 + $0x1f8] sm:$0xff]  }
 0x131   : > { %v1854_v14 = vor.u32 %v1853_v62, %v1849_v55  ;;  %v4376_v15 = vpack.c.bf16 %v877_v5, %v877_v5  ;;  %v1160_v19 = vshll.u32 %v4375_v6, 16  ;;  %644 = vst [vmem:[#allocation2 + $0x98] sm:$0x1] %v643_v10  ;;  %v6507_v20 = vld [vmem:[%s6003_s23 + $0x68] sm:$0xff]   ;;  %v878_v46 = vmax.f32 %v846_v7, 0.0  ;;  %4947 = vmatprep.subr.bf16.mxu1 %v5382_v13 }
 0x132   : > { %v1382_v23 = vld [vmem:[#allocation2 + $0x84] sm:$0xf]  ;;  %v879_v27 = vmax.f32 %v847_v42, 0.0  ;;  %700 = vst.msk [vmem:[#allocation2 + $0x98] sm:$0x1] %vm663_vm7, %v7236_v0  ;;  %v590_v30 = vsel %vm6059_vm5, 0, %v589_v4  ;;  %v4474_v37 = vunpack.c.l.bf16 %v4580_v8  ;;  %v4475_v55 = vunpack.c.h.bf16 %v4580_v8 }
 0x133   : > { %v6514_v56 = vsel %vm1739_vm13, %v1854_v14, %v1858_v9  ;;  %v1159_v32 = vrot.slane %v1157_v17, 7  ;;  %v1165_v33 = vshrl.u32 %v4376_v15, 16  ;;  %v1168_v35 = vshll.u32 %v4376_v15, 16  ;;  %591 = vst [vmem:[#allocation2 + $0x9c] sm:$0x1] %v590_v30  ;;  %v5385_v30 = vld [vmem:[#allocation9 + $0x1b8] sm:$0xff]  }
 0x134   : > { %2745 = vmatprep.mubr.bf16.mxu0 %v6514_v56  ;;  %v4377_v49 = vpack.c.bf16 %v878_v46, %v878_v46  ;;  %v6517_v50 = vpack.c.bf16 %v879_v27, %v879_v27  ;;  %701 = vst.msk [vmem:[#allocation2 + $0x9c] sm:$0xf] %vm660_vm0, %v7236_v0  ;;  %v810_v58 = vmul.f32 %v6396_v3, %v4474_v37  ;;  %v1386_v39 = vld [vmem:[#allocation2 + $0x8c] sm:$0x1]  ;;  %v646_v1 = vsel %vm6064_vm6, 0, %v645_v48 }
 0x135   : > { %v6522_v59 = vld [vmem:[#allocation2 + $0x78] sm:$0xff]   ;;  %v1162_v40 = vor.u32 %v1160_v19, %v1159_v32  ;;  %v1163_v60 = vrot.slane %v1159_v32, 4  ;;  %v1167_v2 = vrot.slane %v1165_v33, 7  ;;  %v811_v5 = vmul.f32 %v6396_v3, %v4475_v55  ;;  %647 = vst [vmem:[#allocation2 + $0xa4] sm:$0x1] %v646_v1  ;;  %4948 = vmatpush3.bf16.msra.mxu1 %v5383_v52 }
 0x136   : > { %v5356_v4 = vld [vmem:[#allocation2 + $0x80] ss:$0 sps:$4 sm:$0x11]   ;;  %v1174_v62 = vshrl.u32 %v4377_v49, 16  ;;  %v848_v6 = vadd.f32 %v6412_v63, %v810_v58  ;;  %v4478_v7 = vunpack.c.l.bf16 %v6507_v20  ;;  %2906 = vmatprep.mubr.bf16.mxu1 %v6522_v59  ;;  %v1861_v8 = vshrl.u32 %v6522_v59, 16  ;;  %4949 = vmatprep.subr.bf16.mxu1 %v5384_v41 }
 0x137   : > { %2746 = vmatmul.mubr.bf16.gmra.mrb[36].mxu0 %v6474_v31  ;;  %v1863_v9 = vshll.u32 %v6522_v59, 16  ;;  %v1170_v42 = vor.u32 %v1168_v35, %v1167_v2  ;;  %v1383_v10 = vsel %vm6098_vm10, %v1162_v40, %v1382_v23  ;;  %703 = vst.msk [vmem:[#allocation2 + $0xa4] sm:$0x1] %vm663_vm7, %v7236_v0  ;;  %v592_v48 = vld [vmem:[#allocation2 + $0xa8] sm:$0x1]  ;;  %2907 = vmatmul.mubr.bf16.gmra.mrb[36].mxu1 %v6501_v45  ;;  %v1868_v12 = vshll.u32 %v5356_v4, 16 }
 0x138   : > { %1384 = vst [vmem:[#allocation2 + $0x84] sm:$0xf] %v1383_v10  ;;  %v1979_v13 = vrot.slane %v6522_v59, 1  ;;  %v1980_v14 = vrot.slane %v5356_v4, 1  ;;  %v1172_v15 = vrot.slane %v1167_v2, 4  ;;  %v1176_v46 = vrot.slane %v1174_v62, 7 }
 0x139   : > { %v1865_v17 = vrot.slane %v1863_v9, 1  ;;  %v1171_v19 = vsel %vm6152_vm14, %v1163_v60, %v1170_v42  ;;  %v1177_v27 = vshll.u32 %v4377_v49, 16  ;;  %v1389_v23 = vld [vmem:[#allocation2 + $0x90] sm:$0xf]  ;;  %v1870_v37 = vrot.slane %v1868_v12, 1  ;;  %4950 = vmatpush3.bf16.msra.mxu1 %v5385_v30  ;;  %v6549_v2 = vld [vmem:[#allocation9 + $0x200] sm:$0xff]  }
 0x13a   : > { %1385 = vst.msk [vmem:[#allocation2 + $0x88] sm:$0xf] %vm1307_vm1, %v1171_v19  ;;  %v6543_v52 = vsel %vm1948_vm12, %v1979_v13, %v1980_v14  ;;  %v1387_v32 = vsel %vm6109_vm11, %v1172_v15, %v1386_v39  ;;  %v1182_v33 = vshrl.u32 %v6517_v50, 16  ;;  %v648_v35 = vld [vmem:[#allocation2 + $0xb0] sm:$0x1]  ;;  %v1180_v40 = vrot.slane %v1176_v46, 4  ;;  %5095 = vmatprep.subr.bf16.mxu0 %v6549_v2 }
 0x13b   : > { %v595_v41 = vld [vmem:[#allocation2 + $0xb4] sm:$0x1]  ;;  %v1866_v55 = vor.u32 %v1865_v17, %v1861_v8  ;;  %1388 = vst [vmem:[#allocation2 + $0x8c] sm:$0x1] %v1387_v32  ;;  %v1179_v58 = vor.u32 %v1177_v27, %v1176_v46  ;;  %v1185_v49 = vshll.u32 %v6517_v50, 16  ;;  %v849_v4 = vadd.f32 %v6412_v63, %v811_v5  ;;  %v4582_v12 = vld [vmem:[%s6003_s23 + $0x70] sm:$0xff]  }
 0x13c   : > { %v1393_v60 = vld [vmem:[#allocation2 + $0x98] sm:$0x1]  ;;  %v1184_v1 = vrot.slane %v1182_v33, 7  ;;  %v880_v62 = vmax.f32 %v848_v6, 0.0  ;;  %v593_v39 = vsel %vm6059_vm5, 0, %v592_v48  ;;  %v4479_v50 = vunpack.c.h.bf16 %v6507_v20  ;;  %v6567_v13 = vld [vmem:[%s6003_s23 + $0x78] sm:$0xff]  }
 0x13d   : > { %v6555_v8 = vsel %vm1739_vm13, %v1866_v55, %v1870_v37  ;;  %v1390_v9 = vsel %vm6098_vm10, %v1179_v58, %v1389_v23  ;;  %594 = vst [vmem:[#allocation2 + $0xa8] sm:$0x1] %v593_v39  ;;  %v812_v42 = vmul.f32 %v6396_v3, %v4478_v7  ;;  %v881_v10 = vmax.f32 %v849_v4, 0.0  ;;  %v1396_v37 = vld [vmem:[#allocation2 + $0x9c] sm:$0xf] }
 0x13e   : > { %2753 = vmatprep.mubr.bf16.mxu0 %v6555_v8  ;;  %v1187_v5 = vor.u32 %v1185_v49, %v1184_v1  ;;  %1391 = vst [vmem:[#allocation2 + $0x90] sm:$0xf] %v1390_v9  ;;  %v1189_v6 = vrot.slane %v1184_v1, 4  ;;  %v4379_v48 = vpack.c.bf16 %v880_v62, %v880_v62  ;;  %704 = vst.msk [vmem:[#allocation2 + $0xa8] sm:$0xf] %vm660_vm0, %v7236_v0  ;;  %v649_v14 = vsel %vm6064_vm6, 0, %v648_v35 }
 0x13f   : > { %2754 = vmatmul.mubr.bf16.gmra.mrb[40].mxu0 %v6522_v59  ;;  %v813_v20 = vmul.f32 %v6396_v3, %v4479_v50  ;;  %v850_v7 = vadd.f32 %v6412_v63, %v812_v42  ;;  %v596_v15 = vsel %vm6059_vm5, 0, %v595_v41  ;;  %v4380_v46 = vpack.c.bf16 %v881_v10, %v881_v10  ;;  %650 = vst [vmem:[#allocation2 + $0xb0] sm:$0x1] %v649_v14  ;;  %v1400_v14 = vld [vmem:[#allocation2 + $0xa4] sm:$0x1] }
 0x140   : > { %v1188_v17 = vsel %vm6152_vm14, %v1180_v40, %v1187_v5  ;;  %v1394_v19 = vsel %vm6109_vm11, %v1189_v6, %v1393_v60  ;;  %v1191_v27 = vshrl.u32 %v4379_v48, 16  ;;  %597 = vst [vmem:[#allocation2 + $0xb4] sm:$0x1] %v596_v15  ;;  %v1194_v30 = vshll.u32 %v4379_v48, 16  ;;  %706 = vst.msk [vmem:[#allocation2 + $0xb0] sm:$0x1] %vm663_vm7, %v7236_v0 }
 0x141   : > { %v6580_v23 = vld [vmem:[#allocation2 + $0x84] sm:$0xff]   ;;  %1392 = vst.msk [vmem:[#allocation2 + $0x94] sm:$0xf] %vm1307_vm1, %v1188_v17  ;;  %1395 = vst [vmem:[#allocation2 + $0x98] sm:$0x1] %v1394_v19  ;;  %v851_v32 = vadd.f32 %v6412_v63, %v813_v20  ;;  %v882_v33 = vmax.f32 %v850_v7, 0.0  ;;  %v4482_v35 = vunpack.c.l.bf16 %v4582_v12  ;;  %v4483_v58 = vunpack.c.h.bf16 %v4582_v12 }
 0x142   : > { %707 = vst.msk [vmem:[#allocation2 + $0xb4] sm:$0xf] %vm660_vm0, %v7236_v0  ;;  %v5360_v41 = vld [vmem:[#allocation2 + $0x8c] ss:$0 sps:$4 sm:$0x11]   ;;  %v1193_v55 = vrot.slane %v1191_v27, 7  ;;  %v4486_v40 = vunpack.c.l.bf16 %v6567_v13  ;;  %2914 = vmatprep.mubr.bf16.mxu1 %v6580_v23 }
 0x143   : > { %v1873_v60 = vshrl.u32 %v6580_v23, 16  ;;  %v1875_v1 = vshll.u32 %v6580_v23, 16  ;;  %v1982_v4 = vrot.slane %v6580_v23, 1  ;;  %v1199_v62 = vshrl.u32 %v4380_v46, 16  ;;  %2915 = vmatmul.mubr.bf16.gmra.mrb[40].mxu1 %v6543_v52 }
 0x144   : > { %v1880_v39 = vshll.u32 %v5360_v41, 16  ;;  %v1983_v9 = vrot.slane %v5360_v41, 1  ;;  %v1196_v50 = vor.u32 %v1194_v30, %v1193_v55  ;;  %v1197_v42 = vrot.slane %v1193_v55, 4 }
 0x145   : > { %v1877_v5 = vrot.slane %v1875_v1, 1  ;;  %v1201_v6 = vrot.slane %v1199_v62, 7  ;;  %v1202_v10 = vshll.u32 %v4380_v46, 16  ;;  %v883_v48 = vmax.f32 %v851_v32, 0.0 }
 0x146   : > { %v1882_v12 = vrot.slane %v1880_v39, 1  ;;  %v6596_v20 = vsel %vm1948_vm12, %v1982_v4, %v1983_v9  ;;  %v1397_v7 = vsel %vm6098_vm10, %v1196_v50, %v1396_v37  ;;  %v4381_v15 = vpack.c.bf16 %v882_v33, %v882_v33  ;;  %v651_v39 = vld [vmem:[#allocation2 + $0xbc] sm:$0x1]  ;;  %v1403_v50 = vld [vmem:[#allocation2 + $0xa8] sm:$0xf] }
 0x147   : > { %v1878_v17 = vor.u32 %v1877_v5, %v1873_v60  ;;  %v1204_v19 = vor.u32 %v1202_v10, %v1201_v6  ;;  %1398 = vst [vmem:[#allocation2 + $0x9c] sm:$0xf] %v1397_v7  ;;  %v1206_v27 = vrot.slane %v1201_v6, 4  ;;  %v4382_v41 = vpack.c.bf16 %v883_v48, %v883_v48 }
 0x148   : > { %v6600_v30 = vld [vmem:[#allocation2 + $0x90] sm:$0xff]   ;;  %v1208_v55 = vshrl.u32 %v4381_v15, 16  ;;  %v814_v46 = vmul.f32 %v6396_v3, %v4482_v35  ;;  %v815_v32 = vmul.f32 %v6396_v3, %v4483_v58  ;;  %v816_v1 = vmul.f32 %v6396_v3, %v4486_v40  ;;  %v5364_v37 = vld [vmem:[#allocation2 + $0x98] ss:$0 sps:$4 sm:$0x11]  }
 0x149   : > { %v6606_v4 = vsel %vm1739_vm13, %v1878_v17, %v1882_v12  ;;  %v1205_v33 = vsel %vm6152_vm14, %v1197_v42, %v1204_v19  ;;  %v1401_v60 = vsel %vm6109_vm11, %v1206_v27, %v1400_v14  ;;  %v1211_v62 = vshll.u32 %v4381_v15, 16  ;;  %2922 = vmatprep.mubr.bf16.mxu1 %v6600_v30  ;;  %v598_v42 = vld [vmem:[#allocation2 + $0xc0] sm:$0x1]  ;;  %v1407_v15 = vld [vmem:[#allocation2 + $0xb0] sm:$0x1] }
 0x14a   : > { %2761 = vmatprep.mubr.bf16.mxu0 %v6606_v4  ;;  %v1885_v35 = vshrl.u32 %v6600_v30, 16  ;;  %v1887_v58 = vshll.u32 %v6600_v30, 16  ;;  %1399 = vst.msk [vmem:[#allocation2 + $0xa0] sm:$0xf] %vm1307_vm1, %v1205_v33  ;;  %v1985_v40 = vrot.slane %v6600_v30, 1  ;;  %v1210_v9 = vrot.slane %v1208_v55, 7 }
 0x14b   : > { %1402 = vst [vmem:[#allocation2 + $0xa4] sm:$0x1] %v1401_v60  ;;  %2762 = vmatmul.mubr.bf16.gmra.mrb[44].mxu0 %v6580_v23  ;;  %v1892_v5 = vshll.u32 %v5364_v37, 16  ;;  %v1986_v6 = vrot.slane %v5364_v37, 1  ;;  %v1216_v10 = vshrl.u32 %v4382_v41, 16  ;;  %v1219_v48 = vshll.u32 %v4382_v41, 16  ;;  %2923 = vmatmul.mubr.bf16.gmra.mrb[44].mxu1 %v6596_v20 }
 0x14c   : > { %v1889_v12 = vrot.slane %v1887_v58, 1  ;;  %v1213_v7 = vor.u32 %v1211_v62, %v1210_v9  ;;  %v1214_v14 = vrot.slane %v1210_v9, 4  ;;  %v852_v17 = vadd.f32 %v6412_v63, %v814_v46  ;;  %v654_v19 = vld [vmem:[#allocation2 + $0xc8] sm:$0x1] }
 0x14d   : > { %v1894_v27 = vrot.slane %v1892_v5, 1  ;;  %v6622_v55 = vsel %vm1948_vm12, %v1985_v40, %v1986_v6  ;;  %v1218_v33 = vrot.slane %v1216_v10, 7  ;;  %v853_v60 = vadd.f32 %v6412_v63, %v815_v32 }
 0x14e   : > { %7288 = vst [vmem:[#allocation26_spill] sm:$0xff] %v6622_v55  ;;  %v1890_v49 = vor.u32 %v1889_v12, %v1885_v35  ;;  %v1404_v41 = vsel %vm6098_vm10, %v1213_v7, %v1403_v50  ;;  %v884_v37 = vmax.f32 %v852_v17, 0.0  ;;  %v652_v62 = vsel %vm6064_vm6, 0, %v651_v39 }
 0x14f   : > { %v1221_v58 = vor.u32 %v1219_v48, %v1218_v33  ;;  %1405 = vst [vmem:[#allocation2 + $0xa8] sm:$0xf] %v1404_v41  ;;  %v1223_v9 = vrot.slane %v1218_v33, 4  ;;  %v885_v46 = vmax.f32 %v853_v60, 0.0  ;;  %653 = vst [vmem:[#allocation2 + $0xbc] sm:$0x1] %v652_v62  ;;  %v7289_v35 = vunpack.c.h.bf16 %v6567_v13 }
 0x150   : > { %v599_v40 = vsel %vm6059_vm5, 0, %v598_v42  ;;  %v6632_v5 = vsel %vm1739_vm13, %v1890_v49, %v1894_v27  ;;  %v4383_v32 = vpack.c.bf16 %v884_v37, %v884_v37  ;;  %709 = vst.msk [vmem:[#allocation2 + $0xbc] sm:$0x1] %vm663_vm7, %v7236_v0  ;;  %v854_v50 = vadd.f32 %v6412_v63, %v816_v1  ;;  %v1410_v27 = vld [vmem:[#allocation2 + $0xb4] sm:$0xf] }
 0x151   : > { %600 = vst [vmem:[#allocation2 + $0xc0] sm:$0x1] %v599_v40  ;;  %v817_v39 = vmul.f32 %v6396_v3, %v7289_v35  ;;  %2769 = vmatprep.mubr.bf16.mxu0 %v6632_v5  ;;  %v6641_v6 = vld [vmem:[#allocation2 + $0x9c] sm:$0xff]   ;;  %v1222_v42 = vsel %vm6152_vm14, %v1214_v14, %v1221_v58  ;;  %v1408_v49 = vsel %vm6109_vm11, %v1223_v9, %v1407_v15  ;;  %v655_v13 = vsel %vm6064_vm6, 0, %v654_v19  ;;  %v601_v37 = vld [vmem:[#allocation2 + $0xcc] sm:$0x1] }
 0x152   : > { %v4384_v10 = vpack.c.bf16 %v885_v46, %v885_v46  ;;  %710 = vst.msk [vmem:[#allocation2 + $0xc0] sm:$0xf] %vm660_vm0, %v7236_v0  ;;  %v5368_v3 = vld [vmem:[#allocation2 + $0xa4] ss:$0 sps:$4 sm:$0x11]   ;;  %v1225_v1 = vshrl.u32 %v4383_v32, 16  ;;  %2930 = vmatprep.mubr.bf16.mxu1 %v6641_v6 }
 0x153   : > { %1406 = vst.msk [vmem:[#allocation2 + $0xac] sm:$0xf] %vm1307_vm1, %v1222_v42  ;;  %1409 = vst [vmem:[#allocation2 + $0xb0] sm:$0x1] %v1408_v49  ;;  %v1228_v48 = vshll.u32 %v4383_v32, 16  ;;  %v855_v12 = vadd.f32 %v6412_v63, %v817_v39  ;;  %v886_v7 = vmax.f32 %v854_v50, 0.0  ;;  %2770 = vmatmul.mubr.bf16.gmra.mrb[48].mxu0 %v6600_v30  ;;  %2931 = vmatmul.mubr.bf16.gmra.mrb[48].mxu1 %v6622_v55 }
 0x154   : > { %656 = vst [vmem:[#allocation2 + $0xc8] sm:$0x1] %v655_v13  ;;  %v1897_v14 = vshrl.u32 %v6641_v6, 16  ;;  %v1899_v15 = vshll.u32 %v6641_v6, 16  ;;  %v1988_v17 = vrot.slane %v6641_v6, 1  ;;  %v1233_v19 = vshrl.u32 %v4384_v10, 16 }
 0x155   : > { %712 = vst.msk [vmem:[#allocation2 + $0xc8] sm:$0x1] %vm663_vm7, %v7236_v0  ;;  %v1904_v63 = vshll.u32 %v5368_v3, 16  ;;  %v1989_v33 = vrot.slane %v5368_v3, 1  ;;  %v1227_v60 = vrot.slane %v1225_v1, 7  ;;  %v1236_v41 = vshll.u32 %v4384_v10, 16 }
 0x156   : > { %v1901_v62 = vrot.slane %v1899_v15, 1  ;;  %v1235_v58 = vrot.slane %v1233_v19, 7  ;;  %v887_v9 = vmax.f32 %v855_v12, 0.0  ;;  %v4385_v46 = vpack.c.bf16 %v886_v7, %v886_v7  ;;  %v657_v40 = vld [vmem:[#allocation2 + $0xd4] sm:$0x1] }
 0x157   : > { %v1906_v32 = vrot.slane %v1904_v63, 1  ;;  %v6662_v35 = vsel %vm1948_vm12, %v1988_v17, %v1989_v33  ;;  %v1230_v39 = vor.u32 %v1228_v48, %v1227_v60  ;;  %v1231_v50 = vrot.slane %v1227_v60, 4  ;;  %v1414_v0 = vld [vmem:[#allocation2 + $0xbc] sm:$0x1] }
 0x158   : > { %v1902_v42 = vor.u32 %v1901_v62, %v1897_v14  ;;  %v1238_v49 = vor.u32 %v1236_v41, %v1235_v58  ;;  %v1240_v13 = vrot.slane %v1235_v58, 4  ;;  %v4386_v55 = vpack.c.bf16 %v887_v9, %v887_v9 }
 0x159   : > { %v1411_v10 = vsel %vm6098_vm10, %v1230_v39, %v1410_v27  ;;  %v1242_v3 = vshrl.u32 %v4385_v46, 16  ;;  %v1245_v1 = vshll.u32 %v4385_v46, 16  ;;  %v602_v12 = vsel %vm6059_vm5, 0, %v601_v37  ;;  %v1417_v19 = vld [vmem:[#allocation2 + $0xc0] sm:$0xf] }
 0x15a   : > { %v6669_v7 = vsel %vm1739_vm13, %v1902_v42, %v1906_v32  ;;  %v6671_v15 = vld [vmem:[#allocation2 + $0xa8] sm:$0xff]   ;;  %v1239_v48 = vsel %vm6152_vm14, %v1231_v50, %v1238_v49  ;;  %1412 = vst [vmem:[#allocation2 + $0xb4] sm:$0xf] %v1411_v10  ;;  %v1415_v14 = vsel %vm6109_vm11, %v1240_v13, %v1414_v0  ;;  %v1250_v17 = vshrl.u32 %v4386_v55, 16  ;;  %603 = vst [vmem:[#allocation2 + $0xcc] sm:$0x1] %v602_v12 }
 0x15b   : > { %2777 = vmatprep.mubr.bf16.mxu0 %v6669_v7  ;;  %v5372_v27 = vld [vmem:[#allocation2 + $0xb0] ss:$0 sps:$4 sm:$0x11]   ;;  %1413 = vst.msk [vmem:[#allocation2 + $0xb8] sm:$0xf] %vm1307_vm1, %v1239_v48  ;;  %v1244_v24 = vrot.slane %v1242_v3, 7  ;;  %2938 = vmatprep.mubr.bf16.mxu1 %v6671_v15 }
 0x15c   : > { %1416 = vst [vmem:[#allocation2 + $0xbc] sm:$0x1] %v1415_v14  ;;  %v1253_v63 = vshll.u32 %v4386_v55, 16  ;;  %v658_v33 = vsel %vm6064_vm6, 0, %v657_v40  ;;  %v7290_v60 = vmov 0   ;;  %2778 = vmatmul.mubr.bf16.gmra.mrb[52].mxu0 %v6641_v6  ;;  %v1909_v0 = vshrl.u32 %v6671_v15, 16  ;;  %2939 = vmatmul.mubr.bf16.gmra.mrb[52].mxu1 %v6662_v35 }
 0x15d   : > { %713 = vst.msk [vmem:[#allocation2 + $0xcc] sm:$0xf] %vm660_vm0, %v7290_v60  ;;  %v1911_v41 = vshll.u32 %v6671_v15, 16  ;;  %v1991_v37 = vrot.slane %v6671_v15, 1  ;;  %v1252_v62 = vrot.slane %v1250_v17, 7  ;;  %v1916_v25 = vshll.u32 %v5372_v27, 16 }
 0x15e   : > { %v1421_v58 = vld [vmem:[#allocation2 + $0xc8] sm:$0x1]  ;;  %659 = vst [vmem:[#allocation2 + $0xd4] sm:$0x1] %v658_v33  ;;  %v1992_v55 = vrot.slane %v5372_v27, 1  ;;  %v1247_v9 = vor.u32 %v1245_v1, %v1244_v24  ;;  %v1248_v46 = vrot.slane %v1244_v24, 4 }
 0x15f   : > { %715 = vst.msk [vmem:[#allocation2 + $0xd4] sm:$0x1] %vm663_vm7, %v7290_v60  ;;  %v1913_v40 = vrot.slane %v1911_v41, 1  ;;  %v1255_v32 = vor.u32 %v1253_v63, %v1252_v62  ;;  %v1257_v39 = vrot.slane %v1252_v62, 4  ;;  %v1918_v50 = vrot.slane %v1916_v25, 1  ;;  %v5407_v25 = vld [vmem:[#allocation2 + $0x18] sm:$0xff]  }
 0x160   : > { %v1418_v42 = vsel %vm6098_vm10, %v1247_v9, %v1417_v19  ;;  %v6704_v12 = vsel %vm1948_vm12, %v1991_v37, %v1992_v55  ;;  %v5388_v55 = vld [vmem:[#allocation9 + $0x210] sm:$0xff]   ;;  %v5389_v9 = vld [vmem:[#allocation9 + $0x218] sm:$0xff]  }
 0x161   : > { %v1914_v49 = vor.u32 %v1913_v40, %v1909_v0  ;;  %v1256_v13 = vsel %vm6152_vm14, %v1248_v46, %v1255_v32  ;;  %1419 = vst [vmem:[#allocation2 + $0xc0] sm:$0xf] %v1418_v42  ;;  %v1422_v10 = vsel %vm6109_vm11, %v1257_v39, %v1421_v58  ;;  %v5409_v46 = vld [vmem:[#allocation2 + $0x30] sm:$0xff]   ;;  %v5410_v32 = vld [vmem:[#allocation2 + $0x3c] sm:$0xff]  }
 0x162   : > { %1420 = vst.msk [vmem:[#allocation2 + $0xc4] sm:$0xf] %vm1307_vm1, %v1256_v13  ;;  %1423 = vst [vmem:[#allocation2 + $0xc8] sm:$0x1] %v1422_v10  ;;  %v6701_v1 = vld [vmem:[#allocation2 + $0xb4] sm:$0xff]   ;;  %v5413_v39 = vld [vmem:[#allocation2 + $0x60] sm:$0xff]  }
 0x163   : > { %v6699_v3 = vsel %vm1739_vm13, %v1914_v49, %v1918_v50  ;;  %v5379_v48 = vld [vmem:[#allocation2 + $0xbc] ss:$0 sps:$4 sm:$0x11]   ;;  %2946 = vmatprep.mubr.bf16.mxu1 %v6701_v1  ;;  %v1921_v14 = vshrl.u32 %v6701_v1, 16  ;;  %v1923_v17 = vshll.u32 %v6701_v1, 16  ;;  %v1994_v33 = vrot.slane %v6701_v1, 1 }
 0x164   : > { %2785 = vmatprep.mubr.bf16.mxu0 %v6699_v3  ;;  %v1534_v43 = vld [vmem:[#allocation2 + $0xcc] sm:$0xf]  ;;  %2947 = vmatmul.mubr.bf16.gmra.mrb[56].mxu1 %v6704_v12  ;;  %v1928_v27 = vshll.u32 %v5379_v48, 16  ;;  %v1995_v60 = vrot.slane %v5379_v48, 1  ;;  %v5393_v40 = vld [vmem:[#allocation9 + $0x238] sm:$0xff]  }
 0x165   : > { %2786 = vmatmul.mubr.bf16.gmra.mrb[56].mxu0 %v6671_v15  ;;  %v1535_v19 = vsel %vm6098_vm10, 0, %v1534_v43  ;;  %v1925_v63 = vrot.slane %v1923_v17, 1 }
 0x166   : > { %1536 = vst [vmem:[#allocation2 + $0xcc] sm:$0xf] %v1535_v19  ;;  %v1538_v24 = vld [vmem:[#allocation2 + $0xd4] sm:$0x1]  ;;  %v1930_v41 = vrot.slane %v1928_v27, 1  ;;  %v6724_v58 = vsel %vm1948_vm12, %v1994_v33, %v1995_v60 }
 0x167   : > { %v1539_v0 = vsel %vm6109_vm11, 0, %v1538_v24  ;;  %v1926_v37 = vor.u32 %v1925_v63, %v1921_v14 }
 0x168   : > { %1540 = vst [vmem:[#allocation2 + $0xd4] sm:$0x1] %v1539_v0 }
 0x169   : > { %v6717_v62 = vld [vmem:[#allocation2 + $0xc0] sm:$0xff]   ;;  %v6720_v54 = vsel %vm1739_vm13, %v1926_v37, %v1930_v41  ;;  %v6779_v37 = vld [vmem:[#allocation2 + $0xc8] ss:$0 sps:$4 sm:$0x11]  }
 0x16a   : > { %2954 = vmatprep.mubr.bf16.mxu1 %v6717_v62  ;;  %2793 = vmatprep.mubr.bf16.mxu0 %v6720_v54 }
 0x16c   : > { %2955 = vmatmul.mubr.bf16.gmra.mrb[60].mxu1 %v6724_v58 }
 0x16d   : > { %2794 = vmatmul.mubr.bf16.gmra.mrb[60].mxu0 %v6701_v1  ;;  %3156 = vmatprep.mubr.bf16.mxu1 %v6233_v51 }
 0x16e   : > { %2995 = vmatprep.mubr.bf16.mxu0 %v6216_v18  ;;  %v5408_v18 = vld [vmem:[#allocation2 + $0x24] sm:$0xff]  }
 0x174   : > { %3157 = vmatmul.mubr.bf16.vlgmr.msra.gmra.mrb[64].mxu1 %v5407_v25 }
 0x175   : > { %2996 = vmatmul.mubr.bf16.vlgmr.msra.gmra.mrb[64].mxu0 %v6220_v29  ;;  %3164 = vmatprep.mubr.bf16.mxu1 %v6271_v34  ;;  %v5390_v29 = vld [vmem:[#allocation9 + $0x220] sm:$0xff]  }
 0x176   : > { %5096 = vmatpush3.bf16.msra.mxu0 %v6549_v2  ;;  %3003 = vmatprep.mubr.bf16.mxu0 %v6224_v38  ;;  %v5391_v2 = vld [vmem:[#allocation9 + $0x228] sm:$0xff]  }
 0x177   : > { %5097 = vmatprep.subr.bf16.mxu0 %v5387_v61 }
 0x17a   : > { %5098 = vmatpush3.bf16.msra.mxu0 %v5387_v61  ;;  %v2025_v61 = vshll.u32 %v6717_v62, 16 }
 0x17b   : > { %5099 = vmatprep.subr.bf16.mxu0 %v5388_v55 }
 0x17c   : > { %3165 = vmatmul.mubr.bf16.gmra.mrb[68].mxu1 %v5408_v18 }
 0x17d   : > { %3004 = vmatmul.mubr.bf16.gmra.mrb[68].mxu0 %v6233_v51  ;;  %3172 = vmatprep.mubr.bf16.mxu1 %v6315_v44  ;;  %v5392_v51 = vld [vmem:[#allocation9 + $0x230] sm:$0xff]  }
 0x17e   : > { %3011 = vmatprep.mubr.bf16.mxu0 %v6255_v16  ;;  %5100 = vmatpush3.bf16.msra.mxu0 %v5388_v55 }
 0x17f   : > { %5101 = vmatprep.subr.bf16.mxu0 %v5389_v9 }
 0x182   : > { %5102 = vmatpush3.bf16.msra.mxu0 %v5389_v9 }
 0x183   : > { %5103 = vmatprep.subr.bf16.mxu0 %v5390_v29 }
 0x184   : > { %3173 = vmatmul.mubr.bf16.gmra.mrb[72].mxu1 %v5409_v46  ;;  %v2027_v46 = vrot.slane %v2025_v61, 1  ;;  %v2035_v61 = vrot.slane %v6717_v62, 1 }
 0x185   : > { %3012 = vmatmul.mubr.bf16.gmra.mrb[72].mxu0 %v6271_v34  ;;  %3180 = vmatprep.mubr.bf16.mxu1 %v6354_v36  ;;  %v5411_v34 = vld [vmem:[#allocation2 + $0x48] sm:$0xff]  }
 0x186   : > { %3019 = vmatprep.mubr.bf16.mxu0 %v6306_v26  ;;  %5104 = vmatpush3.bf16.msra.mxu0 %v5390_v29 }
 0x187   : > { %5105 = vmatprep.subr.bf16.mxu0 %v5391_v2 }
 0x18a   : > { %5106 = vmatpush3.bf16.msra.mxu0 %v5391_v2  ;;  %v2023_v2 = vshrl.u32 %v6717_v62, 16 }
 0x18b   : > { %5107 = vmatprep.subr.bf16.mxu0 %v5392_v51 }
 0x18c   : > { %3181 = vmatmul.mubr.bf16.gmra.mrb[76].mxu1 %v5410_v32 }
 0x18d   : > { %3020 = vmatmul.mubr.bf16.gmra.mrb[76].mxu0 %v6315_v44  ;;  %3188 = vmatprep.mubr.bf16.mxu1 %v6388_v28  ;;  %v5412_v44 = vld [vmem:[#allocation2 + $0x54] sm:$0xff]  }
 0x18e   : > { %3027 = vmatprep.mubr.bf16.mxu0 %v6343_v22  ;;  %5108 = vmatpush3.bf16.msra.mxu0 %v5392_v51  ;;  %v2030_v51 = vshll.u32 %v6779_v37, 16 }
 0x18f   : > { %5109 = vmatprep.subr.bf16.mxu0 %v5393_v40 }
 0x192   : > { %5110 = vmatpush3.bf16.msra.mxu0 %v5393_v40  ;;  %v6786_v40 = vld [vmem:[#allocation2 + $0xcc] sm:$0xff]  }
 0x194   : > { %3189 = vmatmul.mubr.bf16.gmra.mrb[80].mxu1 %v5411_v34 }
 0x195   : > { %3028 = vmatmul.mubr.bf16.gmra.mrb[80].mxu0 %v6354_v36  ;;  %3196 = vmatprep.mubr.bf16.mxu1 %v6442_v47 }
 0x196   : > { %3035 = vmatprep.mubr.bf16.mxu0 %v6383_v11 }
 0x19c   : > { %3197 = vmatmul.mubr.bf16.gmra.mrb[84].mxu1 %v5412_v44 }
 0x19d   : > { %3036 = vmatmul.mubr.bf16.gmra.mrb[84].mxu0 %v6388_v28  ;;  %3204 = vmatprep.mubr.bf16.mxu1 %v6484_v53 }
 0x19e   : > { %3043 = vmatprep.mubr.bf16.mxu0 %v6426_v21 }
 0x1a4   : > { %3205 = vmatmul.mubr.bf16.gmra.mrb[88].mxu1 %v5413_v39 }
 0x1a5   : > { %3044 = vmatmul.mubr.bf16.gmra.mrb[88].mxu0 %v6442_v47  ;;  %3212 = vmatprep.mubr.bf16.mxu1 %v6514_v56 }
 0x1a6   : > { %3051 = vmatprep.mubr.bf16.mxu0 %v6472_v57 }
 0x1ac   : > { %3213 = vmatmul.mubr.bf16.gmra.mrb[92].mxu1 %v6474_v31 }
 0x1ad   : > { %3052 = vmatmul.mubr.bf16.gmra.mrb[92].mxu0 %v6484_v53  ;;  %3220 = vmatprep.mubr.bf16.mxu1 %v6555_v8 }
 0x1ae   : > { %3059 = vmatprep.mubr.bf16.mxu0 %v6501_v45 }
 0x1b4   : > { %3221 = vmatmul.mubr.bf16.gmra.mrb[96].mxu1 %v6522_v59 }
 0x1b5   : > { %3060 = vmatmul.mubr.bf16.gmra.mrb[96].mxu0 %v6514_v56  ;;  %3228 = vmatprep.mubr.bf16.mxu1 %v6606_v4 }
 0x1b6   : > { %3067 = vmatprep.mubr.bf16.mxu0 %v6543_v52 }
 0x1bc   : > { %3229 = vmatmul.mubr.bf16.gmra.mrb[100].mxu1 %v6580_v23  ;;  %v7291_v23 = vld [vmem:[#allocation26_spill] sm:$0xff] }
 0x1bd   : > { %3068 = vmatmul.mubr.bf16.gmra.mrb[100].mxu0 %v6555_v8  ;;  %3236 = vmatprep.mubr.bf16.mxu1 %v6632_v5 }
 0x1be   : > { %3075 = vmatprep.mubr.bf16.mxu0 %v6596_v20 }
 0x1bf   : > { %v4615_v36 = vpop.f32.mrb[0].mxu0  ;;  %v4727_v28 = vpop.f32.mrb[0].mxu1 }
 0x1c0   : > { %v4616_v47 = vpop.f32.mrb[1].mxu0  ;;  %v4728_v53 = vpop.f32.mrb[1].mxu1 }
 0x1c1   : > { %v4617_v31 = vadd.f32 %v4616_v47, %v4615_v36  ;;  %v4618_v56 = vpop.f32.mrb[2].mxu0  ;;  %v4729_v59 = vadd.f32 %v4728_v53, %v4727_v28  ;;  %v4730_v50 = vpop.f32.mrb[2].mxu1  ;;  %v5397_v28 = vld [vmem:[#allocation11] sm:$0xff]   ;;  %v2028_v53 = vor.u32 %v2027_v46, %v2023_v2 }
 0x1c2   : > { %v4619_v42 = vpop.f32.mrb[3].mxu0  ;;  %v4731_v49 = vpop.f32.mrb[3].mxu1  ;;  %5143 = vmatprep.subr.bf16.mxu1 %v5397_v28 }
 0x1c3   : > { %v4620_v8 = vadd.f32 %v4619_v42, %v4618_v56  ;;  %v6768_v13 = vadd.f32 %v4729_v59, %v4617_v31  ;;  %v4732_v10 = vadd.f32 %v4731_v49, %v4730_v50  ;;  %v2032_v56 = vrot.slane %v2030_v51, 1  ;;  %v6794_v59 = vld [vmem:[#allocation2 + $0xd4] ss:$0 sps:$4 sm:$0x11]   ;;  %5144 = vmatpush3.bf16.msra.mxu1 %v5397_v28  ;;  %v5398_v28 = vld [vmem:[#allocation11 + $0x8] sm:$0xff]  }
 0x1c4   : > { %3237 = vmatmul.mubr.bf16.gmra.mrb[104].mxu1 %v6600_v30  ;;  %v2049_v49 = vshrl.u32 %v6786_v40, 16  ;;  %5145 = vmatprep.subr.bf16.mxu1 %v5398_v28 }
 0x1c5   : > { %3076 = vmatmul.mubr.bf16.gmra.mrb[104].mxu0 %v6606_v4  ;;  %3244 = vmatprep.mubr.bf16.mxu1 %v6669_v7  ;;  %v6771_v48 = vadd.f32 %v4732_v10, %v4620_v8 }
 0x1c6   : > { %3083 = vmatprep.mubr.bf16.mxu0 %v7291_v23 }
 0x1c7   : > { %v4621_v43 = vpop.f32.mrb[4].mxu0  ;;  %v4733_v14 = vpop.f32.mrb[4].mxu1  ;;  %5146 = vmatpush3.bf16.msra.mxu1 %v5398_v28 }
 0x1c8   : > { %v4622_v17 = vpop.f32.mrb[5].mxu0  ;;  %v4734_v19 = vpop.f32.mrb[5].mxu1 }
 0x1c9   : > { %v4623_v4 = vadd.f32 %v4622_v17, %v4621_v43  ;;  %v4624_v27 = vpop.f32.mrb[6].mxu0  ;;  %v4735_v30 = vadd.f32 %v4734_v19, %v4733_v14  ;;  %v4736_v24 = vpop.f32.mrb[6].mxu1  ;;  %v2033_v17 = vsel %vm1739_vm13, %v2028_v53, %v2032_v56  ;;  %v2056_v19 = vshll.u32 %v6794_v59, 16 }
 0x1ca   : > { %v4625_v63 = vpop.f32.mrb[7].mxu0  ;;  %v4737_v60 = vpop.f32.mrb[7].mxu1 }
 0x1cb   : > { %v4626_v33 = vadd.f32 %v4625_v63, %v4624_v27  ;;  %v6776_v0 = vadd.f32 %v4735_v30, %v4623_v4  ;;  %v4738_v41 = vadd.f32 %v4737_v60, %v4736_v24 }
 0x1cc   : > { %3245 = vmatmul.mubr.bf16.gmra.mrb[108].mxu1 %v6641_v6 }
 0x1cd   : > { %3084 = vmatmul.mubr.bf16.gmra.mrb[108].mxu0 %v6632_v5  ;;  %3252 = vmatprep.mubr.bf16.mxu1 %v6699_v3  ;;  %v6782_v25 = vadd.f32 %v4738_v41, %v4626_v33 }
 0x1ce   : > { %3091 = vmatprep.mubr.bf16.mxu0 %v6662_v35 }
 0x1cf   : > { %v4627_v5 = vpop.f32.mrb[8].mxu0  ;;  %v4739_v55 = vpop.f32.mrb[8].mxu1 }
 0x1d0   : > { %v4628_v9 = vpop.f32.mrb[9].mxu0  ;;  %v4740_v6 = vpop.f32.mrb[9].mxu1 }
 0x1d1   : > { %v4629_v18 = vadd.f32 %v4628_v9, %v4627_v5  ;;  %v4630_v29 = vpop.f32.mrb[10].mxu0  ;;  %v4741_v32 = vadd.f32 %v4740_v6, %v4739_v55  ;;  %v4742_v34 = vpop.f32.mrb[10].mxu1  ;;  %v2036_v5 = vrot.slane %v6779_v37, 1  ;;  %v2058_v9 = vrot.slane %v2056_v19, 1 }
 0x1d2   : > { %v4631_v44 = vpop.f32.mrb[11].mxu0  ;;  %v4743_v36 = vpop.f32.mrb[11].mxu1 }
 0x1d3   : > { %v4632_v39 = vadd.f32 %v4631_v44, %v4630_v29  ;;  %v6791_v47 = vadd.f32 %v4741_v32, %v4629_v18  ;;  %v4744_v31 = vadd.f32 %v4743_v36, %v4742_v34 }
 0x1d4   : > { %3253 = vmatmul.mubr.bf16.gmra.mrb[112].mxu1 %v6671_v15 }
 0x1d5   : > { %3092 = vmatmul.mubr.bf16.gmra.mrb[112].mxu0 %v6669_v7  ;;  %3260 = vmatprep.mubr.bf16.mxu1 %v6720_v54  ;;  %v2051_v7 = vshll.u32 %v6786_v40, 16  ;;  %v6797_v50 = vadd.f32 %v4744_v31, %v4632_v39 }
 0x1d6   : > { %3099 = vmatprep.mubr.bf16.mxu0 %v6704_v12 }
 0x1d7   : > { %v4633_v15 = vpop.f32.mrb[12].mxu0  ;;  %v4745_v42 = vpop.f32.mrb[12].mxu1  ;;  %v2053_v4 = vrot.slane %v2051_v7, 1 }
 0x1d8   : > { %v4634_v8 = vpop.f32.mrb[13].mxu0  ;;  %v4746_v43 = vpop.f32.mrb[13].mxu1 }
 0x1d9   : > { %v4635_v10 = vadd.f32 %v4634_v8, %v4633_v15  ;;  %v4636_v14 = vpop.f32.mrb[14].mxu0  ;;  %v4747_v27 = vadd.f32 %v4746_v43, %v4745_v42  ;;  %v4748_v30 = vpop.f32.mrb[14].mxu1  ;;  %v2054_v55 = vor.u32 %v2053_v4, %v2049_v49 }
 0x1da   : > { %v4637_v24 = vpop.f32.mrb[15].mxu0  ;;  %v4749_v33 = vpop.f32.mrb[15].mxu1 }
 0x1db   : > { %v4638_v63 = vadd.f32 %v4637_v24, %v4636_v14  ;;  %v6805_v60 = vadd.f32 %v4747_v27, %v4635_v10  ;;  %v4750_v41 = vadd.f32 %v4749_v33, %v4748_v30  ;;  %v2059_v32 = vsel %vm1739_vm13, %v2054_v55, %v2058_v9 }
 0x1dc   : > { %3261 = vmatmul.mubr.bf16.gmra.mrb[116].mxu1 %v6701_v1  ;;  %v6812_v1 = vsel %vm1948_vm12, %v2035_v61, %v2036_v5 }
 0x1dd   : > { %3100 = vmatmul.mubr.bf16.gmra.mrb[116].mxu0 %v6699_v3  ;;  %3268 = vmatprep.mubr.bf16.mxu1 %v2033_v17  ;;  %v6809_v3 = vadd.f32 %v4750_v41, %v4638_v63 }
 0x1de   : > { %3107 = vmatprep.mubr.bf16.mxu0 %v6724_v58 }
 0x1df   : > { %v4639_v18 = vpop.f32.mrb[16].mxu0  ;;  %v4751_v6 = vpop.f32.mrb[16].mxu1 }
 0x1e0   : > { %v4640_v29 = vpop.f32.mrb[17].mxu0  ;;  %v4752_v46 = vpop.f32.mrb[17].mxu1 }
 0x1e1   : > { %v4641_v2 = vadd.f32 %v4640_v29, %v4639_v18  ;;  %v4642_v51 = vpop.f32.mrb[18].mxu0  ;;  %v4753_v34 = vadd.f32 %v4752_v46, %v4751_v6  ;;  %v4754_v44 = vpop.f32.mrb[18].mxu1 }
 0x1e2   : > { %v4643_v37 = vpop.f32.mrb[19].mxu0  ;;  %v4755_v36 = vpop.f32.mrb[19].mxu1 }
 0x1e3   : > { %v4644_v39 = vadd.f32 %v4643_v37, %v4642_v51  ;;  %v6818_v31 = vadd.f32 %v4753_v34, %v4641_v2  ;;  %v4756_v53 = vadd.f32 %v4755_v36, %v4754_v44 }
 0x1e4   : > { %3269 = vmatmul.mubr.bf16.gmra.mrb[120].mxu1 %v6717_v62 }
 0x1e5   : > { %3108 = vmatmul.mubr.bf16.gmra.mrb[120].mxu0 %v6720_v54  ;;  %3276 = vmatprep.mubr.bf16.mxu1 %v2059_v32  ;;  %v6820_v56 = vadd.f32 %v4756_v53, %v4644_v39 }
 0x1e6   : > { %3115 = vmatprep.mubr.bf16.mxu0 %v6812_v1 }
 0x1e7   : > { %v4645_v7 = vpop.f32.mrb[20].mxu0  ;;  %v4757_v54 = vpop.f32.mrb[20].mxu1 }
 0x1e8   : > { %v4646_v15 = vpop.f32.mrb[21].mxu0  ;;  %v4758_v8 = vpop.f32.mrb[21].mxu1 }
 0x1e9   : > { %v4647_v42 = vadd.f32 %v4646_v15, %v4645_v7  ;;  %v4648_v49 = vpop.f32.mrb[22].mxu0  ;;  %v4759_v62 = vadd.f32 %v4758_v8, %v4757_v54  ;;  %v4760_v10 = vpop.f32.mrb[22].mxu1 }
 0x1ea   : > { %v4649_v43 = vpop.f32.mrb[23].mxu0  ;;  %v4761_v4 = vpop.f32.mrb[23].mxu1 }
 0x1eb   : > { %v4650_v14 = vadd.f32 %v4649_v43, %v4648_v49  ;;  %v6824_v19 = vadd.f32 %v4759_v62, %v4647_v42  ;;  %v4762_v27 = vadd.f32 %v4761_v4, %v4760_v10 }
 0x1ec   : > { %3277 = vmatmul.mubr.bf16.gmra.mrb[124].mxu1 %v6786_v40 }
 0x1ed   : > { %3116 = vmatmul.mubr.bf16.gmra.mrb[124].mxu0 %v2033_v17  ;;  %v6826_v30 = vadd.f32 %v4762_v27, %v4650_v14 }
 0x1ee   : > { %5111 = vmatprep.mubr.bf16.mxu0 %v6224_v38  ;;  %v5399_v38 = vld [vmem:[#allocation11 + $0x10] sm:$0xff]  }
 0x1ef   : > { %v4651_v24 = vpop.f32.mrb[24].mxu0  ;;  %5147 = vmatprep.subr.bf16.mxu1 %v5399_v38 }
 0x1f0   : > { %v4652_v63 = vpop.f32.mrb[25].mxu0  ;;  %v4763_v33 = vpop.f32.mrb[24].mxu1  ;;  %5148 = vmatpush3.bf16.msra.mxu1 %v5399_v38 }
 0x1f1   : > { %v4653_v41 = vadd.f32 %v4652_v63, %v4651_v24  ;;  %v4654_v61 = vpop.f32.mrb[26].mxu0  ;;  %v4764_v17 = vpop.f32.mrb[25].mxu1 }
 0x1f2   : > { %v4655_v5 = vpop.f32.mrb[27].mxu0  ;;  %v4765_v55 = vadd.f32 %v4764_v17, %v4763_v33  ;;  %v4766_v9 = vpop.f32.mrb[26].mxu1 }
 0x1f3   : > { %v4656_v18 = vadd.f32 %v4655_v5, %v4654_v61  ;;  %v4767_v6 = vpop.f32.mrb[27].mxu1 }
 0x1f4   : > { %v6830_v29 = vadd.f32 %v4765_v55, %v4653_v41  ;;  %v4768_v2 = vadd.f32 %v4767_v6, %v4766_v9 }
 0x1f5   : > { %5112 = vmatmul.mubr.bf16.vlgmr.msra.gmra.mrb[128].mxu0 %v6255_v16 }
 0x1f6   : > { %5115 = vmatprep.mubr.bf16.mxu0 %v6306_v26  ;;  %v6832_v46 = vadd.f32 %v4768_v2, %v4656_v18 }
 0x1f8   : > { %v4657_v51 = vpop.f32.mrb[28].mxu0 }
 0x1f9   : > { %v4658_v32 = vpop.f32.mrb[29].mxu0  ;;  %v4769_v16 = vpop.f32.mrb[28].mxu1 }
 0x1fa   : > { %v4659_v34 = vadd.f32 %v4658_v32, %v4657_v51  ;;  %v4660_v44 = vpop.f32.mrb[30].mxu0  ;;  %v4770_v37 = vpop.f32.mrb[29].mxu1 }
 0x1fb   : > { %v4661_v39 = vpop.f32.mrb[31].mxu0  ;;  %v4771_v26 = vadd.f32 %v4770_v37, %v4769_v16  ;;  %v4772_v36 = vpop.f32.mrb[30].mxu1 }
 0x1fc   : > { %v4662_v28 = vadd.f32 %v4661_v39, %v4660_v44  ;;  %v4773_v53 = vpop.f32.mrb[31].mxu1  ;;  %v5401_v39 = vld [vmem:[#allocation11 + $0x20] sm:$0xff]  }
 0x1fd   : > { %5116 = vmatmul.mubr.bf16.gmra.mrb[132].mxu0 %v6343_v22  ;;  %v6836_v7 = vadd.f32 %v4771_v26, %v4659_v34  ;;  %v4774_v54 = vadd.f32 %v4773_v53, %v4772_v36 }
 0x1fe   : > { %5119 = vmatprep.mubr.bf16.mxu0 %v6383_v11  ;;  %v5400_v11 = vld [vmem:[#allocation11 + $0x18] sm:$0xff]  }
 0x1ff   : > { %v6838_v15 = vadd.f32 %v4774_v54, %v4662_v28  ;;  %5149 = vmatprep.subr.bf16.mxu1 %v5400_v11 }
 0x200   : > { %5150 = vmatpush3.bf16.msra.mxu1 %v5400_v11 }
 0x201   : > { %5151 = vmatprep.subr.bf16.mxu1 %v5401_v39 }
 0x202   : > { %v4663_v42 = vpop.f32.mrb[32].mxu0  ;;  %v4775_v22 = vpop.f32.mrb[32].mxu1 }
 0x203   : > { %v4664_v8 = vpop.f32.mrb[33].mxu0  ;;  %v4776_v62 = vpop.f32.mrb[33].mxu1 }
 0x204   : > { %v4665_v49 = vadd.f32 %v4664_v8, %v4663_v42  ;;  %v4666_v10 = vpop.f32.mrb[34].mxu0  ;;  %v4777_v43 = vadd.f32 %v4776_v62, %v4775_v22  ;;  %v4778_v14 = vpop.f32.mrb[34].mxu1  ;;  %5152 = vmatpush3.bf16.msra.mxu1 %v5401_v39 }
 0x205   : > { %5120 = vmatmul.mubr.bf16.gmra.mrb[136].mxu0 %v6426_v21  ;;  %v4667_v4 = vpop.f32.mrb[35].mxu0  ;;  %v4779_v24 = vpop.f32.mrb[35].mxu1 }
 0x206   : > { %5123 = vmatprep.mubr.bf16.mxu0 %v6472_v57  ;;  %v4668_v27 = vadd.f32 %v4667_v4, %v4666_v10  ;;  %v6842_v63 = vadd.f32 %v4777_v43, %v4665_v49  ;;  %v4780_v33 = vadd.f32 %v4779_v24, %v4778_v14 }
 0x208   : > { %v6844_v41 = vadd.f32 %v4780_v33, %v4668_v27 }
 0x20a   : > { %v4669_v21 = vpop.f32.mrb[36].mxu0  ;;  %v4781_v61 = vpop.f32.mrb[36].mxu1 }
 0x20b   : > { %v4670_v17 = vpop.f32.mrb[37].mxu0  ;;  %v4782_v57 = vpop.f32.mrb[37].mxu1 }
 0x20c   : > { %v4671_v5 = vadd.f32 %v4670_v17, %v4669_v21  ;;  %v4672_v55 = vpop.f32.mrb[38].mxu0  ;;  %v4783_v9 = vadd.f32 %v4782_v57, %v4781_v61  ;;  %v4784_v18 = vpop.f32.mrb[38].mxu1  ;;  %v5402_v17 = vld [vmem:[#allocation11 + $0x28] sm:$0xff]  }
 0x20d   : > { %5124 = vmatmul.mubr.bf16.gmra.mrb[140].mxu0 %v6501_v45  ;;  %v4673_v38 = vpop.f32.mrb[39].mxu0  ;;  %v4785_v2 = vpop.f32.mrb[39].mxu1  ;;  %5153 = vmatprep.subr.bf16.mxu1 %v5402_v17 }
 0x20e   : > { %5127 = vmatprep.mubr.bf16.mxu0 %v6543_v52  ;;  %v4674_v6 = vadd.f32 %v4673_v38, %v4672_v55  ;;  %v6848_v51 = vadd.f32 %v4783_v9, %v4671_v5  ;;  %v4786_v32 = vadd.f32 %v4785_v2, %v4784_v18  ;;  %5154 = vmatpush3.bf16.msra.mxu1 %v5402_v17 }
 0x210   : > { %v6850_v16 = vadd.f32 %v4786_v32, %v4674_v6 }
 0x212   : > { %v4675_v34 = vpop.f32.mrb[40].mxu0 }
 0x213   : > { %v4676_v45 = vpop.f32.mrb[41].mxu0 }
 0x214   : > { %v4677_v44 = vadd.f32 %v4676_v45, %v4675_v34  ;;  %v4678_v37 = vpop.f32.mrb[42].mxu0 }
 0x215   : > { %5128 = vmatmul.mubr.bf16.gmra.mrb[144].mxu0 %v6596_v20  ;;  %v4679_v52 = vpop.f32.mrb[43].mxu0 }
 0x216   : > { %5131 = vmatprep.mubr.bf16.mxu0 %v7291_v23  ;;  %v4680_v26 = vadd.f32 %v4679_v52, %v4678_v37  ;;  %v4787_v36 = vpop.f32.mrb[40].mxu1 }
 0x217   : > { %v4788_v28 = vpop.f32.mrb[41].mxu1 }
 0x218   : > { %v4789_v53 = vadd.f32 %v4788_v28, %v4787_v36  ;;  %v4790_v54 = vpop.f32.mrb[42].mxu1 }
 0x219   : > { %v4791_v42 = vpop.f32.mrb[43].mxu1 }
 0x21a   : > { %v6854_v22 = vadd.f32 %v4789_v53, %v4677_v44  ;;  %v4792_v8 = vadd.f32 %v4791_v42, %v4790_v54 }
 0x21c   : > { %v6858_v20 = vadd.f32 %v4792_v8, %v4680_v26 }
 0x21d   : > { %5132 = vmatmul.mubr.bf16.gmra.mrb[148].mxu0 %v6662_v35  ;;  %v2061_v35 = vrot.slane %v6786_v40, 1 }
 0x21e   : > { %5135 = vmatprep.mubr.bf16.mxu0 %v6704_v12  ;;  %v4681_v23 = vpop.f32.mrb[44].mxu0  ;;  %v4793_v49 = vpop.f32.mrb[44].mxu1  ;;  %v2062_v12 = vrot.slane %v6794_v59, 1 }
 0x21f   : > { %v4682_v62 = vpop.f32.mrb[45].mxu0  ;;  %v4794_v11 = vpop.f32.mrb[45].mxu1 }
 0x220   : > { %v4683_v10 = vadd.f32 %v4682_v62, %v4681_v23  ;;  %v4684_v43 = vpop.f32.mrb[46].mxu0  ;;  %v4795_v14 = vadd.f32 %v4794_v11, %v4793_v49  ;;  %v4796_v4 = vpop.f32.mrb[46].mxu1  ;;  %v2063_v2 = vsel %vm1948_vm12, %v2061_v35, %v2062_v12 }
 0x221   : > { %v4685_v27 = vpop.f32.mrb[47].mxu0  ;;  %v4797_v33 = vpop.f32.mrb[47].mxu1 }
 0x222   : > { %v4686_v24 = vadd.f32 %v4685_v27, %v4684_v43  ;;  %v6860_v21 = vadd.f32 %v4795_v14, %v4683_v10  ;;  %v4798_v61 = vadd.f32 %v4797_v33, %v4796_v4  ;;  %v5403_v10 = vld [vmem:[#allocation11 + $0x30] sm:$0xff]  }
 0x223   : > { %5155 = vmatprep.subr.bf16.mxu1 %v5403_v10 }
 0x224   : > { %v6866_v5 = vadd.f32 %v4798_v61, %v4686_v24  ;;  %5156 = vmatpush3.bf16.msra.mxu1 %v5403_v10 }
 0x225   : > { %5136 = vmatmul.mubr.bf16.gmra.mrb[152].mxu0 %v6724_v58 }
 0x226   : > { %5139 = vmatprep.mubr.bf16.mxu0 %v6812_v1  ;;  %v4687_v57 = vpop.f32.mrb[48].mxu0  ;;  %v4799_v55 = vpop.f32.mrb[48].mxu1 }
 0x227   : > { %v4688_v9 = vpop.f32.mrb[49].mxu0  ;;  %v4800_v38 = vpop.f32.mrb[49].mxu1 }
 0x228   : > { %v4689_v18 = vadd.f32 %v4688_v9, %v4687_v57  ;;  %v4690_v6 = vpop.f32.mrb[50].mxu0  ;;  %v4801_v58 = vadd.f32 %v4800_v38, %v4799_v55  ;;  %v4802_v32 = vpop.f32.mrb[50].mxu1 }
 0x229   : > { %v4691_v1 = vpop.f32.mrb[51].mxu0  ;;  %v4803_v40 = vpop.f32.mrb[51].mxu1 }
 0x22a   : > { %v4692_v34 = vadd.f32 %v4691_v1, %v4690_v6  ;;  %v6869_v45 = vadd.f32 %v4801_v58, %v4689_v18  ;;  %v4804_v59 = vadd.f32 %v4803_v40, %v4802_v32 }
 0x22c   : > { %v6871_v44 = vadd.f32 %v4804_v59, %v4692_v34 }
 0x22d   : > { %5140 = vmatmul.mubr.bf16.gmra.mrb[156].mxu0 %v2063_v2 }
 0x22f   : > { %v4693_v37 = vpop.f32.mrb[52].mxu0  ;;  %v4805_v39 = vpop.f32.mrb[52].mxu1 }
 0x230   : > { %v4694_v52 = vpop.f32.mrb[53].mxu0  ;;  %v4806_v36 = vpop.f32.mrb[53].mxu1 }
 0x231   : > { %v4695_v26 = vadd.f32 %v4694_v52, %v4693_v37  ;;  %v4696_v28 = vpop.f32.mrb[54].mxu0  ;;  %v4807_v53 = vadd.f32 %v4806_v36, %v4805_v39  ;;  %v4808_v54 = vpop.f32.mrb[54].mxu1  ;;  %v5404_v36 = vld [vmem:[#allocation11 + $0x38] sm:$0xff]  }
 0x232   : > { %v4697_v42 = vpop.f32.mrb[55].mxu0  ;;  %v4809_v23 = vpop.f32.mrb[55].mxu1  ;;  %5157 = vmatprep.subr.bf16.mxu1 %v5404_v36 }
 0x233   : > { %v4698_v8 = vadd.f32 %v4697_v42, %v4696_v28  ;;  %v6873_v49 = vadd.f32 %v4807_v53, %v4695_v26  ;;  %v4810_v62 = vadd.f32 %v4809_v23, %v4808_v54  ;;  %5158 = vmatpush3.bf16.msra.mxu1 %v5404_v36 }
 0x235   : > { %v6875_v11 = vadd.f32 %v4810_v62, %v4698_v8 }
 0x237   : > { %v4811_v14 = vpop.f32.mrb[56].mxu1 }
 0x238   : > { %v4699_v43 = vpop.f32.mrb[56].mxu0  ;;  %v4812_v24 = vpop.f32.mrb[57].mxu1 }
 0x239   : > { %v4700_v4 = vpop.f32.mrb[57].mxu0  ;;  %v4813_v61 = vadd.f32 %v4812_v24, %v4811_v14  ;;  %v4814_v35 = vpop.f32.mrb[58].mxu1 }
 0x23a   : > { %v4701_v27 = vadd.f32 %v4700_v4, %v4699_v43  ;;  %v4702_v33 = vpop.f32.mrb[58].mxu0  ;;  %v4815_v57 = vpop.f32.mrb[59].mxu1 }
 0x23b   : > { %v4703_v12 = vpop.f32.mrb[59].mxu0  ;;  %v4816_v9 = vadd.f32 %v4815_v57, %v4814_v35 }
 0x23c   : > { %v4704_v17 = vadd.f32 %v4703_v12, %v4702_v33  ;;  %v6877_v55 = vadd.f32 %v4813_v61, %v4701_v27 }
 0x23e   : > { %v6879_v18 = vadd.f32 %v4816_v9, %v4704_v17 }
 0x23f   : > { %v4817_v6 = vpop.f32.mrb[60].mxu1 }
 0x240   : > { %v4705_v38 = vpop.f32.mrb[60].mxu0  ;;  %v4818_v32 = vpop.f32.mrb[61].mxu1 }
 0x241   : > { %v4706_v2 = vpop.f32.mrb[61].mxu0  ;;  %v4819_v34 = vadd.f32 %v4818_v32, %v4817_v6  ;;  %v4820_v40 = vpop.f32.mrb[62].mxu1 }
 0x242   : > { %v4707_v58 = vadd.f32 %v4706_v2, %v4705_v38  ;;  %v4708_v1 = vpop.f32.mrb[62].mxu0  ;;  %v4821_v39 = vpop.f32.mrb[63].mxu1 }
 0x243   : > { %v4709_v59 = vpop.f32.mrb[63].mxu0  ;;  %v4822_v26 = vadd.f32 %v4821_v39, %v4820_v40 }
 0x244   : > { %v4710_v37 = vadd.f32 %v4709_v59, %v4708_v1  ;;  %v6881_v52 = vadd.f32 %v4819_v34, %v4707_v58 }
 0x246   : > { %v6883_v28 = vadd.f32 %v4822_v26, %v4710_v37 }
 0x247   : > { %v4951_v42 = vpop.f32.mrb[64].mxu1 }
 0x248   : > { %v4839_v53 = vpop.f32.mrb[64].mxu0  ;;  %v4952_v62 = vpop.f32.mrb[65].mxu1 }
 0x249   : > { %v4840_v54 = vpop.f32.mrb[65].mxu0  ;;  %v4953_v43 = vadd.f32 %v4952_v62, %v4951_v42  ;;  %v4954_v14 = vpop.f32.mrb[66].mxu1 }
 0x24a   : > { %v4841_v8 = vadd.f32 %v4840_v54, %v4839_v53  ;;  %v4842_v23 = vpop.f32.mrb[66].mxu0  ;;  %v4955_v24 = vpop.f32.mrb[67].mxu1 }
 0x24b   : > { %v4843_v10 = vpop.f32.mrb[67].mxu0  ;;  %v4956_v33 = vadd.f32 %v4955_v24, %v4954_v14 }
 0x24c   : > { %v2998_v4 = vadd.f32 %v4841_v8, %v6768_v13  ;;  %v4844_v27 = vadd.f32 %v4843_v10, %v4842_v23 }
 0x24e   : > { %v3001_v61 = vadd.f32 %v4844_v27, %v6771_v48  ;;  %v6887_v35 = vadd.f32 %v4953_v43, %v2998_v4 }
 0x24f   : > { %v4957_v9 = vpop.f32.mrb[68].mxu1 }
 0x250   : > { %v4845_v12 = vpop.f32.mrb[68].mxu0  ;;  %v6889_v17 = vadd.f32 %v4956_v33, %v3001_v61  ;;  %v4958_v2 = vpop.f32.mrb[69].mxu1 }
 0x251   : > { %v4846_v57 = vpop.f32.mrb[69].mxu0  ;;  %v4959_v32 = vadd.f32 %v4958_v2, %v4957_v9  ;;  %v4960_v1 = vpop.f32.mrb[70].mxu1 }
 0x252   : > { %v4847_v38 = vadd.f32 %v4846_v57, %v4845_v12  ;;  %v4848_v6 = vpop.f32.mrb[70].mxu0  ;;  %v4961_v40 = vpop.f32.mrb[71].mxu1 }
 0x253   : > { %v4849_v58 = vpop.f32.mrb[71].mxu0  ;;  %v4962_v59 = vadd.f32 %v4961_v40, %v4960_v1 }
 0x254   : > { %v3006_v13 = vadd.f32 %v4847_v38, %v6776_v0  ;;  %v4850_v34 = vadd.f32 %v4849_v58, %v4848_v6 }
 0x256   : > { %v3009_v48 = vadd.f32 %v4850_v34, %v6782_v25  ;;  %v6893_v37 = vadd.f32 %v4959_v32, %v3006_v13 }
 0x257   : > { %v4963_v53 = vpop.f32.mrb[72].mxu1 }
 0x258   : > { %v4851_v39 = vpop.f32.mrb[72].mxu0  ;;  %v6895_v26 = vadd.f32 %v4962_v59, %v3009_v48  ;;  %v4964_v8 = vpop.f32.mrb[73].mxu1 }
 0x259   : > { %v4852_v36 = vpop.f32.mrb[73].mxu0  ;;  %v4965_v62 = vadd.f32 %v4964_v8, %v4963_v53  ;;  %v4966_v10 = vpop.f32.mrb[74].mxu1 }
 0x25a   : > { %v4853_v54 = vadd.f32 %v4852_v36, %v4851_v39  ;;  %v4854_v42 = vpop.f32.mrb[74].mxu0  ;;  %v4967_v14 = vpop.f32.mrb[75].mxu1 }
 0x25b   : > { %v4855_v23 = vpop.f32.mrb[75].mxu0  ;;  %v4968_v4 = vadd.f32 %v4967_v14, %v4966_v10 }
 0x25c   : > { %v3014_v0 = vadd.f32 %v4853_v54, %v6791_v47  ;;  %v4856_v43 = vadd.f32 %v4855_v23, %v4854_v42 }
 0x25e   : > { %v3017_v25 = vadd.f32 %v4856_v43, %v6797_v50  ;;  %v6899_v27 = vadd.f32 %v4965_v62, %v3014_v0 }
 0x25f   : > { %v4969_v12 = vpop.f32.mrb[76].mxu1 }
 0x260   : > { %v4857_v24 = vpop.f32.mrb[76].mxu0  ;;  %v6901_v33 = vadd.f32 %v4968_v4, %v3017_v25  ;;  %v4970_v38 = vpop.f32.mrb[77].mxu1 }
 0x261   : > { %v4858_v61 = vpop.f32.mrb[77].mxu0  ;;  %v4971_v2 = vadd.f32 %v4970_v38, %v4969_v12  ;;  %v4972_v58 = vpop.f32.mrb[78].mxu1 }
 0x262   : > { %v4859_v57 = vadd.f32 %v4858_v61, %v4857_v24  ;;  %v4860_v9 = vpop.f32.mrb[78].mxu0  ;;  %v4973_v1 = vpop.f32.mrb[79].mxu1 }
 0x263   : > { %v4861_v6 = vpop.f32.mrb[79].mxu0  ;;  %v4974_v13 = vadd.f32 %v4973_v1, %v4972_v58 }
 0x264   : > { %v3022_v47 = vadd.f32 %v4859_v57, %v6805_v60  ;;  %v4862_v32 = vadd.f32 %v4861_v6, %v4860_v9 }
 0x266   : > { %v3025_v50 = vadd.f32 %v4862_v32, %v6809_v3  ;;  %v6905_v34 = vadd.f32 %v4971_v2, %v3022_v47 }
 0x267   : > { %v4975_v39 = vpop.f32.mrb[80].mxu1 }
 0x268   : > { %v4863_v40 = vpop.f32.mrb[80].mxu0  ;;  %v6907_v59 = vadd.f32 %v4974_v13, %v3025_v50  ;;  %v4976_v54 = vpop.f32.mrb[81].mxu1 }
 0x269   : > { %v4864_v48 = vpop.f32.mrb[81].mxu0  ;;  %v4977_v8 = vadd.f32 %v4976_v54, %v4975_v39  ;;  %v4978_v23 = vpop.f32.mrb[82].mxu1 }
 0x26a   : > { %v4865_v36 = vadd.f32 %v4864_v48, %v4863_v40  ;;  %v4866_v53 = vpop.f32.mrb[82].mxu0  ;;  %v4979_v10 = vpop.f32.mrb[83].mxu1 }
 0x26b   : > { %v4867_v42 = vpop.f32.mrb[83].mxu0  ;;  %v4980_v0 = vadd.f32 %v4979_v10, %v4978_v23 }
 0x26c   : > { %v3030_v60 = vadd.f32 %v4865_v36, %v6818_v31  ;;  %v4868_v62 = vadd.f32 %v4867_v42, %v4866_v53 }
 0x26e   : > { %v3033_v3 = vadd.f32 %v4868_v62, %v6820_v56  ;;  %v6911_v43 = vadd.f32 %v4977_v8, %v3030_v60 }
 0x26f   : > { %v4981_v24 = vpop.f32.mrb[84].mxu1 }
 0x270   : > { %v4869_v14 = vpop.f32.mrb[84].mxu0  ;;  %v6913_v4 = vadd.f32 %v4980_v0, %v3033_v3  ;;  %v4982_v57 = vpop.f32.mrb[85].mxu1 }
 0x271   : > { %v4870_v25 = vpop.f32.mrb[85].mxu0  ;;  %v4983_v38 = vadd.f32 %v4982_v57, %v4981_v24  ;;  %v4984_v6 = vpop.f32.mrb[86].mxu1 }
 0x272   : > { %v4871_v61 = vadd.f32 %v4870_v25, %v4869_v14  ;;  %v4872_v12 = vpop.f32.mrb[86].mxu0  ;;  %v4985_v58 = vpop.f32.mrb[87].mxu1 }
 0x273   : > { %v4873_v9 = vpop.f32.mrb[87].mxu0  ;;  %v4986_v47 = vadd.f32 %v4985_v58, %v4984_v6 }
 0x274   : > { %v3038_v31 = vadd.f32 %v4871_v61, %v6824_v19  ;;  %v4874_v2 = vadd.f32 %v4873_v9, %v4872_v12 }
 0x276   : > { %v3041_v56 = vadd.f32 %v4874_v2, %v6826_v30  ;;  %v6917_v32 = vadd.f32 %v4983_v38, %v3038_v31 }
 0x277   : > { %v4987_v40 = vpop.f32.mrb[88].mxu1 }
 0x278   : > { %v4875_v1 = vpop.f32.mrb[88].mxu0  ;;  %v6919_v13 = vadd.f32 %v4986_v47, %v3041_v56  ;;  %v4988_v36 = vpop.f32.mrb[89].mxu1 }
 0x279   : > { %v4876_v50 = vpop.f32.mrb[89].mxu0  ;;  %v4989_v54 = vadd.f32 %v4988_v36, %v4987_v40  ;;  %v4990_v42 = vpop.f32.mrb[90].mxu1 }
 0x27a   : > { %v4877_v48 = vadd.f32 %v4876_v50, %v4875_v1  ;;  %v4878_v39 = vpop.f32.mrb[90].mxu0  ;;  %v4991_v23 = vpop.f32.mrb[91].mxu1 }
 0x27b   : > { %v4879_v53 = vpop.f32.mrb[91].mxu0  ;;  %v4992_v60 = vadd.f32 %v4991_v23, %v4990_v42 }
 0x27c   : > { %v3046_v19 = vadd.f32 %v4877_v48, %v6830_v29  ;;  %v4880_v8 = vadd.f32 %v4879_v53, %v4878_v39 }
 0x27e   : > { %v3049_v30 = vadd.f32 %v4880_v8, %v6832_v46  ;;  %v6923_v62 = vadd.f32 %v4989_v54, %v3046_v19 }
 0x27f   : > { %v4993_v14 = vpop.f32.mrb[92].mxu1 }
 0x280   : > { %v4881_v10 = vpop.f32.mrb[92].mxu0  ;;  %v6925_v0 = vadd.f32 %v4992_v60, %v3049_v30  ;;  %v4994_v61 = vpop.f32.mrb[93].mxu1 }
 0x281   : > { %v4882_v3 = vpop.f32.mrb[93].mxu0  ;;  %v4995_v57 = vadd.f32 %v4994_v61, %v4993_v14  ;;  %v4996_v9 = vpop.f32.mrb[94].mxu1 }
 0x282   : > { %v4883_v25 = vadd.f32 %v4882_v3, %v4881_v10  ;;  %v4884_v24 = vpop.f32.mrb[94].mxu0  ;;  %v4997_v6 = vpop.f32.mrb[95].mxu1 }
 0x283   : > { %v4885_v12 = vpop.f32.mrb[95].mxu0  ;;  %v4998_v31 = vadd.f32 %v4997_v6, %v4996_v9 }
 0x284   : > { %v3054_v29 = vadd.f32 %v4883_v25, %v6836_v7  ;;  %v4886_v38 = vadd.f32 %v4885_v12, %v4884_v24 }
 0x286   : > { %v3057_v46 = vadd.f32 %v4886_v38, %v6838_v15  ;;  %v6929_v2 = vadd.f32 %v4995_v57, %v3054_v29 }
 0x287   : > { %v4999_v1 = vpop.f32.mrb[96].mxu1 }
 0x288   : > { %v4887_v58 = vpop.f32.mrb[96].mxu0  ;;  %v6931_v47 = vadd.f32 %v4998_v31, %v3057_v46  ;;  %v5000_v48 = vpop.f32.mrb[97].mxu1 }
 0x289   : > { %v4888_v56 = vpop.f32.mrb[97].mxu0  ;;  %v5001_v36 = vadd.f32 %v5000_v48, %v4999_v1  ;;  %v5002_v53 = vpop.f32.mrb[98].mxu1 }
 0x28a   : > { %v4889_v50 = vadd.f32 %v4888_v56, %v4887_v58  ;;  %v4890_v40 = vpop.f32.mrb[98].mxu0  ;;  %v5003_v42 = vpop.f32.mrb[99].mxu1 }
 0x28b   : > { %v4891_v39 = vpop.f32.mrb[99].mxu0  ;;  %v5004_v19 = vadd.f32 %v5003_v42, %v5002_v53 }
 0x28c   : > { %v3062_v7 = vadd.f32 %v4889_v50, %v6842_v63  ;;  %v4892_v54 = vadd.f32 %v4891_v39, %v4890_v40 }
 0x28e   : > { %v3065_v15 = vadd.f32 %v4892_v54, %v6844_v41  ;;  %v6935_v8 = vadd.f32 %v5001_v36, %v3062_v7 }
 0x28f   : > { %v5005_v10 = vpop.f32.mrb[100].mxu1 }
 0x290   : > { %v4893_v23 = vpop.f32.mrb[100].mxu0  ;;  %v6937_v60 = vadd.f32 %v5004_v19, %v3065_v15  ;;  %v5006_v25 = vpop.f32.mrb[101].mxu1 }
 0x291   : > { %v4894_v30 = vpop.f32.mrb[101].mxu0  ;;  %v5007_v61 = vadd.f32 %v5006_v25, %v5005_v10  ;;  %v5008_v12 = vpop.f32.mrb[102].mxu1 }
 0x292   : > { %v4895_v3 = vadd.f32 %v4894_v30, %v4893_v23  ;;  %v4896_v14 = vpop.f32.mrb[102].mxu0  ;;  %v5009_v9 = vpop.f32.mrb[103].mxu1 }
 0x293   : > { %v4897_v24 = vpop.f32.mrb[103].mxu0  ;;  %v5010_v29 = vadd.f32 %v5009_v9, %v5008_v12 }
 0x294   : > { %v3070_v63 = vadd.f32 %v4895_v3, %v6848_v51  ;;  %v4898_v57 = vadd.f32 %v4897_v24, %v4896_v14 }
 0x296   : > { %v3073_v41 = vadd.f32 %v4898_v57, %v6850_v16  ;;  %v6941_v38 = vadd.f32 %v5007_v61, %v3070_v63 }
 0x297   : > { %v5011_v58 = vpop.f32.mrb[104].mxu1 }
 0x298   : > { %v4899_v6 = vpop.f32.mrb[104].mxu0  ;;  %v6943_v31 = vadd.f32 %v5010_v29, %v3073_v41  ;;  %v5012_v50 = vpop.f32.mrb[105].mxu1 }
 0x299   : > { %v4900_v46 = vpop.f32.mrb[105].mxu0  ;;  %v5013_v48 = vadd.f32 %v5012_v50, %v5011_v58  ;;  %v5014_v39 = vpop.f32.mrb[106].mxu1 }
 0x29a   : > { %v4901_v56 = vadd.f32 %v4900_v46, %v4899_v6  ;;  %v4902_v1 = vpop.f32.mrb[106].mxu0  ;;  %v5015_v53 = vpop.f32.mrb[107].mxu1 }
 0x29b   : > { %v4903_v40 = vpop.f32.mrb[107].mxu0  ;;  %v5016_v7 = vadd.f32 %v5015_v53, %v5014_v39 }
 0x29c   : > { %v3078_v51 = vadd.f32 %v4901_v56, %v6854_v22  ;;  %v4904_v36 = vadd.f32 %v4903_v40, %v4902_v1 }
 0x29e   : > { %v3081_v16 = vadd.f32 %v4904_v36, %v6858_v20  ;;  %v6947_v54 = vadd.f32 %v5013_v48, %v3078_v51 }
 0x29f   : > { %v5017_v23 = vpop.f32.mrb[108].mxu1 }
 0x2a0   : > { %v4905_v42 = vpop.f32.mrb[108].mxu0  ;;  %v6949_v19 = vadd.f32 %v5016_v7, %v3081_v16  ;;  %v5018_v3 = vpop.f32.mrb[109].mxu1 }
 0x2a1   : > { %v4906_v15 = vpop.f32.mrb[109].mxu0  ;;  %v5019_v25 = vadd.f32 %v5018_v3, %v5017_v23  ;;  %v5020_v24 = vpop.f32.mrb[110].mxu1 }
 0x2a2   : > { %v4907_v30 = vadd.f32 %v4906_v15, %v4905_v42  ;;  %v4908_v10 = vpop.f32.mrb[110].mxu0  ;;  %v5021_v12 = vpop.f32.mrb[111].mxu1 }
 0x2a3   : > { %v4909_v14 = vpop.f32.mrb[111].mxu0  ;;  %v5022_v63 = vadd.f32 %v5021_v12, %v5020_v24 }
 0x2a4   : > { %v3086_v22 = vadd.f32 %v4907_v30, %v6860_v21  ;;  %v4910_v61 = vadd.f32 %v4909_v14, %v4908_v10 }
 0x2a6   : > { %v3089_v20 = vadd.f32 %v4910_v61, %v6866_v5  ;;  %v6953_v57 = vadd.f32 %v5019_v25, %v3086_v22 }
 0x2a7   : > { %v5023_v6 = vpop.f32.mrb[112].mxu1 }
 0x2a8   : > { %v4911_v9 = vpop.f32.mrb[112].mxu0  ;;  %v6955_v29 = vadd.f32 %v5022_v63, %v3089_v20  ;;  %v5024_v56 = vpop.f32.mrb[113].mxu1 }
 0x2a9   : > { %v4912_v41 = vpop.f32.mrb[113].mxu0  ;;  %v5025_v50 = vadd.f32 %v5024_v56, %v5023_v6  ;;  %v5026_v40 = vpop.f32.mrb[114].mxu1 }
 0x2aa   : > { %v4913_v46 = vadd.f32 %v4912_v41, %v4911_v9  ;;  %v4914_v58 = vpop.f32.mrb[114].mxu0  ;;  %v5027_v39 = vpop.f32.mrb[115].mxu1 }
 0x2ab   : > { %v4915_v1 = vpop.f32.mrb[115].mxu0  ;;  %v5028_v51 = vadd.f32 %v5027_v39, %v5026_v40 }
 0x2ac   : > { %v3094_v21 = vadd.f32 %v4913_v46, %v6869_v45  ;;  %v4916_v48 = vadd.f32 %v4915_v1, %v4914_v58 }
 0x2ae   : > { %v3097_v5 = vadd.f32 %v4916_v48, %v6871_v44  ;;  %v6959_v36 = vadd.f32 %v5025_v50, %v3094_v21 }
 0x2af   : > { %v5029_v42 = vpop.f32.mrb[116].mxu1 }
 0x2b0   : > { %v4917_v53 = vpop.f32.mrb[116].mxu0  ;;  %v6961_v7 = vadd.f32 %v5028_v51, %v3097_v5  ;;  %v5030_v30 = vpop.f32.mrb[117].mxu1 }
 0x2b1   : > { %v4918_v16 = vpop.f32.mrb[117].mxu0  ;;  %v5031_v3 = vadd.f32 %v5030_v30, %v5029_v42  ;;  %v5032_v14 = vpop.f32.mrb[118].mxu1 }
 0x2b2   : > { %v4919_v15 = vadd.f32 %v4918_v16, %v4917_v53  ;;  %v4920_v23 = vpop.f32.mrb[118].mxu0  ;;  %v5033_v24 = vpop.f32.mrb[119].mxu1 }
 0x2b3   : > { %v4921_v10 = vpop.f32.mrb[119].mxu0  ;;  %v5034_v22 = vadd.f32 %v5033_v24, %v5032_v14 }
 0x2b4   : > { %v3102_v45 = vadd.f32 %v4919_v15, %v6873_v49  ;;  %v4922_v25 = vadd.f32 %v4921_v10, %v4920_v23 }
 0x2b6   : > { %v3105_v44 = vadd.f32 %v4922_v25, %v6875_v11  ;;  %v6965_v61 = vadd.f32 %v5031_v3, %v3102_v45 }
 0x2b7   : > { %v5035_v9 = vpop.f32.mrb[120].mxu1 }
 0x2b8   : > { %v4923_v12 = vpop.f32.mrb[120].mxu0  ;;  %v6967_v63 = vadd.f32 %v5034_v22, %v3105_v44  ;;  %v5036_v46 = vpop.f32.mrb[121].mxu1  ;;  %v6982_v22 = vld [vmem:[%s7206_s6] ss:$0 sm:$0xff] }
 0x2b9   : > { %v4924_v20 = vpop.f32.mrb[121].mxu0  ;;  %v5037_v56 = vadd.f32 %v5036_v46, %v5035_v9  ;;  %v5038_v1 = vpop.f32.mrb[122].mxu1 }
 0x2ba   : > { %v4925_v41 = vadd.f32 %v4924_v20, %v4923_v12  ;;  %v4926_v6 = vpop.f32.mrb[122].mxu0  ;;  %v5039_v40 = vpop.f32.mrb[123].mxu1 }
 0x2bb   : > { %v4927_v58 = vpop.f32.mrb[123].mxu0  ;;  %v5040_v21 = vadd.f32 %v5039_v40, %v5038_v1 }
 0x2bc   : > { %v3110_v49 = vadd.f32 %v4925_v41, %v6877_v55  ;;  %v4928_v50 = vadd.f32 %v4927_v58, %v4926_v6 }
 0x2be   : > { %v3113_v11 = vadd.f32 %v4928_v50, %v6879_v18  ;;  %v6971_v48 = vadd.f32 %v5037_v56, %v3110_v49 }
 0x2bf   : > { %v5041_v53 = vpop.f32.mrb[124].mxu1 }
 0x2c0   : > { %v4929_v39 = vpop.f32.mrb[124].mxu0  ;;  %v6973_v51 = vadd.f32 %v5040_v21, %v3113_v11  ;;  %v5042_v15 = vpop.f32.mrb[125].mxu1 }
 0x2c1   : > { %v4930_v5 = vpop.f32.mrb[125].mxu0  ;;  %v5043_v30 = vadd.f32 %v5042_v15, %v5041_v53  ;;  %v5044_v10 = vpop.f32.mrb[126].mxu1 }
 0x2c2   : > { %v4931_v16 = vadd.f32 %v4930_v5, %v4929_v39  ;;  %v4932_v42 = vpop.f32.mrb[126].mxu0  ;;  %v5045_v14 = vpop.f32.mrb[127].mxu1 }
 0x2c3   : > { %v4933_v23 = vpop.f32.mrb[127].mxu0  ;;  %v5046_v45 = vadd.f32 %v5045_v14, %v5044_v10 }
 0x2c4   : > { %v3118_v55 = vadd.f32 %v4931_v16, %v6881_v52  ;;  %v4934_v3 = vadd.f32 %v4933_v23, %v4932_v42  ;;  %v6990_v52 = vld [vmem:[%s7207_s7] ss:$0 sm:$0xff] }
 0x2c6   : > { %v3121_v18 = vadd.f32 %v4934_v3, %v6883_v28  ;;  %v6977_v25 = vadd.f32 %v5043_v30, %v3118_v55 }
 0x2c8   : > { %v5113_v24 = vpop.f32.mrb[128].mxu0  ;;  %v6984_v44 = vadd.f32 %v5046_v45, %v3121_v18 }
 0x2c9   : > { %v3328_v12 = vadd.f32 %v5113_v24, %v6893_v37  ;;  %v3319_v20 = vpop.f32.mrb[129].mxu0 }
 0x2ca   : > { %v3320_v28 = vadd.f32 %v3319_v20, %v6887_v35  ;;  %v5114_v9 = vpop.f32.mrb[130].mxu0 }
 0x2cb   : > { %v3455_v41 = vmul.f32 %v6982_v22, %v3328_v12  ;;  %v3331_v6 = vadd.f32 %v5114_v9, %v6895_v26  ;;  %v3322_v46 = vpop.f32.mrb[131].mxu0 }
 0x2cc   : > { %v3453_v58 = vmul.f32 %v6982_v22, %v3320_v28  ;;  %v3323_v56 = vadd.f32 %v3322_v46, %v6889_v17 }
 0x2cd   : > { %v3494_v37 = vadd.f32 %v6990_v52, %v3455_v41  ;;  %v3456_v1 = vmul.f32 %v6982_v22, %v3331_v6 }
 0x2ce   : > { %v3492_v49 = vadd.f32 %v6990_v52, %v3453_v58  ;;  %v3454_v50 = vmul.f32 %v6982_v22, %v3323_v56 }
 0x2cf   : > { %v3495_v35 = vadd.f32 %v6990_v52, %v3456_v1  ;;  %v3526_v11 = vmax.f32 %v3494_v37, 0.0 }
 0x2d0   : > { %v3493_v40 = vadd.f32 %v6990_v52, %v3454_v50  ;;  %v5117_v21 = vpop.f32.mrb[132].mxu0  ;;  %v3524_v53 = vmax.f32 %v3492_v49, 0.0 }
 0x2d1   : > { %v3527_v26 = vmax.f32 %v3495_v35, 0.0  ;;  %v3344_v39 = vadd.f32 %v5117_v21, %v6905_v34  ;;  %v3335_v5 = vpop.f32.mrb[133].mxu0 }
 0x2d2   : > { %v3525_v17 = vmax.f32 %v3493_v40, 0.0  ;;  %v3336_v16 = vadd.f32 %v3335_v5, %v6899_v27  ;;  %v5118_v42 = vpop.f32.mrb[134].mxu0 }
 0x2d3   : > { %v3557_v15 = vpack.c.bf16 %v3527_v26, %v3526_v11  ;;  %v3459_v23 = vmul.f32 %v6982_v22, %v3344_v39  ;;  %v3347_v30 = vadd.f32 %v5118_v42, %v6907_v59  ;;  %v3338_v10 = vpop.f32.mrb[135].mxu0 }
 0x2d4   : > { %v3457_v55 = vmul.f32 %v6982_v22, %v3336_v16  ;;  %v3339_v3 = vadd.f32 %v3338_v10, %v6901_v33  ;;  %v3556_v14 = vpack.c.bf16 %v3525_v17, %v3524_v53 }
 0x2d5   : > { %v3498_v45 = vadd.f32 %v6990_v52, %v3459_v23  ;;  %v3460_v34 = vmul.f32 %v6982_v22, %v3347_v30 }
 0x2d6   : > { %v3496_v18 = vadd.f32 %v6990_v52, %v3457_v55  ;;  %v3458_v27 = vmul.f32 %v6982_v22, %v3339_v3  ;;  %5159 = vmatprep.mubr.bf16.mxu1 %v3556_v14 }
 0x2d7   : > { %v3499_v24 = vadd.f32 %v6990_v52, %v3460_v34  ;;  %5160 = vmatmul.mubr.bf16.vlgmr.msra.gmra.mrb[128].mxu1 %v3557_v15  ;;  %v3530_v20 = vmax.f32 %v3498_v45, 0.0 }
 0x2d8   : > { %v3497_v59 = vadd.f32 %v6990_v52, %v3458_v27  ;;  %v5121_v12 = vpop.f32.mrb[136].mxu0  ;;  %v3528_v41 = vmax.f32 %v3496_v18, 0.0 }
 0x2d9   : > { %v3531_v28 = vmax.f32 %v3499_v24, 0.0  ;;  %v3360_v33 = vadd.f32 %v5121_v12, %v6917_v32  ;;  %v3351_v9 = vpop.f32.mrb[137].mxu0 }
 0x2da   : > { %v3529_v6 = vmax.f32 %v3497_v59, 0.0  ;;  %v3352_v46 = vadd.f32 %v3351_v9, %v6911_v43  ;;  %v5122_v58 = vpop.f32.mrb[138].mxu0 }
 0x2db   : > { %v3463_v56 = vmul.f32 %v6982_v22, %v3360_v33  ;;  %v3363_v37 = vadd.f32 %v5122_v58, %v6919_v13  ;;  %v3354_v1 = vpop.f32.mrb[139].mxu0  ;;  %v3559_v49 = vpack.c.bf16 %v3531_v28, %v3530_v20 }
 0x2dc   : > { %v3461_v50 = vmul.f32 %v6982_v22, %v3352_v46  ;;  %v3355_v35 = vadd.f32 %v3354_v1, %v6913_v4  ;;  %v3558_v40 = vpack.c.bf16 %v3529_v6, %v3528_v41 }
 0x2dd   : > { %v3502_v21 = vadd.f32 %v6990_v52, %v3463_v56  ;;  %v3464_v32 = vmul.f32 %v6982_v22, %v3363_v37 }
 0x2de   : > { %v3500_v11 = vadd.f32 %v6990_v52, %v3461_v50  ;;  %v3462_v43 = vmul.f32 %v6982_v22, %v3355_v35  ;;  %5163 = vmatprep.mubr.bf16.mxu1 %v3558_v40 }
 0x2df   : > { %v3503_v26 = vadd.f32 %v6990_v52, %v3464_v32  ;;  %5164 = vmatmul.mubr.bf16.gmra.mrb[132].mxu1 %v3559_v49  ;;  %v3534_v5 = vmax.f32 %v3502_v21, 0.0 }
 0x2e0   : > { %v3501_v13 = vadd.f32 %v6990_v52, %v3462_v43  ;;  %v5125_v39 = vpop.f32.mrb[140].mxu0  ;;  %v3532_v16 = vmax.f32 %v3500_v11, 0.0 }
 0x2e1   : > { %v3535_v53 = vmax.f32 %v3503_v26, 0.0  ;;  %v3376_v4 = vadd.f32 %v5125_v39, %v6929_v2  ;;  %v3367_v17 = vpop.f32.mrb[141].mxu0 }
 0x2e2   : > { %v3533_v42 = vmax.f32 %v3501_v13, 0.0  ;;  %v3368_v15 = vadd.f32 %v3367_v17, %v6923_v62  ;;  %v5126_v23 = vpop.f32.mrb[142].mxu0 }
 0x2e3   : > { %v3467_v30 = vmul.f32 %v6982_v22, %v3376_v4  ;;  %v3379_v10 = vadd.f32 %v5126_v23, %v6931_v47  ;;  %v3370_v55 = vpop.f32.mrb[143].mxu0  ;;  %v3561_v3 = vpack.c.bf16 %v3535_v53, %v3534_v5 }
 0x2e4   : > { %v3465_v14 = vmul.f32 %v6982_v22, %v3368_v15  ;;  %v3371_v45 = vadd.f32 %v3370_v55, %v6925_v0  ;;  %v3560_v34 = vpack.c.bf16 %v3533_v42, %v3532_v16 }
 0x2e5   : > { %v3506_v18 = vadd.f32 %v6990_v52, %v3467_v30  ;;  %v3468_v2 = vmul.f32 %v6982_v22, %v3379_v10 }
 0x2e6   : > { %v3504_v27 = vadd.f32 %v6990_v52, %v3465_v14  ;;  %v3466_v62 = vmul.f32 %v6982_v22, %v3371_v45  ;;  %5167 = vmatprep.mubr.bf16.mxu1 %v3560_v34 }
 0x2e7   : > { %v3507_v24 = vadd.f32 %v6990_v52, %v3468_v2  ;;  %5168 = vmatmul.mubr.bf16.gmra.mrb[136].mxu1 %v3561_v3  ;;  %v3538_v12 = vmax.f32 %v3506_v18, 0.0 }
 0x2e8   : > { %v3505_v47 = vadd.f32 %v6990_v52, %v3466_v62  ;;  %v5129_v59 = vpop.f32.mrb[144].mxu0  ;;  %v3536_v33 = vmax.f32 %v3504_v27, 0.0 }
 0x2e9   : > { %v3539_v20 = vmax.f32 %v3507_v24, 0.0  ;;  %v3392_v0 = vadd.f32 %v5129_v59, %v6941_v38  ;;  %v3383_v28 = vpop.f32.mrb[145].mxu0 }
 0x2ea   : > { %v3537_v9 = vmax.f32 %v3505_v47, 0.0  ;;  %v3384_v41 = vadd.f32 %v3383_v28, %v6935_v8  ;;  %v5130_v6 = vpop.f32.mrb[146].mxu0 }
 0x2eb   : > { %v3471_v46 = vmul.f32 %v6982_v22, %v3392_v0  ;;  %v3395_v58 = vadd.f32 %v5130_v6, %v6943_v31  ;;  %v3386_v56 = vpop.f32.mrb[147].mxu0  ;;  %v3563_v37 = vpack.c.bf16 %v3539_v20, %v3538_v12 }
 0x2ec   : > { %v3469_v1 = vmul.f32 %v6982_v22, %v3384_v41  ;;  %v3387_v49 = vadd.f32 %v3386_v56, %v6937_v60  ;;  %v3562_v50 = vpack.c.bf16 %v3537_v9, %v3536_v33 }
 0x2ed   : > { %v3510_v35 = vadd.f32 %v6990_v52, %v3471_v46  ;;  %v3472_v38 = vmul.f32 %v6982_v22, %v3395_v58 }
 0x2ee   : > { %v3508_v40 = vadd.f32 %v6990_v52, %v3469_v1  ;;  %v3470_v8 = vmul.f32 %v6982_v22, %v3387_v49  ;;  %5171 = vmatprep.mubr.bf16.mxu1 %v3562_v50 }
 0x2ef   : > { %v3511_v21 = vadd.f32 %v6990_v52, %v3472_v38  ;;  %5172 = vmatmul.mubr.bf16.gmra.mrb[140].mxu1 %v3563_v37  ;;  %v3542_v11 = vmax.f32 %v3510_v35, 0.0 }
 0x2f0   : > { %v3509_v31 = vadd.f32 %v6990_v52, %v3470_v8  ;;  %v5133_v32 = vpop.f32.mrb[148].mxu0  ;;  %v3540_v13 = vmax.f32 %v3508_v40, 0.0 }
 0x2f1   : > { %v3543_v43 = vmax.f32 %v3511_v21, 0.0  ;;  %v3408_v60 = vadd.f32 %v5133_v32, %v6953_v57  ;;  %v3399_v26 = vpop.f32.mrb[149].mxu0 }
 0x2f2   : > { %v3541_v39 = vmax.f32 %v3509_v31, 0.0  ;;  %v3400_v5 = vadd.f32 %v3399_v26, %v6947_v54  ;;  %v5134_v53 = vpop.f32.mrb[150].mxu0 }
 0x2f3   : > { %v3475_v4 = vmul.f32 %v6982_v22, %v3408_v60  ;;  %v3411_v17 = vadd.f32 %v5134_v53, %v6955_v29  ;;  %v3402_v16 = vpop.f32.mrb[151].mxu0  ;;  %v3565_v42 = vpack.c.bf16 %v3543_v43, %v3542_v11 }
 0x2f4   : > { %v3473_v15 = vmul.f32 %v6982_v22, %v3400_v5  ;;  %v3403_v23 = vadd.f32 %v3402_v16, %v6949_v19  ;;  %v3564_v30 = vpack.c.bf16 %v3541_v39, %v3540_v13 }
 0x2f5   : > { %v3514_v10 = vadd.f32 %v6990_v52, %v3475_v4  ;;  %v3476_v57 = vmul.f32 %v6982_v22, %v3411_v17 }
 0x2f6   : > { %v3512_v55 = vadd.f32 %v6990_v52, %v3473_v15  ;;  %v3474_v54 = vmul.f32 %v6982_v22, %v3403_v23  ;;  %5175 = vmatprep.mubr.bf16.mxu1 %v3564_v30 }
 0x2f7   : > { %v3515_v3 = vadd.f32 %v6990_v52, %v3476_v57  ;;  %5176 = vmatmul.mubr.bf16.gmra.mrb[144].mxu1 %v3565_v42  ;;  %v3546_v45 = vmax.f32 %v3514_v10, 0.0 }
 0x2f8   : > { %v3513_v29 = vadd.f32 %v6990_v52, %v3474_v54  ;;  %v5137_v14 = vpop.f32.mrb[152].mxu0  ;;  %v3544_v2 = vmax.f32 %v3512_v55, 0.0 }
 0x2f9   : > { %v3547_v34 = vmax.f32 %v3515_v3, 0.0  ;;  %v3424_v19 = vadd.f32 %v5137_v14, %v6965_v61  ;;  %v3415_v18 = vpop.f32.mrb[153].mxu0 }
 0x2fa   : > { %v3545_v27 = vmax.f32 %v3513_v29, 0.0  ;;  %v3416_v62 = vadd.f32 %v3415_v18, %v6959_v36  ;;  %v5138_v24 = vpop.f32.mrb[154].mxu0 }
 0x2fb   : > { %v3479_v47 = vmul.f32 %v6982_v22, %v3424_v19  ;;  %v3427_v59 = vadd.f32 %v5138_v24, %v6967_v63  ;;  %v3418_v12 = vpop.f32.mrb[155].mxu0  ;;  %v3567_v20 = vpack.c.bf16 %v3547_v34, %v3546_v45 }
 0x2fc   : > { %v3477_v0 = vmul.f32 %v6982_v22, %v3416_v62  ;;  %v3419_v28 = vadd.f32 %v3418_v12, %v6961_v7  ;;  %v3566_v33 = vpack.c.bf16 %v3545_v27, %v3544_v2 }
 0x2fd   : > { %v3518_v9 = vadd.f32 %v6990_v52, %v3479_v47  ;;  %v3480_v61 = vmul.f32 %v6982_v22, %v3427_v59 }
 0x2fe   : > { %v3516_v41 = vadd.f32 %v6990_v52, %v3477_v0  ;;  %v3478_v36 = vmul.f32 %v6982_v22, %v3419_v28  ;;  %5179 = vmatprep.mubr.bf16.mxu1 %v3566_v33 }
 0x2ff   : > { %v3519_v6 = vadd.f32 %v6990_v52, %v3480_v61  ;;  %5180 = vmatmul.mubr.bf16.gmra.mrb[148].mxu1 %v3567_v20  ;;  %v3550_v58 = vmax.f32 %v3518_v9, 0.0 }
 0x300   : > { %v3517_v63 = vadd.f32 %v6990_v52, %v3478_v36  ;;  %v5141_v46 = vpop.f32.mrb[156].mxu0  ;;  %v3548_v1 = vmax.f32 %v3516_v41, 0.0 }
 0x301   : > { %v3551_v56 = vmax.f32 %v3519_v6, 0.0  ;;  %v3440_v7 = vadd.f32 %v5141_v46, %v6977_v25  ;;  %v3431_v37 = vpop.f32.mrb[157].mxu0 }
 0x302   : > { %v3549_v49 = vmax.f32 %v3517_v63, 0.0  ;;  %v3432_v50 = vadd.f32 %v3431_v37, %v6971_v48  ;;  %v5142_v35 = vpop.f32.mrb[158].mxu0 }
 0x303   : > { %v3483_v38 = vmul.f32 %v6982_v22, %v3440_v7  ;;  %v3443_v40 = vadd.f32 %v5142_v35, %v6984_v44  ;;  %v3434_v8 = vpop.f32.mrb[159].mxu0  ;;  %v3569_v21 = vpack.c.bf16 %v3551_v56, %v3550_v58 }
 0x304   : > { %v3481_v31 = vmul.f32 %v6982_v22, %v3432_v50  ;;  %v3435_v32 = vadd.f32 %v3434_v8, %v6973_v51  ;;  %v3568_v11 = vpack.c.bf16 %v3549_v49, %v3548_v1 }
 0x305   : > { %v3522_v43 = vadd.f32 %v6990_v52, %v3483_v38  ;;  %v3484_v25 = vmul.f32 %v6982_v22, %v3443_v40 }
 0x306   : > { %v3520_v60 = vadd.f32 %v6990_v52, %v3481_v31  ;;  %v3482_v48 = vmul.f32 %v6982_v22, %v3435_v32  ;;  %5183 = vmatprep.mubr.bf16.mxu1 %v3568_v11  ;;  %v7090_v22 = vld [vmem:[%s7292_s20] ss:$0 sm:$0xff] }
 0x307   : > { %v3523_v26 = vadd.f32 %v6990_v52, %v3484_v25  ;;  %5184 = vmatmul.mubr.bf16.gmra.mrb[152].mxu1 %v3569_v21  ;;  %v3554_v13 = vmax.f32 %v3522_v43, 0.0 }
 0x308   : > { %v3521_v44 = vadd.f32 %v6990_v52, %v3482_v48  ;;  %v3552_v5 = vmax.f32 %v3520_v60, 0.0 }
 0x309   : > { %v3555_v39 = vmax.f32 %v3523_v26, 0.0 }
 0x30a   : > { %v3553_v53 = vmax.f32 %v3521_v44, 0.0 }
 0x30b   : > { %v3571_v51 = vpack.c.bf16 %v3555_v39, %v3554_v13 }
 0x30c   : > { %v3570_v4 = vpack.c.bf16 %v3553_v53, %v3552_v5 }
 0x30e   : > { %5187 = vmatprep.mubr.bf16.mxu1 %v3570_v4 }
 0x30f   : > { %5188 = vmatmul.mubr.bf16.gmra.mrb[156].mxu1 %v3571_v51 }
 0x3aa   : > { %v5161_v17 = vpop.f32.mrb[128].mxu1 }
 0x3ab   : > { %v3677_v16 = vpop.f32.mrb[129].mxu1  ;;  %v3686_v15 = vadd.f32 %v5161_v17, %v7090_v22 }
 0x3ac   : > { %v5162_v42 = vpop.f32.mrb[130].mxu1  ;;  %v3678_v30 = vadd.f32 %v7090_v22, %v3677_v16 }
 0x3ad   : > { %v3689_v52 = vadd.f32 %v5162_v42, %v7090_v22  ;;  %v3680_v23 = vpop.f32.mrb[131].mxu1 }
 0x3ae   : > { %v3681_v10 = vadd.f32 %v7090_v22, %v3680_v23 }
 0x3af   : > { %v4496_v57 = vpack.c.bf16 %v3689_v52, %v3686_v15 }
 0x3b0   : > { %v4491_v55 = vpack.c.bf16 %v3681_v10, %v3678_v30 }
 0x3b1   : > { %4584 = vst [vmem:[%s7098_s21 + $0x8] sm:$0xff] %v4496_v57  }
 0x3b2   : > { %4492 = vst [vmem:[%s7098_s21] sm:$0xff] %v4491_v55   ;;  %v5165_v54 = vpop.f32.mrb[132].mxu1 }
 0x3b3   : > { %v3693_v3 = vpop.f32.mrb[133].mxu1  ;;  %v3702_v14 = vadd.f32 %v5165_v54, %v7090_v22 }
 0x3b4   : > { %v5166_v29 = vpop.f32.mrb[134].mxu1  ;;  %v3694_v19 = vadd.f32 %v7090_v22, %v3693_v3 }
 0x3b5   : > { %v3705_v45 = vadd.f32 %v5166_v29, %v7090_v22  ;;  %v3696_v34 = vpop.f32.mrb[135].mxu1 }
 0x3b6   : > { %v3697_v18 = vadd.f32 %v7090_v22, %v3696_v34 }
 0x3b7   : > { %v4506_v2 = vpack.c.bf16 %v3705_v45, %v3702_v14 }
 0x3b8   : > { %v4501_v27 = vpack.c.bf16 %v3697_v18, %v3694_v19 }
 0x3b9   : > { %4586 = vst [vmem:[%s7098_s21 + $0x18] sm:$0xff] %v4506_v2  }
 0x3ba   : > { %4585 = vst [vmem:[%s7098_s21 + $0x10] sm:$0xff] %v4501_v27   ;;  %v5169_v62 = vpop.f32.mrb[136].mxu1 }
 0x3bb   : > { %v3709_v24 = vpop.f32.mrb[137].mxu1  ;;  %v3718_v59 = vadd.f32 %v5169_v62, %v7090_v22 }
 0x3bc   : > { %v5170_v47 = vpop.f32.mrb[138].mxu1  ;;  %v3710_v0 = vadd.f32 %v7090_v22, %v3709_v24 }
 0x3bd   : > { %v3721_v12 = vadd.f32 %v5170_v47, %v7090_v22  ;;  %v3712_v20 = vpop.f32.mrb[139].mxu1 }
 0x3be   : > { %v3713_v28 = vadd.f32 %v7090_v22, %v3712_v20 }
 0x3bf   : > { %v4516_v33 = vpack.c.bf16 %v3721_v12, %v3718_v59 }
 0x3c0   : > { %v4511_v9 = vpack.c.bf16 %v3713_v28, %v3710_v0 }
 0x3c1   : > { %4588 = vst [vmem:[%s7098_s21 + $0x28] sm:$0xff] %v4516_v33  }
 0x3c2   : > { %4587 = vst [vmem:[%s7098_s21 + $0x20] sm:$0xff] %v4511_v9   ;;  %v5173_v61 = vpop.f32.mrb[140].mxu1 }
 0x3c3   : > { %v3725_v41 = vpop.f32.mrb[141].mxu1  ;;  %v3734_v6 = vadd.f32 %v5173_v61, %v7090_v22 }
 0x3c4   : > { %v5174_v36 = vpop.f32.mrb[142].mxu1  ;;  %v3726_v58 = vadd.f32 %v7090_v22, %v3725_v41 }
 0x3c5   : > { %v3737_v63 = vadd.f32 %v5174_v36, %v7090_v22  ;;  %v3728_v46 = vpop.f32.mrb[143].mxu1 }
 0x3c6   : > { %v3729_v56 = vadd.f32 %v7090_v22, %v3728_v46 }
 0x3c7   : > { %v4526_v7 = vpack.c.bf16 %v3737_v63, %v3734_v6 }
 0x3c8   : > { %v4521_v37 = vpack.c.bf16 %v3729_v56, %v3726_v58 }
 0x3c9   : > { %4590 = vst [vmem:[%s7098_s21 + $0x38] sm:$0xff] %v4526_v7  }
 0x3ca   : > { %4589 = vst [vmem:[%s7098_s21 + $0x30] sm:$0xff] %v4521_v37   ;;  %v5177_v1 = vpop.f32.mrb[144].mxu1 }
 0x3cb   : > { %v3741_v49 = vpop.f32.mrb[145].mxu1  ;;  %v3750_v35 = vadd.f32 %v5177_v1, %v7090_v22 }
 0x3cc   : > { %v5178_v50 = vpop.f32.mrb[146].mxu1  ;;  %v3742_v8 = vadd.f32 %v7090_v22, %v3741_v49 }
 0x3cd   : > { %v3753_v38 = vadd.f32 %v5178_v50, %v7090_v22  ;;  %v3744_v40 = vpop.f32.mrb[147].mxu1 }
 0x3ce   : > { %v3745_v21 = vadd.f32 %v7090_v22, %v3744_v40 }
 0x3cf   : > { %v4536_v31 = vpack.c.bf16 %v3753_v38, %v3750_v35 }
 0x3d0   : > { %v4531_v32 = vpack.c.bf16 %v3745_v21, %v3742_v8 }
 0x3d1   : > { %4592 = vst [vmem:[%s7098_s21 + $0x48] sm:$0xff] %v4536_v31  }
 0x3d2   : > { %4591 = vst [vmem:[%s7098_s21 + $0x40] sm:$0xff] %v4531_v32   ;;  %v5181_v11 = vpop.f32.mrb[148].mxu1 }
 0x3d3   : > { %v3757_v43 = vpop.f32.mrb[149].mxu1  ;;  %v3766_v60 = vadd.f32 %v5181_v11, %v7090_v22 }
 0x3d4   : > { %v5182_v25 = vpop.f32.mrb[150].mxu1  ;;  %v3758_v44 = vadd.f32 %v7090_v22, %v3757_v43 }
 0x3d5   : > { %v3769_v48 = vadd.f32 %v5182_v25, %v7090_v22  ;;  %v3760_v26 = vpop.f32.mrb[151].mxu1 }
 0x3d6   : > { %v3761_v13 = vadd.f32 %v7090_v22, %v3760_v26 }
 0x3d7   : > { %v4546_v39 = vpack.c.bf16 %v3769_v48, %v3766_v60 }
 0x3d8   : > { %v4541_v5 = vpack.c.bf16 %v3761_v13, %v3758_v44 }
 0x3d9   : > { %4594 = vst [vmem:[%s7098_s21 + $0x58] sm:$0xff] %v4546_v39  }
 0x3da   : > { %4593 = vst [vmem:[%s7098_s21 + $0x50] sm:$0xff] %v4541_v5   ;;  %v5185_v53 = vpop.f32.mrb[152].mxu1 }
 0x3db   : > { %v3773_v51 = vpop.f32.mrb[153].mxu1  ;;  %v3782_v17 = vadd.f32 %v5185_v53, %v7090_v22 }
 0x3dc   : > { %v5186_v4 = vpop.f32.mrb[154].mxu1  ;;  %v3774_v15 = vadd.f32 %v7090_v22, %v3773_v51 }
 0x3dd   : > { %v3785_v16 = vadd.f32 %v5186_v4, %v7090_v22  ;;  %v3776_v42 = vpop.f32.mrb[155].mxu1 }
 0x3de   : > { %v3777_v52 = vadd.f32 %v7090_v22, %v3776_v42 }
 0x3df   : > { %v4556_v23 = vpack.c.bf16 %v3785_v16, %v3782_v17 }
 0x3e0   : > { %v4551_v30 = vpack.c.bf16 %v3777_v52, %v3774_v15 }
 0x3e1   : > { %4596 = vst [vmem:[%s7098_s21 + $0x68] sm:$0xff] %v4556_v23  }
 0x3e2   : > { %4595 = vst [vmem:[%s7098_s21 + $0x60] sm:$0xff] %v4551_v30   ;;  %v5189_v10 = vpop.f32.mrb[156].mxu1 }
 0x3e3   : > { %v3789_v57 = vpop.f32.mrb[157].mxu1  ;;  %v3798_v54 = vadd.f32 %v5189_v10, %v7090_v22 }
 0x3e4   : > { %v5190_v55 = vpop.f32.mrb[158].mxu1  ;;  %v3790_v14 = vadd.f32 %v7090_v22, %v3789_v57 }
 0x3e5   : > { %v3801_v3 = vadd.f32 %v5190_v55, %v7090_v22  ;;  %v3792_v29 = vpop.f32.mrb[159].mxu1 }
 0x3e6   : > { %v3793_v45 = vadd.f32 %v7090_v22, %v3792_v29 }
 0x3e7   : > { %v4566_v34 = vpack.c.bf16 %v3801_v3, %v3798_v54 }
 0x3e8   : > { %v4561_v19 = vpack.c.bf16 %v3793_v45, %v3790_v14 }
 0x3e9   : > { %4598 = vst [vmem:[%s7098_s21 + $0x78] sm:$0xff] %v4566_v34  }
 0x3ea   : > { %4597 = vst [vmem:[%s7098_s21 + $0x70] sm:$0xff] %v4561_v19  }
 0x3eb   : > { %5573 = shalt.err (!%p5570_p9)
}
 0x3ec   : > { %s5574_s26 = scalar_lea.hbm %s7147_s22, 2048  ;;  %s5578_s16 = scalar_lea.hbm %s7296_s19, 4096 }
 0x3ed   : > { %p5575_p6 = scmp.ne.s32.totalorder %s7147_s22, %s5574_s26  ;;  %p5579_p3 = scmp.lt.u32.totalorder %s7147_s22, %s7296_s19 }
 0x3ee   : > { %p5580_p7 = scmp.lt.u32.totalorder %s5578_s16, %s5574_s26  ;;  %p5582_p2 = scmp.lt.u32.totalorder %s5574_s26, %s7147_s22 }
 0x3ef   : > { %p5576_p4 = pnand %p5575_p6, %p7297_p11 }
 0x3f0   : > { %p5581_p12 = por %p5580_p7, %p5579_p3 }
 0x3f1   : > { %p5577_p10 = pneg %p5576_p4 }
 0x3f2   : > { %p5583_p0 = por %p5582_p2, %p5581_p12 }
 0x3f4   : > { %p5584_p8 = pnand %p5583_p0, %p5577_p10 }
 0x3f6   : > { %5587 = shalt.err (!%p5584_p8)
}
 0x3f7   : > { %s5661_s28 = smov 64   ;;  %s5662_s20 = smov 4  }
 0x3f8   : > { %5205 = dma.vmem_to_hbm [thread:$0]  (%p7297_p11), %s7149_s5, 2048, %s7147_s22, %s3965_s25, %s5661_s28, %s5661_s28, %s5662_s20  }
 0x3f9 PF: > { %s7298_s21 = sld [smem:[#allocation17_spill]]  ;;  %s7299_s15 = sld [smem:[#allocation23_spill]] }
 0x3fa   : > { %s7300_s27 = sld [smem:[#allocation21_spill]] }
 0x3ff   : > { %s3995_s23 = sand.u32 1, %s7298_s21   ;;  %p7301_p1 = scmp.ne.s32.totalorder %s7299_s15, 0 }
 0x400   : > { %p7302_p13 = scmp.ge.s32.totalorder %s7300_s27, 2  ;;  %s3996_s17 = scalar_lea.sflag [#allocation5], %s3995_s23 }
 0x402   : > { %p5225_p5 = pnand %p7302_p13, %p7301_p1 }
 0x404   : > { %5625 = dma.done.wait (!%p5225_p5), %s3996_s17, 2048  }
 0x405   : > { %5627 = vsyncadd (!%p5225_p5), %s3996_s17, 4294965248  ;;  %s30_s18 = sadd.s32 1, %s7300_s27   ;;  %s7303_s30 = sld [smem:[#allocation18_spill]] }
 0x406   : > { %p27_p9 = scmp.ge.s32.totalorder %s30_s18, 4   ;;  %s7304_s15 = sld [smem:[#allocation25_spill]] }
 0x407   : > { %s7305_s16 = sld [smem:[#allocation20_spill]]  ;;  %s7306_s17 = sld [smem:[#allocation24_spill]] }
 0x408   : > { %s7307_s13 = smov %s5634_s14  ;;  %29 = sbr.rel (!%p27_p9) target bundleno = 15 (0xf), region = 156 }
 0x40b   : > { %s7308_s14 = smov %s7303_s30 }
 0x40f   :  { %4001 = vsyncpa [#allocation4], 1 }
 0x410   :  { %4003 = vsyncpa [#allocation4 + $0x1], 1 }
 0x411   :  { %4004 = vsyncpa [#allocation7], 1 }
 0x412   :  { %4006 = vsyncpa [#allocation7 + $0x1], 1 }
 0x413   :  { %4007 = vsyncpa [#allocation10], 1 }
 0x414   :  { %4008 = vsyncpa [#allocation5], 1 }
 0x415   :  { %4010 = vsyncpa [#allocation5 + $0x1], 1 }

</bundles_post_ra>
